<compile_context>
chip_gen: v5e
topology: v5e:2x2
jax: 0.10.0
libtpu: 0.0.40
codegen_flags: <defaults>
</compile_context>

<pallas_src>
import functools

import jax
import jax.numpy as jnp
from jax import lax
from jax.experimental import pallas as pl
from jax.experimental.pallas import tpu as pltpu


def _round_up(x, m):
    return (x + m - 1) // m * m


# ---------------- kernel 1: batched encoder + x-side gate projection ----------------
def encoder_kernel(obs_ref, prev_ref, w_enc_ref, w_emb_ref, b_enc_ref,
                   wx_ref, bgx_ref, xw_ref):
    # obs_ref: (TM, D_obs) bf16, prev_ref: (TM, A) bf16.  bf16 MXU matmuls, f32 accum.
    x = jnp.dot(obs_ref[...], w_enc_ref[...], preferred_element_type=jnp.float32)
    x = x + jnp.dot(prev_ref[...], w_emb_ref[...], preferred_element_type=jnp.float32)
    x = jnp.maximum(x + b_enc_ref[...], 0.0)                               # (TM, H) f32
    gx = jnp.dot(x.astype(jnp.bfloat16), wx_ref[...],
                 preferred_element_type=jnp.float32) + bgx_ref[...]        # (TM, G) f32
    xw_ref[...] = gx.astype(jnp.bfloat16)                                  # bf16 writeback


# ---------------- kernel 2: sequential masked-GRU recurrence + per-step losses --------
def gru_loss_kernel(H, A, Tb,
                    xw_ref,     # (Tb, 1, Bc, G)   bf16  precomputed x-side gates (r|z|n|pad)
                    side_ref,   # (Tb, 1, Bc, 3+A) f32   packed [mask | valid | dist | gt_onehot]
                    wh_ref,     # (H, G)           bf16  fused hidden-side GRU weights
                    whead_ref,  # (H, P)           bf16  fused [action logits | distance] head
                    bhead_ref,  # (1, P)           f32
                    stats_ref,  # (1, Tb, 3)       f32   out: per-step [ce_sum, mse_sum, n_valid]
                    h_scr):     # (Bc, H)          f32   recurrent hidden state
    tb = pl.program_id(1)

    @pl.when(tb == 0)
    def _():
        h_scr[...] = jnp.zeros_like(h_scr)

    wh = wh_ref[...]
    whead = whead_ref[...]
    bhead = bhead_ref[...]
    step_iota = lax.broadcasted_iota(jnp.int32, (Tb, 1), 0)   # hoisted out of the loop

    def step(i, carry):
        h, s_ce, s_mse, s_nv = carry
        gx = xw_ref[i][0].astype(jnp.float32)                 # (Bc, G)
        side = side_ref[i][0]                                 # (Bc, 3+A)
        mask = side[:, 0:1]
        valid = side[:, 1:2]
        dist = side[:, 2:3]
        gt_oh = side[:, 3:3 + A]

        # masked GRU step: one fused h-side matmul, one 2H-wide sigmoid for r|z
        hm = h * mask
        gh = jnp.dot(hm.astype(jnp.bfloat16), wh, preferred_element_type=jnp.float32)
        rz = jax.nn.sigmoid(gx[:, 0:2 * H] + gh[:, 0:2 * H])
        r = rz[:, 0:H]
        z = rz[:, H:2 * H]
        n = jnp.tanh(gx[:, 2 * H:3 * H] + r * gh[:, 2 * H:3 * H])
        h_new = (1.0 - z) * n + z * hm

        # fused heads: one MXU push per timestep, lane-slice the padded result
        ho = jnp.dot(h_new.astype(jnp.bfloat16), whead,
                     preferred_element_type=jnp.float32) + bhead            # (Bc, P)
        logits = ho[:, 0:A]
        pred_d = ho[:, A:A + 1]

        # per-core PARTIAL sums (normalization over the full batch happens in the wrapper)
        m = jnp.max(logits, axis=-1, keepdims=True)
        lse = m + jnp.log(jnp.sum(jnp.exp(logits - m), axis=-1, keepdims=True))
        logp = logits - lse
        nv = jnp.sum(valid, axis=0, keepdims=True)                          # (1, 1)
        ce = -jnp.sum(jnp.sum(gt_oh * logp * valid, axis=1, keepdims=True),
                      axis=0, keepdims=True)                                # (1, 1)
        mse = jnp.sum((jax.nn.sigmoid(pred_d) - dist) ** 2 * valid,
                      axis=0, keepdims=True)                                # (1, 1)

        row = (step_iota == i).astype(jnp.float32)                          # (Tb, 1)
        return (h_new, s_ce + row * ce, s_mse + row * mse, s_nv + row * nv)

    zeros = jnp.zeros((Tb, 1), jnp.float32)
    h, s_ce, s_mse, s_nv = lax.fori_loop(
        0, Tb, step, (h_scr[...], zeros, zeros, zeros), unroll=True)
    h_scr[...] = h
    stats_ref[0] = jnp.concatenate([s_ce, s_mse, s_nv], axis=-1)            # (Tb, 3)


# ------------------------------------ wrapper ----------------------------------------
@jax.jit
def bc_forward_pallas(obs, prev_oh, mask, gt_oh, valid, dist, params):
    T, B, D_obs = obs.shape
    A = prev_oh.shape[-1]
    H = params["b_enc"].shape[-1]
    G = _round_up(3 * H, 128)        # lane-dense packed GRU gate width (r|z|n|pad)
    P = _round_up(A + 1, 128)        # lane-dense fused head width (logits|dist|pad)

    # ---- static geometry ----
    Tb = min(T, 8)                   # timesteps per serial grid step (fully unrolled)
    T_pad = _round_up(T, Tb)
    NC = 2 if (B >= 2 and B % 2 == 0) else 1   # batch split: feeds both TCs on v7x
    Bc = B // NC
    S = 3 + A

    # ---- pack / pad only the (tiny) parameters; bf16 operands for every matmul ----
    w_enc = params["w_enc"].astype(jnp.bfloat16)                           # (D_obs, H)
    w_emb = params["w_emb"].astype(jnp.bfloat16)                           # (A, H)
    b_enc = params["b_enc"].astype(jnp.float32)                            # (1, H)
    wx_p = jnp.pad(jnp.concatenate([params["wx3"][0], params["wx3"][1],
                                    params["wx3"][2]], axis=1),
                   ((0, 0), (0, G - 3 * H))).astype(jnp.bfloat16)          # (H, G)
    wh_p = jnp.pad(jnp.concatenate([params["wh3"][0], params["wh3"][1],
                                    params["wh3"][2]], axis=1),
                   ((0, 0), (0, G - 3 * H))).astype(jnp.bfloat16)          # (H, G)
    bgx_p = jnp.pad(jnp.concatenate([params["bg3"][0], params["bg3"][1],
                                     params["bg3"][2]], axis=1),
                    ((0, 0), (0, G - 3 * H))).astype(jnp.float32)          # (1, G)
    w_head = jnp.pad(jnp.concatenate([params["w_pi"], params["w_d"]], axis=1),
                     ((0, 0), (0, P - (A + 1)))).astype(jnp.bfloat16)      # (H, P)
    b_head = jnp.pad(jnp.concatenate([params["b_pi"], params["b_d"]], axis=1),
                     ((0, 0), (0, P - (A + 1)))).astype(jnp.float32)       # (1, P)

    # ---- kernel 1: obs streams go straight to the MXU (no wrapper materialization) ----
    if T_pad != T:
        obs = jnp.pad(obs, ((0, T_pad - T), (0, 0), (0, 0)))
        prev_oh = jnp.pad(prev_oh, ((0, T_pad - T), (0, 0), (0, 0)))
    TBp = T_pad * B
    obs2d = obs.astype(jnp.bfloat16).reshape(TBp, D_obs)      # free reshape (no copy)
    prev2d = prev_oh.astype(jnp.bfloat16).reshape(TBp, A)

    if TBp <= 1024:
        TM = TBp                                              # single / full-extent tile
    else:
        TM = 1024                                             # big M tile for HBM roofline
        def vmem_est(tm):                                     # conservative, all x2 buffers
            return (2 * tm * (D_obs + A + G) * 2
                    + 2 * (D_obs * H + A * H + H * G) * 2
                    + 2 * (H + G) * 4)
        while TM > 128 and vmem_est(TM) > 24 * 1024 * 1024:   # fits v7x's 32 MiB scoped VMEM
            TM //= 2

    xw_flat = pl.pallas_call(
        encoder_kernel,
        grid=(pl.cdiv(TBp, TM),),
        in_specs=[
            pl.BlockSpec((TM, D_obs), lambda i: (i, 0)),
            pl.BlockSpec((TM, A), lambda i: (i, 0)),
            pl.BlockSpec((D_obs, H), lambda i: (0, 0)),
            pl.BlockSpec((A, H), lambda i: (0, 0)),
            pl.BlockSpec((1, H), lambda i: (0, 0)),
            pl.BlockSpec((H, G), lambda i: (0, 0)),
            pl.BlockSpec((1, G), lambda i: (0, 0)),
        ],
        out_specs=pl.BlockSpec((TM, G), lambda i: (i, 0)),
        out_shape=jax.ShapeDtypeStruct((TBp, G), jnp.bfloat16),
        compiler_params=pltpu.CompilerParams(
            dimension_semantics=("parallel",),          # shards rows across TCs on v7x
            vmem_limit_bytes=32 * 1024 * 1024),         # raises v5e's 16 MiB default
    )(obs2d, prev2d, w_enc, w_emb, b_enc, wx_p, bgx_p)

    # copy-free handoff: contiguous split of the leading dim only
    xw = xw_flat.reshape(T_pad, NC, Bc, G)

    side = jnp.concatenate([mask, valid, dist, gt_oh], axis=-1).astype(jnp.float32)
    if T_pad != T:
        side = jnp.pad(side, ((0, T_pad - T), (0, 0), (0, 0)))   # padded steps: valid = 0
    side = side.reshape(T_pad, NC, Bc, S)

    kern = functools.partial(gru_loss_kernel, H, A, Tb)
    stats = pl.pallas_call(
        kern,
        grid=(NC, T_pad // Tb),
        in_specs=[
            pl.BlockSpec((Tb, 1, Bc, G), lambda c, t: (t, c, 0, 0)),
            pl.BlockSpec((Tb, 1, Bc, S), lambda c, t: (t, c, 0, 0)),
            pl.BlockSpec((H, G), lambda c, t: (0, 0)),
            pl.BlockSpec((H, P), lambda c, t: (0, 0)),
            pl.BlockSpec((1, P), lambda c, t: (0, 0)),
        ],
        out_specs=pl.BlockSpec((1, Tb, 3), lambda c, t: (c, t, 0)),
        out_shape=jax.ShapeDtypeStruct((NC, T_pad, 3), jnp.float32),
        scratch_shapes=[pltpu.VMEM((Bc, H), jnp.float32)],    # recurrent hidden state
        compiler_params=pltpu.CompilerParams(
            dimension_semantics=("parallel", "arbitrary")),
    )(xw, side, wh_p, w_head, b_head)

    # ---- exact-f32 per-step normalization + means (tiny epilogue over T_pad*3 floats) ----
    tot = jnp.sum(stats, axis=0)                              # combine per-core partials
    ce_t, mse_t, nv_t = tot[:, 0], tot[:, 1], tot[:, 2]
    has_t = (nv_t > 0.0).astype(jnp.float32)
    denom_t = jnp.maximum(nv_t, 1.0)
    n_steps = jnp.maximum(jnp.sum(has_t), 1.0)
    action_loss = jnp.sum(has_t * ce_t / denom_t) / n_steps
    aux_loss2 = jnp.sum(has_t * mse_t / denom_t) / n_steps
    return action_loss, aux_loss2


# ------------------------------ pure-JAX reference ------------------------------------
def bc_forward_ref(obs, prev_oh, mask, gt_oh, valid, dist, params):
    T, B, _ = obs.shape
    H = params["b_enc"].shape[-1]
    obs = obs.astype(jnp.float32)
    w_enc = params["w_enc"].astype(jnp.float32)
    w_emb = params["w_emb"].astype(jnp.float32)
    h = jnp.zeros((B, H), jnp.float32)
    ce_sum = mse_sum = cnt = 0.0
    for t in range(T):
        x = jnp.maximum(obs[t] @ w_enc + prev_oh[t] @ w_emb + params["b_enc"], 0.0)
        hm = h * mask[t]
        r = jax.nn.sigmoid(x @ params["wx3"][0] + hm @ params["wh3"][0] + params["bg3"][0])
        z = jax.nn.sigmoid(x @ params["wx3"][1] + hm @ params["wh3"][1] + params["bg3"][1])
        n = jnp.tanh(x @ params["wx3"][2] + r * (hm @ params["wh3"][2]) + params["bg3"][2])
        h = (1.0 - z) * n + z * hm
        logits = h @ params["w_pi"] + params["b_pi"]
        pred_d = h @ params["w_d"] + params["b_d"]
        logp = jax.nn.log_softmax(logits, axis=-1)
        v = valid[t]
        nv = v.sum()
        ce = -(gt_oh[t] * logp * v).sum() / jnp.maximum(nv, 1.0)
        mse = (((jax.nn.sigmoid(pred_d) - dist[t]) ** 2) * v).sum() / jnp.maximum(nv, 1.0)
        has = (nv > 0).astype(jnp.float32)
        ce_sum += ce * has
        mse_sum += mse * has
        cnt += has
    denom = jnp.maximum(cnt, 1.0)
    return ce_sum / denom, mse_sum / denom


# --------------------------------------- main -----------------------------------------
if __name__ == "__main__":
    B, T = 2, 8
    Himg = Wimg = 16
    NUM_TGT, A, HID = 3, 6, 32

    key = jax.random.PRNGKey(0)
    ks = jax.random.split(key, 16)

    # batch = (demo_rgb, demo_depth, demo_act, positions, rotations, targets,
    #          target_img, scene, start_pose, aux_info)
    demo_rgb = jax.random.uniform(ks[0], (B, T, Himg, Wimg, 3)) * 255.0
    demo_depth = jax.random.uniform(ks[1], (B, T, Himg, Wimg, 1))
    positions = jax.random.normal(ks[2], (B, T, 3))
    targets = jax.random.randint(ks[3], (B, T), 0, NUM_TGT)
    target_img = jax.random.uniform(ks[4], (B, NUM_TGT, Himg, Wimg, 4))
    demo_act = jax.random.randint(ks[5], (B, T), 0, A)
    demo_act = demo_act.at[1, 6:].set(-100)                  # batch 1 padded: lengths = [8, 6]
    aux_distance = jax.random.uniform(ks[6], (B, T))

    # ---- glue: build time-major flattened tensors (reshape/gather only) ----
    target_goal = target_img[jnp.arange(B)[:, None], targets]   # [B, T, H, W, 4]
    obs = jnp.concatenate(
        [demo_rgb.reshape(B, T, -1) / 255.0,
         demo_depth.reshape(B, T, -1),
         target_goal.reshape(B, T, -1),
         positions], axis=-1)                                    # [B, T, D_obs]
    obs = jnp.transpose(obs, (1, 0, 2)).astype(jnp.bfloat16)     # [T, B, D_obs] bf16
    D_obs = obs.shape[-1]

    prev_act = jnp.concatenate(
        [jnp.zeros((B, 1), demo_act.dtype), demo_act[:, :-1]], axis=1)
    prev_act = jnp.where(prev_act < 0, 0, prev_act)              # "-100 in actions -> 0"
    prev_oh = jnp.transpose(jax.nn.one_hot(prev_act, A, dtype=jnp.float32), (1, 0, 2))

    lengths = (demo_act > -10).sum(axis=1)
    mask_bt = (jnp.arange(T)[None, :] < lengths[:, None])
    mask_bt = mask_bt.at[:, 0].set(False)                        # masks[:] = False at t == 0
    mask = jnp.transpose(mask_bt, (1, 0))[:, :, None].astype(jnp.float32)   # [T, B, 1]

    valid = jnp.transpose(demo_act != -100, (1, 0))[:, :, None].astype(jnp.float32)
    gt_oh = jnp.transpose(
        jax.nn.one_hot(jnp.clip(demo_act, 0, A - 1), A, dtype=jnp.float32), (1, 0, 2))
    dist = jnp.transpose(aux_distance, (1, 0))[:, :, None].astype(jnp.float32)

    # ---- deterministic synthetic agent parameters ----
    # Values are kept exactly bf16-representable so the bf16-MXU kernel and the f32
    # reference see identical parameter values (only activation rounding differs).
    def init(k, shape, scale, dtype=jnp.float32):
        w = (jax.random.normal(k, shape) * scale).astype(jnp.bfloat16)
        return w.astype(dtype)

    params = {
        "w_enc": init(ks[7], (D_obs, HID), 0.02, jnp.bfloat16),
        "b_enc": jnp.zeros((1, HID), jnp.float32),
        "w_emb": init(ks[8], (A, HID), 0.1, jnp.bfloat16),
        "wx3": init(ks[9], (3, HID, HID), 0.1),
        "wh3": init(ks[10], (3, HID, HID), 0.1),
        "bg3": jnp.zeros((3, 1, HID), jnp.float32),
        "w_pi": init(ks[11], (HID, A), 0.1),
        "b_pi": jnp.zeros((1, A), jnp.float32),
        "w_d": init(ks[12], (HID, 1), 0.1),
        "b_d": jnp.zeros((1, 1), jnp.float32),
    }

    loss, aux = bc_forward_pallas(obs, prev_oh, mask, gt_oh, valid, dist, params)
    loss, aux = jax.block_until_ready((loss, aux))

    ref_loss, ref_aux = bc_forward_ref(obs, prev_oh, mask, gt_oh, valid, dist, params)
    assert jnp.allclose(loss, ref_loss, rtol=3e-3, atol=3e-3), (loss, ref_loss)
    assert jnp.allclose(aux, ref_aux, rtol=3e-3, atol=3e-3), (aux, ref_aux)

    print("KERNEL_OK")
</pallas_src>

<mosaic_0001>
module attributes {stable_mosaic.version = 11 : i64} {
  func.func @encoder_kernel(%arg0: i32, %arg1: memref<16x2051xbf16, #tpu.memory_space<vmem>>, %arg2: memref<16x6xbf16, #tpu.memory_space<vmem>>, %arg3: memref<2051x32xbf16, #tpu.memory_space<vmem>>, %arg4: memref<6x32xbf16, #tpu.memory_space<vmem>>, %arg5: memref<1x32xf32, #tpu.memory_space<vmem>>, %arg6: memref<32x128xbf16, #tpu.memory_space<vmem>>, %arg7: memref<1x128xf32, #tpu.memory_space<vmem>>, %arg8: memref<16x128xbf16, #tpu.memory_space<vmem>>) attributes {dimension_semantics = [#tpu.dimension_semantics<parallel>], iteration_bounds = array<i64: 1>, scalar_prefetch = 0 : i64, scratch_operands = 0 : i64, tpu.core_type = #tpu.core_type<tc>, window_params = [{transform_indices = @transform_0, window_bounds = array<i64: 16, 2051>}, {transform_indices = @transform_1, window_bounds = array<i64: 16, 6>}, {pipeline_mode = #tpu.pipeline_mode<synchronous>, transform_indices = @transform_2, window_bounds = array<i64: 2051, 32>}, {pipeline_mode = #tpu.pipeline_mode<synchronous>, transform_indices = @transform_3, window_bounds = array<i64: 6, 32>}, {pipeline_mode = #tpu.pipeline_mode<synchronous>, transform_indices = @transform_4, window_bounds = array<i64: 1, 32>}, {pipeline_mode = #tpu.pipeline_mode<synchronous>, transform_indices = @transform_5, window_bounds = array<i64: 32, 128>}, {pipeline_mode = #tpu.pipeline_mode<synchronous>, transform_indices = @transform_6, window_bounds = array<i64: 1, 128>}, {transform_indices = @transform_7, window_bounds = array<i64: 16, 128>}]} {
    %c0 = arith.constant 0 : index
    %c0_0 = arith.constant 0 : index
    %0 = vector.load %arg1[%c0, %c0_0] : memref<16x2051xbf16, #tpu.memory_space<vmem>>, vector<16x2051xbf16>
    %c0_1 = arith.constant 0 : index
    %c0_2 = arith.constant 0 : index
    %1 = vector.load %arg3[%c0_1, %c0_2] : memref<2051x32xbf16, #tpu.memory_space<vmem>>, vector<2051x32xbf16>
    %cst = arith.constant dense<0.000000e+00> : vector<16x32xf32>
    %2 = tpu.matmul %0, %1, %cst {dimension_numbers = #tpu.dot_dimension_numbers<[1], [0], [0], [1], [0, 0, 1, 1], [], []>} : vector<16x2051xbf16>, vector<2051x32xbf16>, vector<16x32xf32> -> vector<16x32xf32>
    %c0_3 = arith.constant 0 : index
    %c0_4 = arith.constant 0 : index
    %3 = vector.load %arg2[%c0_3, %c0_4] : memref<16x6xbf16, #tpu.memory_space<vmem>>, vector<16x6xbf16>
    %c0_5 = arith.constant 0 : index
    %c0_6 = arith.constant 0 : index
    %4 = vector.load %arg4[%c0_5, %c0_6] : memref<6x32xbf16, #tpu.memory_space<vmem>>, vector<6x32xbf16>
    %cst_7 = arith.constant dense<0.000000e+00> : vector<16x32xf32>
    %5 = tpu.matmul %3, %4, %cst_7 {dimension_numbers = #tpu.dot_dimension_numbers<[1], [0], [0], [1], [0, 0, 1, 1], [], []>} : vector<16x6xbf16>, vector<6x32xbf16>, vector<16x32xf32> -> vector<16x32xf32>
    %6 = arith.addf %2, %5 : vector<16x32xf32>
    %c0_8 = arith.constant 0 : index
    %c0_9 = arith.constant 0 : index
    %7 = vector.load %arg5[%c0_8, %c0_9] : memref<1x32xf32, #tpu.memory_space<vmem>>, vector<1x32xf32>
    %8 = vector.broadcast %7 : vector<1x32xf32> to vector<16x32xf32>
    %9 = arith.addf %6, %8 : vector<16x32xf32>
    %cst_10 = arith.constant 0.000000e+00 : f32
    %10 = vector.broadcast %cst_10 : f32 to vector<16x32xf32>
    %11 = arith.maximumf %9, %10 : vector<16x32xf32>
    %12 = arith.truncf %11 : vector<16x32xf32> to vector<16x32xbf16>
    %c0_11 = arith.constant 0 : index
    %c0_12 = arith.constant 0 : index
    %13 = vector.load %arg6[%c0_11, %c0_12] : memref<32x128xbf16, #tpu.memory_space<vmem>>, vector<32x128xbf16>
    %cst_13 = arith.constant dense<0.000000e+00> : vector<16x128xf32>
    %14 = tpu.matmul %12, %13, %cst_13 {dimension_numbers = #tpu.dot_dimension_numbers<[1], [0], [0], [1], [0, 0, 1, 1], [], []>} : vector<16x32xbf16>, vector<32x128xbf16>, vector<16x128xf32> -> vector<16x128xf32>
    %c0_14 = arith.constant 0 : index
    %c0_15 = arith.constant 0 : index
    %15 = vector.load %arg7[%c0_14, %c0_15] : memref<1x128xf32, #tpu.memory_space<vmem>>, vector<1x128xf32>
    %16 = vector.broadcast %15 : vector<1x128xf32> to vector<16x128xf32>
    %17 = arith.addf %14, %16 : vector<16x128xf32>
    %18 = arith.truncf %17 : vector<16x128xf32> to vector<16x128xbf16>
    %c0_16 = arith.constant 0 : index
    %c0_17 = arith.constant 0 : index
    %19 = vector.load %arg8[%c0_16, %c0_17] : memref<16x128xbf16, #tpu.memory_space<vmem>>, vector<16x128xbf16>
    tpu.vector_store %arg8[%c0_16, %c0_17], %18 {strides = array<i32>} : memref<16x128xbf16, #tpu.memory_space<vmem>>, vector<16x128xbf16>,
    return
  }
  func.func @transform_0(%arg0: i32) -> (i32, i32) {
    %c0_i32 = arith.constant 0 : i32
    %c0_i32_0 = arith.constant 0 : i32
    return %arg0, %c0_i32 : i32, i32
  }
  func.func @transform_1(%arg0: i32) -> (i32, i32) {
    %c0_i32 = arith.constant 0 : i32
    %c0_i32_0 = arith.constant 0 : i32
    return %arg0, %c0_i32 : i32, i32
  }
  func.func @transform_2(%arg0: i32) -> (i32, i32) {
    %c0_i32 = arith.constant 0 : i32
    %c0_i32_0 = arith.constant 0 : i32
    %c0_i32_1 = arith.constant 0 : i32
    return %c0_i32, %c0_i32_0 : i32, i32
  }
  func.func @transform_3(%arg0: i32) -> (i32, i32) {
    %c0_i32 = arith.constant 0 : i32
    %c0_i32_0 = arith.constant 0 : i32
    %c0_i32_1 = arith.constant 0 : i32
    return %c0_i32, %c0_i32_0 : i32, i32
  }
  func.func @transform_4(%arg0: i32) -> (i32, i32) {
    %c0_i32 = arith.constant 0 : i32
    %c0_i32_0 = arith.constant 0 : i32
    %c0_i32_1 = arith.constant 0 : i32
    return %c0_i32, %c0_i32_0 : i32, i32
  }
  func.func @transform_5(%arg0: i32) -> (i32, i32) {
    %c0_i32 = arith.constant 0 : i32
    %c0_i32_0 = arith.constant 0 : i32
    %c0_i32_1 = arith.constant 0 : i32
    return %c0_i32, %c0_i32_0 : i32, i32
  }
  func.func @transform_6(%arg0: i32) -> (i32, i32) {
    %c0_i32 = arith.constant 0 : i32
    %c0_i32_0 = arith.constant 0 : i32
    %c0_i32_1 = arith.constant 0 : i32
    return %c0_i32, %c0_i32_0 : i32, i32
  }
  func.func @transform_7(%arg0: i32) -> (i32, i32) {
    %c0_i32 = arith.constant 0 : i32
    %c0_i32_0 = arith.constant 0 : i32
    return %arg0, %c0_i32 : i32, i32
  }
}

module attributes {stable_mosaic.version = 11 : i64} {
  func.func @gru_loss_kernel(%arg0: i32, %arg1: i32, %arg2: memref<8x1x1x128xbf16, #tpu.memory_space<vmem>>, %arg3: memref<8x1x1x9xf32, #tpu.memory_space<vmem>>, %arg4: memref<32x128xbf16, #tpu.memory_space<vmem>>, %arg5: memref<32x128xbf16, #tpu.memory_space<vmem>>, %arg6: memref<1x128xf32, #tpu.memory_space<vmem>>, %arg7: memref<1x8x3xf32, #tpu.memory_space<vmem>>, %arg8: memref<1x32xf32, #tpu.memory_space<vmem>>) attributes {dimension_semantics = [#tpu.dimension_semantics<parallel>, #tpu.dimension_semantics<arbitrary>], iteration_bounds = array<i64: 2, 1>, scalar_prefetch = 0 : i64, scratch_operands = 1 : i64, tpu.core_type = #tpu.core_type<tc>, window_params = [{transform_indices = @transform_0, window_bounds = array<i64: 8, 1, 1, 128>}, {transform_indices = @transform_1, window_bounds = array<i64: 8, 1, 1, 9>}, {pipeline_mode = #tpu.pipeline_mode<synchronous>, transform_indices = @transform_2, window_bounds = array<i64: 32, 128>}, {pipeline_mode = #tpu.pipeline_mode<synchronous>, transform_indices = @transform_3, window_bounds = array<i64: 32, 128>}, {pipeline_mode = #tpu.pipeline_mode<synchronous>, transform_indices = @transform_4, window_bounds = array<i64: 1, 128>}, {transform_indices = @transform_5, window_bounds = array<i64: 1, 8, 3>}]} {
    %c0_i32 = arith.constant 0 : i32
    %0 = arith.cmpi eq, %arg1, %c0_i32 : i32
    %1 = arith.extui %0 : i1 to i32
    %c0_i32_0 = arith.constant 0 : i32
    %2 = arith.cmpi ne, %1, %c0_i32_0 : i32
    scf.if %2 {
      %cst_158 = arith.constant 0.000000e+00 : f32
      %710 = vector.broadcast %cst_158 : f32 to vector<1x32xf32>
      %c0_159 = arith.constant 0 : index
      %c0_160 = arith.constant 0 : index
      %711 = vector.load %arg8[%c0_159, %c0_160] : memref<1x32xf32, #tpu.memory_space<vmem>>, vector<1x32xf32>
      tpu.vector_store %arg8[%c0_159, %c0_160], %710 {strides = array<i32>} : memref<1x32xf32, #tpu.memory_space<vmem>>, vector<1x32xf32>,
    } else {
    }
    %c0 = arith.constant 0 : index
    %c0_1 = arith.constant 0 : index
    %3 = vector.load %arg4[%c0, %c0_1] : memref<32x128xbf16, #tpu.memory_space<vmem>>, vector<32x128xbf16>
    %c0_2 = arith.constant 0 : index
    %c0_3 = arith.constant 0 : index
    %4 = vector.load %arg5[%c0_2, %c0_3] : memref<32x128xbf16, #tpu.memory_space<vmem>>, vector<32x128xbf16>
    %c0_4 = arith.constant 0 : index
    %c0_5 = arith.constant 0 : index
    %5 = vector.load %arg6[%c0_4, %c0_5] : memref<1x128xf32, #tpu.memory_space<vmem>>, vector<1x128xf32>
    %6 = tpu.iota {dimensions = array<i32: 0>} : vector<8x1xi32>
    %cst = arith.constant 0.000000e+00 : f32
    %7 = vector.broadcast %cst : f32 to vector<8x1xf32>
    %c0_6 = arith.constant 0 : index
    %c0_7 = arith.constant 0 : index
    %8 = vector.load %arg8[%c0_6, %c0_7] : memref<1x32xf32, #tpu.memory_space<vmem>>, vector<1x32xf32>
    %c0_i32_8 = arith.constant 0 : i32
    %9 = arith.index_cast %c0_i32_8 : i32 to index
    %c0_9 = arith.constant 0 : index
    %c0_10 = arith.constant 0 : index
    %c0_11 = arith.constant 0 : index
    %10 = vector.load %arg2[%9, %c0_9, %c0_10, %c0_11] : memref<8x1x1x128xbf16, #tpu.memory_space<vmem>>, vector<1x1x1x128xbf16>
    %11 = vector.shape_cast %10 : vector<1x1x1x128xbf16> to vector<1x1x128xbf16>
    %12 = vector.shape_cast %11 : vector<1x1x128xbf16> to vector<1x128xbf16>
    %13 = arith.extf %12 : vector<1x128xbf16> to vector<1x128xf32>
    %14 = arith.index_cast %c0_i32_8 : i32 to index
    %c0_12 = arith.constant 0 : index
    %c0_13 = arith.constant 0 : index
    %c0_14 = arith.constant 0 : index
    %15 = vector.load %arg3[%14, %c0_12, %c0_13, %c0_14] : memref<8x1x1x9xf32, #tpu.memory_space<vmem>>, vector<1x1x1x9xf32>
    %16 = vector.shape_cast %15 : vector<1x1x1x9xf32> to vector<1x1x9xf32>
    %17 = vector.shape_cast %16 : vector<1x1x9xf32> to vector<1x9xf32>
    %18 = vector.extract_strided_slice %17 {offsets = [0, 0], sizes = [1, 1], strides = [1, 1]} : vector<1x9xf32> to vector<1x1xf32>
    %19 = vector.extract_strided_slice %17 {offsets = [0, 1], sizes = [1, 1], strides = [1, 1]} : vector<1x9xf32> to vector<1x1xf32>
    %20 = vector.extract_strided_slice %17 {offsets = [0, 2], sizes = [1, 1], strides = [1, 1]} : vector<1x9xf32> to vector<1x1xf32>
    %21 = vector.extract_strided_slice %17 {offsets = [0, 3], sizes = [1, 6], strides = [1, 1]} : vector<1x9xf32> to vector<1x6xf32>
    %22 = vector.broadcast %18 : vector<1x1xf32> to vector<1x32xf32>
    %23 = arith.mulf %8, %22 : vector<1x32xf32>
    %24 = arith.truncf %23 : vector<1x32xf32> to vector<1x32xbf16>
    %cst_15 = arith.constant dense<0.000000e+00> : vector<1x128xf32>
    %25 = tpu.matmul %24, %3, %cst_15 {dimension_numbers = #tpu.dot_dimension_numbers<[1], [0], [0], [1], [0, 0, 1, 1], [], []>} : vector<1x32xbf16>, vector<32x128xbf16>, vector<1x128xf32> -> vector<1x128xf32>
    %26 = vector.extract_strided_slice %13 {offsets = [0, 0], sizes = [1, 64], strides = [1, 1]} : vector<1x128xf32> to vector<1x64xf32>
    %27 = vector.extract_strided_slice %25 {offsets = [0, 0], sizes = [1, 64], strides = [1, 1]} : vector<1x128xf32> to vector<1x64xf32>
    %28 = arith.addf %26, %27 : vector<1x64xf32>
    %29 = arith.negf %28 : vector<1x64xf32>
    %30 = math.exp %29 : vector<1x64xf32>
    %cst_16 = arith.constant 1.000000e+00 : f32
    %31 = vector.broadcast %cst_16 : f32 to vector<1x64xf32>
    %32 = arith.addf %31, %30 : vector<1x64xf32>
    %33 = arith.divf %31, %32 : vector<1x64xf32>
    %34 = vector.extract_strided_slice %33 {offsets = [0, 0], sizes = [1, 32], strides = [1, 1]} : vector<1x64xf32> to vector<1x32xf32>
    %35 = vector.extract_strided_slice %33 {offsets = [0, 32], sizes = [1, 32], strides = [1, 1]} : vector<1x64xf32> to vector<1x32xf32>
    %36 = vector.extract_strided_slice %13 {offsets = [0, 64], sizes = [1, 32], strides = [1, 1]} : vector<1x128xf32> to vector<1x32xf32>
    %37 = vector.extract_strided_slice %25 {offsets = [0, 64], sizes = [1, 32], strides = [1, 1]} : vector<1x128xf32> to vector<1x32xf32>
    %38 = arith.mulf %34, %37 : vector<1x32xf32>
    %39 = arith.addf %36, %38 : vector<1x32xf32>
    %40 = math.tanh %39 : vector<1x32xf32>
    %cst_17 = arith.constant 1.000000e+00 : f32
    %41 = vector.broadcast %cst_17 : f32 to vector<1x32xf32>
    %42 = arith.subf %41, %35 : vector<1x32xf32>
    %43 = arith.mulf %42, %40 : vector<1x32xf32>
    %44 = arith.mulf %35, %23 : vector<1x32xf32>
    %45 = arith.addf %43, %44 : vector<1x32xf32>
    %46 = arith.truncf %45 : vector<1x32xf32> to vector<1x32xbf16>
    %cst_18 = arith.constant dense<0.000000e+00> : vector<1x128xf32>
    %47 = tpu.matmul %46, %4, %cst_18 {dimension_numbers = #tpu.dot_dimension_numbers<[1], [0], [0], [1], [0, 0, 1, 1], [], []>} : vector<1x32xbf16>, vector<32x128xbf16>, vector<1x128xf32> -> vector<1x128xf32>
    %48 = arith.addf %47, %5 : vector<1x128xf32>
    %49 = vector.extract_strided_slice %48 {offsets = [0, 0], sizes = [1, 6], strides = [1, 1]} : vector<1x128xf32> to vector<1x6xf32>
    %50 = vector.extract_strided_slice %48 {offsets = [0, 6], sizes = [1, 1], strides = [1, 1]} : vector<1x128xf32> to vector<1x1xf32>
    %cst_19 = arith.constant dense<0xFF800000> : vector<1xf32>
    %51 = vector.multi_reduction <maximumf>, %49, %cst_19 [1] : vector<1x6xf32> to vector<1xf32>
    %52 = vector.shape_cast %51 : vector<1xf32> to vector<1x1xf32>
    %53 = vector.broadcast %52 : vector<1x1xf32> to vector<1x6xf32>
    %54 = arith.subf %49, %53 : vector<1x6xf32>
    %55 = math.exp %54 : vector<1x6xf32>
    %cst_20 = arith.constant dense<0.000000e+00> : vector<1xf32>
    %56 = vector.multi_reduction <add>, %55, %cst_20 [1] : vector<1x6xf32> to vector<1xf32>
    %57 = vector.shape_cast %56 : vector<1xf32> to vector<1x1xf32>
    %58 = math.log %57 : vector<1x1xf32>
    %59 = arith.addf %52, %58 : vector<1x1xf32>
    %60 = vector.broadcast %59 : vector<1x1xf32> to vector<1x6xf32>
    %61 = arith.subf %49, %60 : vector<1x6xf32>
    %cst_21 = arith.constant dense<0.000000e+00> : vector<1xf32>
    %62 = vector.multi_reduction <add>, %19, %cst_21 [0] : vector<1x1xf32> to vector<1xf32>
    %63 = vector.shape_cast %62 : vector<1xf32> to vector<1x1xf32>
    %64 = arith.mulf %21, %61 : vector<1x6xf32>
    %65 = vector.broadcast %19 : vector<1x1xf32> to vector<1x6xf32>
    %66 = arith.mulf %64, %65 : vector<1x6xf32>
    %cst_22 = arith.constant dense<0.000000e+00> : vector<1xf32>
    %67 = vector.multi_reduction <add>, %66, %cst_22 [1] : vector<1x6xf32> to vector<1xf32>
    %68 = vector.shape_cast %67 : vector<1xf32> to vector<1x1xf32>
    %cst_23 = arith.constant dense<0.000000e+00> : vector<1xf32>
    %69 = vector.multi_reduction <add>, %68, %cst_23 [0] : vector<1x1xf32> to vector<1xf32>
    %70 = vector.shape_cast %69 : vector<1xf32> to vector<1x1xf32>
    %cst_24 = arith.constant 0.000000e+00 : f32
    %71 = vector.broadcast %cst_24 : f32 to vector<1x1xf32>
    %72 = arith.subf %71, %70 : vector<1x1xf32>
    %73 = arith.negf %50 : vector<1x1xf32>
    %74 = math.exp %73 : vector<1x1xf32>
    %cst_25 = arith.constant 1.000000e+00 : f32
    %75 = vector.broadcast %cst_25 : f32 to vector<1x1xf32>
    %76 = arith.addf %75, %74 : vector<1x1xf32>
    %77 = arith.divf %75, %76 : vector<1x1xf32>
    %78 = arith.subf %77, %20 : vector<1x1xf32>
    %79 = arith.mulf %78, %78 : vector<1x1xf32>
    %80 = arith.mulf %79, %19 : vector<1x1xf32>
    %cst_26 = arith.constant dense<0.000000e+00> : vector<1xf32>
    %81 = vector.multi_reduction <add>, %80, %cst_26 [0] : vector<1x1xf32> to vector<1xf32>
    %82 = vector.shape_cast %81 : vector<1xf32> to vector<1x1xf32>
    %83 = vector.broadcast %c0_i32_8 : i32 to vector<8x1xi32>
    %84 = arith.cmpi eq, %6, %83 : vector<8x1xi32>
    %85 = arith.extui %84 : vector<8x1xi1> to vector<8x1xi32>
    %86 = arith.sitofp %85 : vector<8x1xi32> to vector<8x1xf32>
    %87 = vector.broadcast %72 : vector<1x1xf32> to vector<8x1xf32>
    %88 = arith.mulf %86, %87 : vector<8x1xf32>
    %89 = arith.addf %7, %88 : vector<8x1xf32>
    %90 = vector.broadcast %82 : vector<1x1xf32> to vector<8x1xf32>
    %91 = arith.mulf %86, %90 : vector<8x1xf32>
    %92 = arith.addf %7, %91 : vector<8x1xf32>
    %93 = vector.broadcast %63 : vector<1x1xf32> to vector<8x1xf32>
    %94 = arith.mulf %86, %93 : vector<8x1xf32>
    %95 = arith.addf %7, %94 : vector<8x1xf32>
    %c1_i32 = arith.constant 1 : i32
    %96 = arith.index_cast %c1_i32 : i32 to index
    %c0_27 = arith.constant 0 : index
    %c0_28 = arith.constant 0 : index
    %c0_29 = arith.constant 0 : index
    %97 = vector.load %arg2[%96, %c0_27, %c0_28, %c0_29] : memref<8x1x1x128xbf16, #tpu.memory_space<vmem>>, vector<1x1x1x128xbf16>
    %98 = vector.shape_cast %97 : vector<1x1x1x128xbf16> to vector<1x1x128xbf16>
    %99 = vector.shape_cast %98 : vector<1x1x128xbf16> to vector<1x128xbf16>
    %100 = arith.extf %99 : vector<1x128xbf16> to vector<1x128xf32>
    %101 = arith.index_cast %c1_i32 : i32 to index
    %c0_30 = arith.constant 0 : index
    %c0_31 = arith.constant 0 : index
    %c0_32 = arith.constant 0 : index
    %102 = vector.load %arg3[%101, %c0_30, %c0_31, %c0_32] : memref<8x1x1x9xf32, #tpu.memory_space<vmem>>, vector<1x1x1x9xf32>
    %103 = vector.shape_cast %102 : vector<1x1x1x9xf32> to vector<1x1x9xf32>
    %104 = vector.shape_cast %103 : vector<1x1x9xf32> to vector<1x9xf32>
    %105 = vector.extract_strided_slice %104 {offsets = [0, 0], sizes = [1, 1], strides = [1, 1]} : vector<1x9xf32> to vector<1x1xf32>
    %106 = vector.extract_strided_slice %104 {offsets = [0, 1], sizes = [1, 1], strides = [1, 1]} : vector<1x9xf32> to vector<1x1xf32>
    %107 = vector.extract_strided_slice %104 {offsets = [0, 2], sizes = [1, 1], strides = [1, 1]} : vector<1x9xf32> to vector<1x1xf32>
    %108 = vector.extract_strided_slice %104 {offsets = [0, 3], sizes = [1, 6], strides = [1, 1]} : vector<1x9xf32> to vector<1x6xf32>
    %109 = vector.broadcast %105 : vector<1x1xf32> to vector<1x32xf32>
    %110 = arith.mulf %45, %109 : vector<1x32xf32>
    %111 = arith.truncf %110 : vector<1x32xf32> to vector<1x32xbf16>
    %cst_33 = arith.constant dense<0.000000e+00> : vector<1x128xf32>
    %112 = tpu.matmul %111, %3, %cst_33 {dimension_numbers = #tpu.dot_dimension_numbers<[1], [0], [0], [1], [0, 0, 1, 1], [], []>} : vector<1x32xbf16>, vector<32x128xbf16>, vector<1x128xf32> -> vector<1x128xf32>
    %113 = vector.extract_strided_slice %100 {offsets = [0, 0], sizes = [1, 64], strides = [1, 1]} : vector<1x128xf32> to vector<1x64xf32>
    %114 = vector.extract_strided_slice %112 {offsets = [0, 0], sizes = [1, 64], strides = [1, 1]} : vector<1x128xf32> to vector<1x64xf32>
    %115 = arith.addf %113, %114 : vector<1x64xf32>
    %116 = arith.negf %115 : vector<1x64xf32>
    %117 = math.exp %116 : vector<1x64xf32>
    %cst_34 = arith.constant 1.000000e+00 : f32
    %118 = vector.broadcast %cst_34 : f32 to vector<1x64xf32>
    %119 = arith.addf %118, %117 : vector<1x64xf32>
    %120 = arith.divf %118, %119 : vector<1x64xf32>
    %121 = vector.extract_strided_slice %120 {offsets = [0, 0], sizes = [1, 32], strides = [1, 1]} : vector<1x64xf32> to vector<1x32xf32>
    %122 = vector.extract_strided_slice %120 {offsets = [0, 32], sizes = [1, 32], strides = [1, 1]} : vector<1x64xf32> to vector<1x32xf32>
    %123 = vector.extract_strided_slice %100 {offsets = [0, 64], sizes = [1, 32], strides = [1, 1]} : vector<1x128xf32> to vector<1x32xf32>
    %124 = vector.extract_strided_slice %112 {offsets = [0, 64], sizes = [1, 32], strides = [1, 1]} : vector<1x128xf32> to vector<1x32xf32>
    %125 = arith.mulf %121, %124 : vector<1x32xf32>
    %126 = arith.addf %123, %125 : vector<1x32xf32>
    %127 = math.tanh %126 : vector<1x32xf32>
    %cst_35 = arith.constant 1.000000e+00 : f32
    %128 = vector.broadcast %cst_35 : f32 to vector<1x32xf32>
    %129 = arith.subf %128, %122 : vector<1x32xf32>
    %130 = arith.mulf %129, %127 : vector<1x32xf32>
    %131 = arith.mulf %122, %110 : vector<1x32xf32>
    %132 = arith.addf %130, %131 : vector<1x32xf32>
    %133 = arith.truncf %132 : vector<1x32xf32> to vector<1x32xbf16>
    %cst_36 = arith.constant dense<0.000000e+00> : vector<1x128xf32>
    %134 = tpu.matmul %133, %4, %cst_36 {dimension_numbers = #tpu.dot_dimension_numbers<[1], [0], [0], [1], [0, 0, 1, 1], [], []>} : vector<1x32xbf16>, vector<32x128xbf16>, vector<1x128xf32> -> vector<1x128xf32>
    %135 = arith.addf %134, %5 : vector<1x128xf32>
    %136 = vector.extract_strided_slice %135 {offsets = [0, 0], sizes = [1, 6], strides = [1, 1]} : vector<1x128xf32> to vector<1x6xf32>
    %137 = vector.extract_strided_slice %135 {offsets = [0, 6], sizes = [1, 1], strides = [1, 1]} : vector<1x128xf32> to vector<1x1xf32>
    %cst_37 = arith.constant dense<0xFF800000> : vector<1xf32>
    %138 = vector.multi_reduction <maximumf>, %136, %cst_37 [1] : vector<1x6xf32> to vector<1xf32>
    %139 = vector.shape_cast %138 : vector<1xf32> to vector<1x1xf32>
    %140 = vector.broadcast %139 : vector<1x1xf32> to vector<1x6xf32>
    %141 = arith.subf %136, %140 : vector<1x6xf32>
    %142 = math.exp %141 : vector<1x6xf32>
    %cst_38 = arith.constant dense<0.000000e+00> : vector<1xf32>
    %143 = vector.multi_reduction <add>, %142, %cst_38 [1] : vector<1x6xf32> to vector<1xf32>
    %144 = vector.shape_cast %143 : vector<1xf32> to vector<1x1xf32>
    %145 = math.log %144 : vector<1x1xf32>
    %146 = arith.addf %139, %145 : vector<1x1xf32>
    %147 = vector.broadcast %146 : vector<1x1xf32> to vector<1x6xf32>
    %148 = arith.subf %136, %147 : vector<1x6xf32>
    %cst_39 = arith.constant dense<0.000000e+00> : vector<1xf32>
    %149 = vector.multi_reduction <add>, %106, %cst_39 [0] : vector<1x1xf32> to vector<1xf32>
    %150 = vector.shape_cast %149 : vector<1xf32> to vector<1x1xf32>
    %151 = arith.mulf %108, %148 : vector<1x6xf32>
    %152 = vector.broadcast %106 : vector<1x1xf32> to vector<1x6xf32>
    %153 = arith.mulf %151, %152 : vector<1x6xf32>
    %cst_40 = arith.constant dense<0.000000e+00> : vector<1xf32>
    %154 = vector.multi_reduction <add>, %153, %cst_40 [1] : vector<1x6xf32> to vector<1xf32>
    %155 = vector.shape_cast %154 : vector<1xf32> to vector<1x1xf32>
    %cst_41 = arith.constant dense<0.000000e+00> : vector<1xf32>
    %156 = vector.multi_reduction <add>, %155, %cst_41 [0] : vector<1x1xf32> to vector<1xf32>
    %157 = vector.shape_cast %156 : vector<1xf32> to vector<1x1xf32>
    %cst_42 = arith.constant 0.000000e+00 : f32
    %158 = vector.broadcast %cst_42 : f32 to vector<1x1xf32>
    %159 = arith.subf %158, %157 : vector<1x1xf32>
    %160 = arith.negf %137 : vector<1x1xf32>
    %161 = math.exp %160 : vector<1x1xf32>
    %cst_43 = arith.constant 1.000000e+00 : f32
    %162 = vector.broadcast %cst_43 : f32 to vector<1x1xf32>
    %163 = arith.addf %162, %161 : vector<1x1xf32>
    %164 = arith.divf %162, %163 : vector<1x1xf32>
    %165 = arith.subf %164, %107 : vector<1x1xf32>
    %166 = arith.mulf %165, %165 : vector<1x1xf32>
    %167 = arith.mulf %166, %106 : vector<1x1xf32>
    %cst_44 = arith.constant dense<0.000000e+00> : vector<1xf32>
    %168 = vector.multi_reduction <add>, %167, %cst_44 [0] : vector<1x1xf32> to vector<1xf32>
    %169 = vector.shape_cast %168 : vector<1xf32> to vector<1x1xf32>
    %170 = vector.broadcast %c1_i32 : i32 to vector<8x1xi32>
    %171 = arith.cmpi eq, %6, %170 : vector<8x1xi32>
    %172 = arith.extui %171 : vector<8x1xi1> to vector<8x1xi32>
    %173 = arith.sitofp %172 : vector<8x1xi32> to vector<8x1xf32>
    %174 = vector.broadcast %159 : vector<1x1xf32> to vector<8x1xf32>
    %175 = arith.mulf %173, %174 : vector<8x1xf32>
    %176 = arith.addf %89, %175 : vector<8x1xf32>
    %177 = vector.broadcast %169 : vector<1x1xf32> to vector<8x1xf32>
    %178 = arith.mulf %173, %177 : vector<8x1xf32>
    %179 = arith.addf %92, %178 : vector<8x1xf32>
    %180 = vector.broadcast %150 : vector<1x1xf32> to vector<8x1xf32>
    %181 = arith.mulf %173, %180 : vector<8x1xf32>
    %182 = arith.addf %95, %181 : vector<8x1xf32>
    %c2_i32 = arith.constant 2 : i32
    %183 = arith.index_cast %c2_i32 : i32 to index
    %c0_45 = arith.constant 0 : index
    %c0_46 = arith.constant 0 : index
    %c0_47 = arith.constant 0 : index
    %184 = vector.load %arg2[%183, %c0_45, %c0_46, %c0_47] : memref<8x1x1x128xbf16, #tpu.memory_space<vmem>>, vector<1x1x1x128xbf16>
    %185 = vector.shape_cast %184 : vector<1x1x1x128xbf16> to vector<1x1x128xbf16>
    %186 = vector.shape_cast %185 : vector<1x1x128xbf16> to vector<1x128xbf16>
    %187 = arith.extf %186 : vector<1x128xbf16> to vector<1x128xf32>
    %188 = arith.index_cast %c2_i32 : i32 to index
    %c0_48 = arith.constant 0 : index
    %c0_49 = arith.constant 0 : index
    %c0_50 = arith.constant 0 : index
    %189 = vector.load %arg3[%188, %c0_48, %c0_49, %c0_50] : memref<8x1x1x9xf32, #tpu.memory_space<vmem>>, vector<1x1x1x9xf32>
    %190 = vector.shape_cast %189 : vector<1x1x1x9xf32> to vector<1x1x9xf32>
    %191 = vector.shape_cast %190 : vector<1x1x9xf32> to vector<1x9xf32>
    %192 = vector.extract_strided_slice %191 {offsets = [0, 0], sizes = [1, 1], strides = [1, 1]} : vector<1x9xf32> to vector<1x1xf32>
    %193 = vector.extract_strided_slice %191 {offsets = [0, 1], sizes = [1, 1], strides = [1, 1]} : vector<1x9xf32> to vector<1x1xf32>
    %194 = vector.extract_strided_slice %191 {offsets = [0, 2], sizes = [1, 1], strides = [1, 1]} : vector<1x9xf32> to vector<1x1xf32>
    %195 = vector.extract_strided_slice %191 {offsets = [0, 3], sizes = [1, 6], strides = [1, 1]} : vector<1x9xf32> to vector<1x6xf32>
    %196 = vector.broadcast %192 : vector<1x1xf32> to vector<1x32xf32>
    %197 = arith.mulf %132, %196 : vector<1x32xf32>
    %198 = arith.truncf %197 : vector<1x32xf32> to vector<1x32xbf16>
    %cst_51 = arith.constant dense<0.000000e+00> : vector<1x128xf32>
    %199 = tpu.matmul %198, %3, %cst_51 {dimension_numbers = #tpu.dot_dimension_numbers<[1], [0], [0], [1], [0, 0, 1, 1], [], []>} : vector<1x32xbf16>, vector<32x128xbf16>, vector<1x128xf32> -> vector<1x128xf32>
    %200 = vector.extract_strided_slice %187 {offsets = [0, 0], sizes = [1, 64], strides = [1, 1]} : vector<1x128xf32> to vector<1x64xf32>
    %201 = vector.extract_strided_slice %199 {offsets = [0, 0], sizes = [1, 64], strides = [1, 1]} : vector<1x128xf32> to vector<1x64xf32>
    %202 = arith.addf %200, %201 : vector<1x64xf32>
    %203 = arith.negf %202 : vector<1x64xf32>
    %204 = math.exp %203 : vector<1x64xf32>
    %cst_52 = arith.constant 1.000000e+00 : f32
    %205 = vector.broadcast %cst_52 : f32 to vector<1x64xf32>
    %206 = arith.addf %205, %204 : vector<1x64xf32>
    %207 = arith.divf %205, %206 : vector<1x64xf32>
    %208 = vector.extract_strided_slice %207 {offsets = [0, 0], sizes = [1, 32], strides = [1, 1]} : vector<1x64xf32> to vector<1x32xf32>
    %209 = vector.extract_strided_slice %207 {offsets = [0, 32], sizes = [1, 32], strides = [1, 1]} : vector<1x64xf32> to vector<1x32xf32>
    %210 = vector.extract_strided_slice %187 {offsets = [0, 64], sizes = [1, 32], strides = [1, 1]} : vector<1x128xf32> to vector<1x32xf32>
    %211 = vector.extract_strided_slice %199 {offsets = [0, 64], sizes = [1, 32], strides = [1, 1]} : vector<1x128xf32> to vector<1x32xf32>
    %212 = arith.mulf %208, %211 : vector<1x32xf32>
    %213 = arith.addf %210, %212 : vector<1x32xf32>
    %214 = math.tanh %213 : vector<1x32xf32>
    %cst_53 = arith.constant 1.000000e+00 : f32
    %215 = vector.broadcast %cst_53 : f32 to vector<1x32xf32>
    %216 = arith.subf %215, %209 : vector<1x32xf32>
    %217 = arith.mulf %216, %214 : vector<1x32xf32>
    %218 = arith.mulf %209, %197 : vector<1x32xf32>
    %219 = arith.addf %217, %218 : vector<1x32xf32>
    %220 = arith.truncf %219 : vector<1x32xf32> to vector<1x32xbf16>
    %cst_54 = arith.constant dense<0.000000e+00> : vector<1x128xf32>
    %221 = tpu.matmul %220, %4, %cst_54 {dimension_numbers = #tpu.dot_dimension_numbers<[1], [0], [0], [1], [0, 0, 1, 1], [], []>} : vector<1x32xbf16>, vector<32x128xbf16>, vector<1x128xf32> -> vector<1x128xf32>
    %222 = arith.addf %221, %5 : vector<1x128xf32>
    %223 = vector.extract_strided_slice %222 {offsets = [0, 0], sizes = [1, 6], strides = [1, 1]} : vector<1x128xf32> to vector<1x6xf32>
    %224 = vector.extract_strided_slice %222 {offsets = [0, 6], sizes = [1, 1], strides = [1, 1]} : vector<1x128xf32> to vector<1x1xf32>
    %cst_55 = arith.constant dense<0xFF800000> : vector<1xf32>
    %225 = vector.multi_reduction <maximumf>, %223, %cst_55 [1] : vector<1x6xf32> to vector<1xf32>
    %226 = vector.shape_cast %225 : vector<1xf32> to vector<1x1xf32>
    %227 = vector.broadcast %226 : vector<1x1xf32> to vector<1x6xf32>
    %228 = arith.subf %223, %227 : vector<1x6xf32>
    %229 = math.exp %228 : vector<1x6xf32>
    %cst_56 = arith.constant dense<0.000000e+00> : vector<1xf32>
    %230 = vector.multi_reduction <add>, %229, %cst_56 [1] : vector<1x6xf32> to vector<1xf32>
    %231 = vector.shape_cast %230 : vector<1xf32> to vector<1x1xf32>
    %232 = math.log %231 : vector<1x1xf32>
    %233 = arith.addf %226, %232 : vector<1x1xf32>
    %234 = vector.broadcast %233 : vector<1x1xf32> to vector<1x6xf32>
    %235 = arith.subf %223, %234 : vector<1x6xf32>
    %cst_57 = arith.constant dense<0.000000e+00> : vector<1xf32>
    %236 = vector.multi_reduction <add>, %193, %cst_57 [0] : vector<1x1xf32> to vector<1xf32>
    %237 = vector.shape_cast %236 : vector<1xf32> to vector<1x1xf32>
    %238 = arith.mulf %195, %235 : vector<1x6xf32>
    %239 = vector.broadcast %193 : vector<1x1xf32> to vector<1x6xf32>
    %240 = arith.mulf %238, %239 : vector<1x6xf32>
    %cst_58 = arith.constant dense<0.000000e+00> : vector<1xf32>
    %241 = vector.multi_reduction <add>, %240, %cst_58 [1] : vector<1x6xf32> to vector<1xf32>
    %242 = vector.shape_cast %241 : vector<1xf32> to vector<1x1xf32>
    %cst_59 = arith.constant dense<0.000000e+00> : vector<1xf32>
    %243 = vector.multi_reduction <add>, %242, %cst_59 [0] : vector<1x1xf32> to vector<1xf32>
    %244 = vector.shape_cast %243 : vector<1xf32> to vector<1x1xf32>
    %cst_60 = arith.constant 0.000000e+00 : f32
    %245 = vector.broadcast %cst_60 : f32 to vector<1x1xf32>
    %246 = arith.subf %245, %244 : vector<1x1xf32>
    %247 = arith.negf %224 : vector<1x1xf32>
    %248 = math.exp %247 : vector<1x1xf32>
    %cst_61 = arith.constant 1.000000e+00 : f32
    %249 = vector.broadcast %cst_61 : f32 to vector<1x1xf32>
    %250 = arith.addf %249, %248 : vector<1x1xf32>
    %251 = arith.divf %249, %250 : vector<1x1xf32>
    %252 = arith.subf %251, %194 : vector<1x1xf32>
    %253 = arith.mulf %252, %252 : vector<1x1xf32>
    %254 = arith.mulf %253, %193 : vector<1x1xf32>
    %cst_62 = arith.constant dense<0.000000e+00> : vector<1xf32>
    %255 = vector.multi_reduction <add>, %254, %cst_62 [0] : vector<1x1xf32> to vector<1xf32>
    %256 = vector.shape_cast %255 : vector<1xf32> to vector<1x1xf32>
    %257 = vector.broadcast %c2_i32 : i32 to vector<8x1xi32>
    %258 = arith.cmpi eq, %6, %257 : vector<8x1xi32>
    %259 = arith.extui %258 : vector<8x1xi1> to vector<8x1xi32>
    %260 = arith.sitofp %259 : vector<8x1xi32> to vector<8x1xf32>
    %261 = vector.broadcast %246 : vector<1x1xf32> to vector<8x1xf32>
    %262 = arith.mulf %260, %261 : vector<8x1xf32>
    %263 = arith.addf %176, %262 : vector<8x1xf32>
    %264 = vector.broadcast %256 : vector<1x1xf32> to vector<8x1xf32>
    %265 = arith.mulf %260, %264 : vector<8x1xf32>
    %266 = arith.addf %179, %265 : vector<8x1xf32>
    %267 = vector.broadcast %237 : vector<1x1xf32> to vector<8x1xf32>
    %268 = arith.mulf %260, %267 : vector<8x1xf32>
    %269 = arith.addf %182, %268 : vector<8x1xf32>
    %c3_i32 = arith.constant 3 : i32
    %270 = arith.index_cast %c3_i32 : i32 to index
    %c0_63 = arith.constant 0 : index
    %c0_64 = arith.constant 0 : index
    %c0_65 = arith.constant 0 : index
    %271 = vector.load %arg2[%270, %c0_63, %c0_64, %c0_65] : memref<8x1x1x128xbf16, #tpu.memory_space<vmem>>, vector<1x1x1x128xbf16>
    %272 = vector.shape_cast %271 : vector<1x1x1x128xbf16> to vector<1x1x128xbf16>
    %273 = vector.shape_cast %272 : vector<1x1x128xbf16> to vector<1x128xbf16>
    %274 = arith.extf %273 : vector<1x128xbf16> to vector<1x128xf32>
    %275 = arith.index_cast %c3_i32 : i32 to index
    %c0_66 = arith.constant 0 : index
    %c0_67 = arith.constant 0 : index
    %c0_68 = arith.constant 0 : index
    %276 = vector.load %arg3[%275, %c0_66, %c0_67, %c0_68] : memref<8x1x1x9xf32, #tpu.memory_space<vmem>>, vector<1x1x1x9xf32>
    %277 = vector.shape_cast %276 : vector<1x1x1x9xf32> to vector<1x1x9xf32>
    %278 = vector.shape_cast %277 : vector<1x1x9xf32> to vector<1x9xf32>
    %279 = vector.extract_strided_slice %278 {offsets = [0, 0], sizes = [1, 1], strides = [1, 1]} : vector<1x9xf32> to vector<1x1xf32>
    %280 = vector.extract_strided_slice %278 {offsets = [0, 1], sizes = [1, 1], strides = [1, 1]} : vector<1x9xf32> to vector<1x1xf32>
    %281 = vector.extract_strided_slice %278 {offsets = [0, 2], sizes = [1, 1], strides = [1, 1]} : vector<1x9xf32> to vector<1x1xf32>
    %282 = vector.extract_strided_slice %278 {offsets = [0, 3], sizes = [1, 6], strides = [1, 1]} : vector<1x9xf32> to vector<1x6xf32>
    %283 = vector.broadcast %279 : vector<1x1xf32> to vector<1x32xf32>
    %284 = arith.mulf %219, %283 : vector<1x32xf32>
    %285 = arith.truncf %284 : vector<1x32xf32> to vector<1x32xbf16>
    %cst_69 = arith.constant dense<0.000000e+00> : vector<1x128xf32>
    %286 = tpu.matmul %285, %3, %cst_69 {dimension_numbers = #tpu.dot_dimension_numbers<[1], [0], [0], [1], [0, 0, 1, 1], [], []>} : vector<1x32xbf16>, vector<32x128xbf16>, vector<1x128xf32> -> vector<1x128xf32>
    %287 = vector.extract_strided_slice %274 {offsets = [0, 0], sizes = [1, 64], strides = [1, 1]} : vector<1x128xf32> to vector<1x64xf32>
    %288 = vector.extract_strided_slice %286 {offsets = [0, 0], sizes = [1, 64], strides = [1, 1]} : vector<1x128xf32> to vector<1x64xf32>
    %289 = arith.addf %287, %288 : vector<1x64xf32>
    %290 = arith.negf %289 : vector<1x64xf32>
    %291 = math.exp %290 : vector<1x64xf32>
    %cst_70 = arith.constant 1.000000e+00 : f32
    %292 = vector.broadcast %cst_70 : f32 to vector<1x64xf32>
    %293 = arith.addf %292, %291 : vector<1x64xf32>
    %294 = arith.divf %292, %293 : vector<1x64xf32>
    %295 = vector.extract_strided_slice %294 {offsets = [0, 0], sizes = [1, 32], strides = [1, 1]} : vector<1x64xf32> to vector<1x32xf32>
    %296 = vector.extract_strided_slice %294 {offsets = [0, 32], sizes = [1, 32], strides = [1, 1]} : vector<1x64xf32> to vector<1x32xf32>
    %297 = vector.extract_strided_slice %274 {offsets = [0, 64], sizes = [1, 32], strides = [1, 1]} : vector<1x128xf32> to vector<1x32xf32>
    %298 = vector.extract_strided_slice %286 {offsets = [0, 64], sizes = [1, 32], strides = [1, 1]} : vector<1x128xf32> to vector<1x32xf32>
    %299 = arith.mulf %295, %298 : vector<1x32xf32>
    %300 = arith.addf %297, %299 : vector<1x32xf32>
    %301 = math.tanh %300 : vector<1x32xf32>
    %cst_71 = arith.constant 1.000000e+00 : f32
    %302 = vector.broadcast %cst_71 : f32 to vector<1x32xf32>
    %303 = arith.subf %302, %296 : vector<1x32xf32>
    %304 = arith.mulf %303, %301 : vector<1x32xf32>
    %305 = arith.mulf %296, %284 : vector<1x32xf32>
    %306 = arith.addf %304, %305 : vector<1x32xf32>
    %307 = arith.truncf %306 : vector<1x32xf32> to vector<1x32xbf16>
    %cst_72 = arith.constant dense<0.000000e+00> : vector<1x128xf32>
    %308 = tpu.matmul %307, %4, %cst_72 {dimension_numbers = #tpu.dot_dimension_numbers<[1], [0], [0], [1], [0, 0, 1, 1], [], []>} : vector<1x32xbf16>, vector<32x128xbf16>, vector<1x128xf32> -> vector<1x128xf32>
    %309 = arith.addf %308, %5 : vector<1x128xf32>
    %310 = vector.extract_strided_slice %309 {offsets = [0, 0], sizes = [1, 6], strides = [1, 1]} : vector<1x128xf32> to vector<1x6xf32>
    %311 = vector.extract_strided_slice %309 {offsets = [0, 6], sizes = [1, 1], strides = [1, 1]} : vector<1x128xf32> to vector<1x1xf32>
    %cst_73 = arith.constant dense<0xFF800000> : vector<1xf32>
    %312 = vector.multi_reduction <maximumf>, %310, %cst_73 [1] : vector<1x6xf32> to vector<1xf32>
    %313 = vector.shape_cast %312 : vector<1xf32> to vector<1x1xf32>
    %314 = vector.broadcast %313 : vector<1x1xf32> to vector<1x6xf32>
    %315 = arith.subf %310, %314 : vector<1x6xf32>
    %316 = math.exp %315 : vector<1x6xf32>
    %cst_74 = arith.constant dense<0.000000e+00> : vector<1xf32>
    %317 = vector.multi_reduction <add>, %316, %cst_74 [1] : vector<1x6xf32> to vector<1xf32>
    %318 = vector.shape_cast %317 : vector<1xf32> to vector<1x1xf32>
    %319 = math.log %318 : vector<1x1xf32>
    %320 = arith.addf %313, %319 : vector<1x1xf32>
    %321 = vector.broadcast %320 : vector<1x1xf32> to vector<1x6xf32>
    %322 = arith.subf %310, %321 : vector<1x6xf32>
    %cst_75 = arith.constant dense<0.000000e+00> : vector<1xf32>
    %323 = vector.multi_reduction <add>, %280, %cst_75 [0] : vector<1x1xf32> to vector<1xf32>
    %324 = vector.shape_cast %323 : vector<1xf32> to vector<1x1xf32>
    %325 = arith.mulf %282, %322 : vector<1x6xf32>
    %326 = vector.broadcast %280 : vector<1x1xf32> to vector<1x6xf32>
    %327 = arith.mulf %325, %326 : vector<1x6xf32>
    %cst_76 = arith.constant dense<0.000000e+00> : vector<1xf32>
    %328 = vector.multi_reduction <add>, %327, %cst_76 [1] : vector<1x6xf32> to vector<1xf32>
    %329 = vector.shape_cast %328 : vector<1xf32> to vector<1x1xf32>
    %cst_77 = arith.constant dense<0.000000e+00> : vector<1xf32>
    %330 = vector.multi_reduction <add>, %329, %cst_77 [0] : vector<1x1xf32> to vector<1xf32>
    %331 = vector.shape_cast %330 : vector<1xf32> to vector<1x1xf32>
    %cst_78 = arith.constant 0.000000e+00 : f32
    %332 = vector.broadcast %cst_78 : f32 to vector<1x1xf32>
    %333 = arith.subf %332, %331 : vector<1x1xf32>
    %334 = arith.negf %311 : vector<1x1xf32>
    %335 = math.exp %334 : vector<1x1xf32>
    %cst_79 = arith.constant 1.000000e+00 : f32
    %336 = vector.broadcast %cst_79 : f32 to vector<1x1xf32>
    %337 = arith.addf %336, %335 : vector<1x1xf32>
    %338 = arith.divf %336, %337 : vector<1x1xf32>
    %339 = arith.subf %338, %281 : vector<1x1xf32>
    %340 = arith.mulf %339, %339 : vector<1x1xf32>
    %341 = arith.mulf %340, %280 : vector<1x1xf32>
    %cst_80 = arith.constant dense<0.000000e+00> : vector<1xf32>
    %342 = vector.multi_reduction <add>, %341, %cst_80 [0] : vector<1x1xf32> to vector<1xf32>
    %343 = vector.shape_cast %342 : vector<1xf32> to vector<1x1xf32>
    %344 = vector.broadcast %c3_i32 : i32 to vector<8x1xi32>
    %345 = arith.cmpi eq, %6, %344 : vector<8x1xi32>
    %346 = arith.extui %345 : vector<8x1xi1> to vector<8x1xi32>
    %347 = arith.sitofp %346 : vector<8x1xi32> to vector<8x1xf32>
    %348 = vector.broadcast %333 : vector<1x1xf32> to vector<8x1xf32>
    %349 = arith.mulf %347, %348 : vector<8x1xf32>
    %350 = arith.addf %263, %349 : vector<8x1xf32>
    %351 = vector.broadcast %343 : vector<1x1xf32> to vector<8x1xf32>
    %352 = arith.mulf %347, %351 : vector<8x1xf32>
    %353 = arith.addf %266, %352 : vector<8x1xf32>
    %354 = vector.broadcast %324 : vector<1x1xf32> to vector<8x1xf32>
    %355 = arith.mulf %347, %354 : vector<8x1xf32>
    %356 = arith.addf %269, %355 : vector<8x1xf32>
    %c4_i32 = arith.constant 4 : i32
    %357 = arith.index_cast %c4_i32 : i32 to index
    %c0_81 = arith.constant 0 : index
    %c0_82 = arith.constant 0 : index
    %c0_83 = arith.constant 0 : index
    %358 = vector.load %arg2[%357, %c0_81, %c0_82, %c0_83] : memref<8x1x1x128xbf16, #tpu.memory_space<vmem>>, vector<1x1x1x128xbf16>
    %359 = vector.shape_cast %358 : vector<1x1x1x128xbf16> to vector<1x1x128xbf16>
    %360 = vector.shape_cast %359 : vector<1x1x128xbf16> to vector<1x128xbf16>
    %361 = arith.extf %360 : vector<1x128xbf16> to vector<1x128xf32>
    %362 = arith.index_cast %c4_i32 : i32 to index
    %c0_84 = arith.constant 0 : index
    %c0_85 = arith.constant 0 : index
    %c0_86 = arith.constant 0 : index
    %363 = vector.load %arg3[%362, %c0_84, %c0_85, %c0_86] : memref<8x1x1x9xf32, #tpu.memory_space<vmem>>, vector<1x1x1x9xf32>
    %364 = vector.shape_cast %363 : vector<1x1x1x9xf32> to vector<1x1x9xf32>
    %365 = vector.shape_cast %364 : vector<1x1x9xf32> to vector<1x9xf32>
    %366 = vector.extract_strided_slice %365 {offsets = [0, 0], sizes = [1, 1], strides = [1, 1]} : vector<1x9xf32> to vector<1x1xf32>
    %367 = vector.extract_strided_slice %365 {offsets = [0, 1], sizes = [1, 1], strides = [1, 1]} : vector<1x9xf32> to vector<1x1xf32>
    %368 = vector.extract_strided_slice %365 {offsets = [0, 2], sizes = [1, 1], strides = [1, 1]} : vector<1x9xf32> to vector<1x1xf32>
    %369 = vector.extract_strided_slice %365 {offsets = [0, 3], sizes = [1, 6], strides = [1, 1]} : vector<1x9xf32> to vector<1x6xf32>
    %370 = vector.broadcast %366 : vector<1x1xf32> to vector<1x32xf32>
    %371 = arith.mulf %306, %370 : vector<1x32xf32>
    %372 = arith.truncf %371 : vector<1x32xf32> to vector<1x32xbf16>
    %cst_87 = arith.constant dense<0.000000e+00> : vector<1x128xf32>
    %373 = tpu.matmul %372, %3, %cst_87 {dimension_numbers = #tpu.dot_dimension_numbers<[1], [0], [0], [1], [0, 0, 1, 1], [], []>} : vector<1x32xbf16>, vector<32x128xbf16>, vector<1x128xf32> -> vector<1x128xf32>
    %374 = vector.extract_strided_slice %361 {offsets = [0, 0], sizes = [1, 64], strides = [1, 1]} : vector<1x128xf32> to vector<1x64xf32>
    %375 = vector.extract_strided_slice %373 {offsets = [0, 0], sizes = [1, 64], strides = [1, 1]} : vector<1x128xf32> to vector<1x64xf32>
    %376 = arith.addf %374, %375 : vector<1x64xf32>
    %377 = arith.negf %376 : vector<1x64xf32>
    %378 = math.exp %377 : vector<1x64xf32>
    %cst_88 = arith.constant 1.000000e+00 : f32
    %379 = vector.broadcast %cst_88 : f32 to vector<1x64xf32>
    %380 = arith.addf %379, %378 : vector<1x64xf32>
    %381 = arith.divf %379, %380 : vector<1x64xf32>
    %382 = vector.extract_strided_slice %381 {offsets = [0, 0], sizes = [1, 32], strides = [1, 1]} : vector<1x64xf32> to vector<1x32xf32>
    %383 = vector.extract_strided_slice %381 {offsets = [0, 32], sizes = [1, 32], strides = [1, 1]} : vector<1x64xf32> to vector<1x32xf32>
    %384 = vector.extract_strided_slice %361 {offsets = [0, 64], sizes = [1, 32], strides = [1, 1]} : vector<1x128xf32> to vector<1x32xf32>
    %385 = vector.extract_strided_slice %373 {offsets = [0, 64], sizes = [1, 32], strides = [1, 1]} : vector<1x128xf32> to vector<1x32xf32>
    %386 = arith.mulf %382, %385 : vector<1x32xf32>
    %387 = arith.addf %384, %386 : vector<1x32xf32>
    %388 = math.tanh %387 : vector<1x32xf32>
    %cst_89 = arith.constant 1.000000e+00 : f32
    %389 = vector.broadcast %cst_89 : f32 to vector<1x32xf32>
    %390 = arith.subf %389, %383 : vector<1x32xf32>
    %391 = arith.mulf %390, %388 : vector<1x32xf32>
    %392 = arith.mulf %383, %371 : vector<1x32xf32>
    %393 = arith.addf %391, %392 : vector<1x32xf32>
    %394 = arith.truncf %393 : vector<1x32xf32> to vector<1x32xbf16>
    %cst_90 = arith.constant dense<0.000000e+00> : vector<1x128xf32>
    %395 = tpu.matmul %394, %4, %cst_90 {dimension_numbers = #tpu.dot_dimension_numbers<[1], [0], [0], [1], [0, 0, 1, 1], [], []>} : vector<1x32xbf16>, vector<32x128xbf16>, vector<1x128xf32> -> vector<1x128xf32>
    %396 = arith.addf %395, %5 : vector<1x128xf32>
    %397 = vector.extract_strided_slice %396 {offsets = [0, 0], sizes = [1, 6], strides = [1, 1]} : vector<1x128xf32> to vector<1x6xf32>
    %398 = vector.extract_strided_slice %396 {offsets = [0, 6], sizes = [1, 1], strides = [1, 1]} : vector<1x128xf32> to vector<1x1xf32>
    %cst_91 = arith.constant dense<0xFF800000> : vector<1xf32>
    %399 = vector.multi_reduction <maximumf>, %397, %cst_91 [1] : vector<1x6xf32> to vector<1xf32>
    %400 = vector.shape_cast %399 : vector<1xf32> to vector<1x1xf32>
    %401 = vector.broadcast %400 : vector<1x1xf32> to vector<1x6xf32>
    %402 = arith.subf %397, %401 : vector<1x6xf32>
    %403 = math.exp %402 : vector<1x6xf32>
    %cst_92 = arith.constant dense<0.000000e+00> : vector<1xf32>
    %404 = vector.multi_reduction <add>, %403, %cst_92 [1] : vector<1x6xf32> to vector<1xf32>
    %405 = vector.shape_cast %404 : vector<1xf32> to vector<1x1xf32>
    %406 = math.log %405 : vector<1x1xf32>
    %407 = arith.addf %400, %406 : vector<1x1xf32>
    %408 = vector.broadcast %407 : vector<1x1xf32> to vector<1x6xf32>
    %409 = arith.subf %397, %408 : vector<1x6xf32>
    %cst_93 = arith.constant dense<0.000000e+00> : vector<1xf32>
    %410 = vector.multi_reduction <add>, %367, %cst_93 [0] : vector<1x1xf32> to vector<1xf32>
    %411 = vector.shape_cast %410 : vector<1xf32> to vector<1x1xf32>
    %412 = arith.mulf %369, %409 : vector<1x6xf32>
    %413 = vector.broadcast %367 : vector<1x1xf32> to vector<1x6xf32>
    %414 = arith.mulf %412, %413 : vector<1x6xf32>
    %cst_94 = arith.constant dense<0.000000e+00> : vector<1xf32>
    %415 = vector.multi_reduction <add>, %414, %cst_94 [1] : vector<1x6xf32> to vector<1xf32>
    %416 = vector.shape_cast %415 : vector<1xf32> to vector<1x1xf32>
    %cst_95 = arith.constant dense<0.000000e+00> : vector<1xf32>
    %417 = vector.multi_reduction <add>, %416, %cst_95 [0] : vector<1x1xf32> to vector<1xf32>
    %418 = vector.shape_cast %417 : vector<1xf32> to vector<1x1xf32>
    %cst_96 = arith.constant 0.000000e+00 : f32
    %419 = vector.broadcast %cst_96 : f32 to vector<1x1xf32>
    %420 = arith.subf %419, %418 : vector<1x1xf32>
    %421 = arith.negf %398 : vector<1x1xf32>
    %422 = math.exp %421 : vector<1x1xf32>
    %cst_97 = arith.constant 1.000000e+00 : f32
    %423 = vector.broadcast %cst_97 : f32 to vector<1x1xf32>
    %424 = arith.addf %423, %422 : vector<1x1xf32>
    %425 = arith.divf %423, %424 : vector<1x1xf32>
    %426 = arith.subf %425, %368 : vector<1x1xf32>
    %427 = arith.mulf %426, %426 : vector<1x1xf32>
    %428 = arith.mulf %427, %367 : vector<1x1xf32>
    %cst_98 = arith.constant dense<0.000000e+00> : vector<1xf32>
    %429 = vector.multi_reduction <add>, %428, %cst_98 [0] : vector<1x1xf32> to vector<1xf32>
    %430 = vector.shape_cast %429 : vector<1xf32> to vector<1x1xf32>
    %431 = vector.broadcast %c4_i32 : i32 to vector<8x1xi32>
    %432 = arith.cmpi eq, %6, %431 : vector<8x1xi32>
    %433 = arith.extui %432 : vector<8x1xi1> to vector<8x1xi32>
    %434 = arith.sitofp %433 : vector<8x1xi32> to vector<8x1xf32>
    %435 = vector.broadcast %420 : vector<1x1xf32> to vector<8x1xf32>
    %436 = arith.mulf %434, %435 : vector<8x1xf32>
    %437 = arith.addf %350, %436 : vector<8x1xf32>
    %438 = vector.broadcast %430 : vector<1x1xf32> to vector<8x1xf32>
    %439 = arith.mulf %434, %438 : vector<8x1xf32>
    %440 = arith.addf %353, %439 : vector<8x1xf32>
    %441 = vector.broadcast %411 : vector<1x1xf32> to vector<8x1xf32>
    %442 = arith.mulf %434, %441 : vector<8x1xf32>
    %443 = arith.addf %356, %442 : vector<8x1xf32>
    %c5_i32 = arith.constant 5 : i32
    %444 = arith.index_cast %c5_i32 : i32 to index
    %c0_99 = arith.constant 0 : index
    %c0_100 = arith.constant 0 : index
    %c0_101 = arith.constant 0 : index
    %445 = vector.load %arg2[%444, %c0_99, %c0_100, %c0_101] : memref<8x1x1x128xbf16, #tpu.memory_space<vmem>>, vector<1x1x1x128xbf16>
    %446 = vector.shape_cast %445 : vector<1x1x1x128xbf16> to vector<1x1x128xbf16>
    %447 = vector.shape_cast %446 : vector<1x1x128xbf16> to vector<1x128xbf16>
    %448 = arith.extf %447 : vector<1x128xbf16> to vector<1x128xf32>
    %449 = arith.index_cast %c5_i32 : i32 to index
    %c0_102 = arith.constant 0 : index
    %c0_103 = arith.constant 0 : index
    %c0_104 = arith.constant 0 : index
    %450 = vector.load %arg3[%449, %c0_102, %c0_103, %c0_104] : memref<8x1x1x9xf32, #tpu.memory_space<vmem>>, vector<1x1x1x9xf32>
    %451 = vector.shape_cast %450 : vector<1x1x1x9xf32> to vector<1x1x9xf32>
    %452 = vector.shape_cast %451 : vector<1x1x9xf32> to vector<1x9xf32>
    %453 = vector.extract_strided_slice %452 {offsets = [0, 0], sizes = [1, 1], strides = [1, 1]} : vector<1x9xf32> to vector<1x1xf32>
    %454 = vector.extract_strided_slice %452 {offsets = [0, 1], sizes = [1, 1], strides = [1, 1]} : vector<1x9xf32> to vector<1x1xf32>
    %455 = vector.extract_strided_slice %452 {offsets = [0, 2], sizes = [1, 1], strides = [1, 1]} : vector<1x9xf32> to vector<1x1xf32>
    %456 = vector.extract_strided_slice %452 {offsets = [0, 3], sizes = [1, 6], strides = [1, 1]} : vector<1x9xf32> to vector<1x6xf32>
    %457 = vector.broadcast %453 : vector<1x1xf32> to vector<1x32xf32>
    %458 = arith.mulf %393, %457 : vector<1x32xf32>
    %459 = arith.truncf %458 : vector<1x32xf32> to vector<1x32xbf16>
    %cst_105 = arith.constant dense<0.000000e+00> : vector<1x128xf32>
    %460 = tpu.matmul %459, %3, %cst_105 {dimension_numbers = #tpu.dot_dimension_numbers<[1], [0], [0], [1], [0, 0, 1, 1], [], []>} : vector<1x32xbf16>, vector<32x128xbf16>, vector<1x128xf32> -> vector<1x128xf32>
    %461 = vector.extract_strided_slice %448 {offsets = [0, 0], sizes = [1, 64], strides = [1, 1]} : vector<1x128xf32> to vector<1x64xf32>
    %462 = vector.extract_strided_slice %460 {offsets = [0, 0], sizes = [1, 64], strides = [1, 1]} : vector<1x128xf32> to vector<1x64xf32>
    %463 = arith.addf %461, %462 : vector<1x64xf32>
    %464 = arith.negf %463 : vector<1x64xf32>
    %465 = math.exp %464 : vector<1x64xf32>
    %cst_106 = arith.constant 1.000000e+00 : f32
    %466 = vector.broadcast %cst_106 : f32 to vector<1x64xf32>
    %467 = arith.addf %466, %465 : vector<1x64xf32>
    %468 = arith.divf %466, %467 : vector<1x64xf32>
    %469 = vector.extract_strided_slice %468 {offsets = [0, 0], sizes = [1, 32], strides = [1, 1]} : vector<1x64xf32> to vector<1x32xf32>
    %470 = vector.extract_strided_slice %468 {offsets = [0, 32], sizes = [1, 32], strides = [1, 1]} : vector<1x64xf32> to vector<1x32xf32>
    %471 = vector.extract_strided_slice %448 {offsets = [0, 64], sizes = [1, 32], strides = [1, 1]} : vector<1x128xf32> to vector<1x32xf32>
    %472 = vector.extract_strided_slice %460 {offsets = [0, 64], sizes = [1, 32], strides = [1, 1]} : vector<1x128xf32> to vector<1x32xf32>
    %473 = arith.mulf %469, %472 : vector<1x32xf32>
    %474 = arith.addf %471, %473 : vector<1x32xf32>
    %475 = math.tanh %474 : vector<1x32xf32>
    %cst_107 = arith.constant 1.000000e+00 : f32
    %476 = vector.broadcast %cst_107 : f32 to vector<1x32xf32>
    %477 = arith.subf %476, %470 : vector<1x32xf32>
    %478 = arith.mulf %477, %475 : vector<1x32xf32>
    %479 = arith.mulf %470, %458 : vector<1x32xf32>
    %480 = arith.addf %478, %479 : vector<1x32xf32>
    %481 = arith.truncf %480 : vector<1x32xf32> to vector<1x32xbf16>
    %cst_108 = arith.constant dense<0.000000e+00> : vector<1x128xf32>
    %482 = tpu.matmul %481, %4, %cst_108 {dimension_numbers = #tpu.dot_dimension_numbers<[1], [0], [0], [1], [0, 0, 1, 1], [], []>} : vector<1x32xbf16>, vector<32x128xbf16>, vector<1x128xf32> -> vector<1x128xf32>
    %483 = arith.addf %482, %5 : vector<1x128xf32>
    %484 = vector.extract_strided_slice %483 {offsets = [0, 0], sizes = [1, 6], strides = [1, 1]} : vector<1x128xf32> to vector<1x6xf32>
    %485 = vector.extract_strided_slice %483 {offsets = [0, 6], sizes = [1, 1], strides = [1, 1]} : vector<1x128xf32> to vector<1x1xf32>
    %cst_109 = arith.constant dense<0xFF800000> : vector<1xf32>
    %486 = vector.multi_reduction <maximumf>, %484, %cst_109 [1] : vector<1x6xf32> to vector<1xf32>
    %487 = vector.shape_cast %486 : vector<1xf32> to vector<1x1xf32>
    %488 = vector.broadcast %487 : vector<1x1xf32> to vector<1x6xf32>
    %489 = arith.subf %484, %488 : vector<1x6xf32>
    %490 = math.exp %489 : vector<1x6xf32>
    %cst_110 = arith.constant dense<0.000000e+00> : vector<1xf32>
    %491 = vector.multi_reduction <add>, %490, %cst_110 [1] : vector<1x6xf32> to vector<1xf32>
    %492 = vector.shape_cast %491 : vector<1xf32> to vector<1x1xf32>
    %493 = math.log %492 : vector<1x1xf32>
    %494 = arith.addf %487, %493 : vector<1x1xf32>
    %495 = vector.broadcast %494 : vector<1x1xf32> to vector<1x6xf32>
    %496 = arith.subf %484, %495 : vector<1x6xf32>
    %cst_111 = arith.constant dense<0.000000e+00> : vector<1xf32>
    %497 = vector.multi_reduction <add>, %454, %cst_111 [0] : vector<1x1xf32> to vector<1xf32>
    %498 = vector.shape_cast %497 : vector<1xf32> to vector<1x1xf32>
    %499 = arith.mulf %456, %496 : vector<1x6xf32>
    %500 = vector.broadcast %454 : vector<1x1xf32> to vector<1x6xf32>
    %501 = arith.mulf %499, %500 : vector<1x6xf32>
    %cst_112 = arith.constant dense<0.000000e+00> : vector<1xf32>
    %502 = vector.multi_reduction <add>, %501, %cst_112 [1] : vector<1x6xf32> to vector<1xf32>
    %503 = vector.shape_cast %502 : vector<1xf32> to vector<1x1xf32>
    %cst_113 = arith.constant dense<0.000000e+00> : vector<1xf32>
    %504 = vector.multi_reduction <add>, %503, %cst_113 [0] : vector<1x1xf32> to vector<1xf32>
    %505 = vector.shape_cast %504 : vector<1xf32> to vector<1x1xf32>
    %cst_114 = arith.constant 0.000000e+00 : f32
    %506 = vector.broadcast %cst_114 : f32 to vector<1x1xf32>
    %507 = arith.subf %506, %505 : vector<1x1xf32>
    %508 = arith.negf %485 : vector<1x1xf32>
    %509 = math.exp %508 : vector<1x1xf32>
    %cst_115 = arith.constant 1.000000e+00 : f32
    %510 = vector.broadcast %cst_115 : f32 to vector<1x1xf32>
    %511 = arith.addf %510, %509 : vector<1x1xf32>
    %512 = arith.divf %510, %511 : vector<1x1xf32>
    %513 = arith.subf %512, %455 : vector<1x1xf32>
    %514 = arith.mulf %513, %513 : vector<1x1xf32>
    %515 = arith.mulf %514, %454 : vector<1x1xf32>
    %cst_116 = arith.constant dense<0.000000e+00> : vector<1xf32>
    %516 = vector.multi_reduction <add>, %515, %cst_116 [0] : vector<1x1xf32> to vector<1xf32>
    %517 = vector.shape_cast %516 : vector<1xf32> to vector<1x1xf32>
    %518 = vector.broadcast %c5_i32 : i32 to vector<8x1xi32>
    %519 = arith.cmpi eq, %6, %518 : vector<8x1xi32>
    %520 = arith.extui %519 : vector<8x1xi1> to vector<8x1xi32>
    %521 = arith.sitofp %520 : vector<8x1xi32> to vector<8x1xf32>
    %522 = vector.broadcast %507 : vector<1x1xf32> to vector<8x1xf32>
    %523 = arith.mulf %521, %522 : vector<8x1xf32>
    %524 = arith.addf %437, %523 : vector<8x1xf32>
    %525 = vector.broadcast %517 : vector<1x1xf32> to vector<8x1xf32>
    %526 = arith.mulf %521, %525 : vector<8x1xf32>
    %527 = arith.addf %440, %526 : vector<8x1xf32>
    %528 = vector.broadcast %498 : vector<1x1xf32> to vector<8x1xf32>
    %529 = arith.mulf %521, %528 : vector<8x1xf32>
    %530 = arith.addf %443, %529 : vector<8x1xf32>
    %c6_i32 = arith.constant 6 : i32
    %531 = arith.index_cast %c6_i32 : i32 to index
    %c0_117 = arith.constant 0 : index
    %c0_118 = arith.constant 0 : index
    %c0_119 = arith.constant 0 : index
    %532 = vector.load %arg2[%531, %c0_117, %c0_118, %c0_119] : memref<8x1x1x128xbf16, #tpu.memory_space<vmem>>, vector<1x1x1x128xbf16>
    %533 = vector.shape_cast %532 : vector<1x1x1x128xbf16> to vector<1x1x128xbf16>
    %534 = vector.shape_cast %533 : vector<1x1x128xbf16> to vector<1x128xbf16>
    %535 = arith.extf %534 : vector<1x128xbf16> to vector<1x128xf32>
    %536 = arith.index_cast %c6_i32 : i32 to index
    %c0_120 = arith.constant 0 : index
    %c0_121 = arith.constant 0 : index
    %c0_122 = arith.constant 0 : index
    %537 = vector.load %arg3[%536, %c0_120, %c0_121, %c0_122] : memref<8x1x1x9xf32, #tpu.memory_space<vmem>>, vector<1x1x1x9xf32>
    %538 = vector.shape_cast %537 : vector<1x1x1x9xf32> to vector<1x1x9xf32>
    %539 = vector.shape_cast %538 : vector<1x1x9xf32> to vector<1x9xf32>
    %540 = vector.extract_strided_slice %539 {offsets = [0, 0], sizes = [1, 1], strides = [1, 1]} : vector<1x9xf32> to vector<1x1xf32>
    %541 = vector.extract_strided_slice %539 {offsets = [0, 1], sizes = [1, 1], strides = [1, 1]} : vector<1x9xf32> to vector<1x1xf32>
    %542 = vector.extract_strided_slice %539 {offsets = [0, 2], sizes = [1, 1], strides = [1, 1]} : vector<1x9xf32> to vector<1x1xf32>
    %543 = vector.extract_strided_slice %539 {offsets = [0, 3], sizes = [1, 6], strides = [1, 1]} : vector<1x9xf32> to vector<1x6xf32>
    %544 = vector.broadcast %540 : vector<1x1xf32> to vector<1x32xf32>
    %545 = arith.mulf %480, %544 : vector<1x32xf32>
    %546 = arith.truncf %545 : vector<1x32xf32> to vector<1x32xbf16>
    %cst_123 = arith.constant dense<0.000000e+00> : vector<1x128xf32>
    %547 = tpu.matmul %546, %3, %cst_123 {dimension_numbers = #tpu.dot_dimension_numbers<[1], [0], [0], [1], [0, 0, 1, 1], [], []>} : vector<1x32xbf16>, vector<32x128xbf16>, vector<1x128xf32> -> vector<1x128xf32>
    %548 = vector.extract_strided_slice %535 {offsets = [0, 0], sizes = [1, 64], strides = [1, 1]} : vector<1x128xf32> to vector<1x64xf32>
    %549 = vector.extract_strided_slice %547 {offsets = [0, 0], sizes = [1, 64], strides = [1, 1]} : vector<1x128xf32> to vector<1x64xf32>
    %550 = arith.addf %548, %549 : vector<1x64xf32>
    %551 = arith.negf %550 : vector<1x64xf32>
    %552 = math.exp %551 : vector<1x64xf32>
    %cst_124 = arith.constant 1.000000e+00 : f32
    %553 = vector.broadcast %cst_124 : f32 to vector<1x64xf32>
    %554 = arith.addf %553, %552 : vector<1x64xf32>
    %555 = arith.divf %553, %554 : vector<1x64xf32>
    %556 = vector.extract_strided_slice %555 {offsets = [0, 0], sizes = [1, 32], strides = [1, 1]} : vector<1x64xf32> to vector<1x32xf32>
    %557 = vector.extract_strided_slice %555 {offsets = [0, 32], sizes = [1, 32], strides = [1, 1]} : vector<1x64xf32> to vector<1x32xf32>
    %558 = vector.extract_strided_slice %535 {offsets = [0, 64], sizes = [1, 32], strides = [1, 1]} : vector<1x128xf32> to vector<1x32xf32>
    %559 = vector.extract_strided_slice %547 {offsets = [0, 64], sizes = [1, 32], strides = [1, 1]} : vector<1x128xf32> to vector<1x32xf32>
    %560 = arith.mulf %556, %559 : vector<1x32xf32>
    %561 = arith.addf %558, %560 : vector<1x32xf32>
    %562 = math.tanh %561 : vector<1x32xf32>
    %cst_125 = arith.constant 1.000000e+00 : f32
    %563 = vector.broadcast %cst_125 : f32 to vector<1x32xf32>
    %564 = arith.subf %563, %557 : vector<1x32xf32>
    %565 = arith.mulf %564, %562 : vector<1x32xf32>
    %566 = arith.mulf %557, %545 : vector<1x32xf32>
    %567 = arith.addf %565, %566 : vector<1x32xf32>
    %568 = arith.truncf %567 : vector<1x32xf32> to vector<1x32xbf16>
    %cst_126 = arith.constant dense<0.000000e+00> : vector<1x128xf32>
    %569 = tpu.matmul %568, %4, %cst_126 {dimension_numbers = #tpu.dot_dimension_numbers<[1], [0], [0], [1], [0, 0, 1, 1], [], []>} : vector<1x32xbf16>, vector<32x128xbf16>, vector<1x128xf32> -> vector<1x128xf32>
    %570 = arith.addf %569, %5 : vector<1x128xf32>
    %571 = vector.extract_strided_slice %570 {offsets = [0, 0], sizes = [1, 6], strides = [1, 1]} : vector<1x128xf32> to vector<1x6xf32>
    %572 = vector.extract_strided_slice %570 {offsets = [0, 6], sizes = [1, 1], strides = [1, 1]} : vector<1x128xf32> to vector<1x1xf32>
    %cst_127 = arith.constant dense<0xFF800000> : vector<1xf32>
    %573 = vector.multi_reduction <maximumf>, %571, %cst_127 [1] : vector<1x6xf32> to vector<1xf32>
    %574 = vector.shape_cast %573 : vector<1xf32> to vector<1x1xf32>
    %575 = vector.broadcast %574 : vector<1x1xf32> to vector<1x6xf32>
    %576 = arith.subf %571, %575 : vector<1x6xf32>
    %577 = math.exp %576 : vector<1x6xf32>
    %cst_128 = arith.constant dense<0.000000e+00> : vector<1xf32>
    %578 = vector.multi_reduction <add>, %577, %cst_128 [1] : vector<1x6xf32> to vector<1xf32>
    %579 = vector.shape_cast %578 : vector<1xf32> to vector<1x1xf32>
    %580 = math.log %579 : vector<1x1xf32>
    %581 = arith.addf %574, %580 : vector<1x1xf32>
    %582 = vector.broadcast %581 : vector<1x1xf32> to vector<1x6xf32>
    %583 = arith.subf %571, %582 : vector<1x6xf32>
    %cst_129 = arith.constant dense<0.000000e+00> : vector<1xf32>
    %584 = vector.multi_reduction <add>, %541, %cst_129 [0] : vector<1x1xf32> to vector<1xf32>
    %585 = vector.shape_cast %584 : vector<1xf32> to vector<1x1xf32>
    %586 = arith.mulf %543, %583 : vector<1x6xf32>
    %587 = vector.broadcast %541 : vector<1x1xf32> to vector<1x6xf32>
    %588 = arith.mulf %586, %587 : vector<1x6xf32>
    %cst_130 = arith.constant dense<0.000000e+00> : vector<1xf32>
    %589 = vector.multi_reduction <add>, %588, %cst_130 [1] : vector<1x6xf32> to vector<1xf32>
    %590 = vector.shape_cast %589 : vector<1xf32> to vector<1x1xf32>
    %cst_131 = arith.constant dense<0.000000e+00> : vector<1xf32>
    %591 = vector.multi_reduction <add>, %590, %cst_131 [0] : vector<1x1xf32> to vector<1xf32>
    %592 = vector.shape_cast %591 : vector<1xf32> to vector<1x1xf32>
    %cst_132 = arith.constant 0.000000e+00 : f32
    %593 = vector.broadcast %cst_132 : f32 to vector<1x1xf32>
    %594 = arith.subf %593, %592 : vector<1x1xf32>
    %595 = arith.negf %572 : vector<1x1xf32>
    %596 = math.exp %595 : vector<1x1xf32>
    %cst_133 = arith.constant 1.000000e+00 : f32
    %597 = vector.broadcast %cst_133 : f32 to vector<1x1xf32>
    %598 = arith.addf %597, %596 : vector<1x1xf32>
    %599 = arith.divf %597, %598 : vector<1x1xf32>
    %600 = arith.subf %599, %542 : vector<1x1xf32>
    %601 = arith.mulf %600, %600 : vector<1x1xf32>
    %602 = arith.mulf %601, %541 : vector<1x1xf32>
    %cst_134 = arith.constant dense<0.000000e+00> : vector<1xf32>
    %603 = vector.multi_reduction <add>, %602, %cst_134 [0] : vector<1x1xf32> to vector<1xf32>
    %604 = vector.shape_cast %603 : vector<1xf32> to vector<1x1xf32>
    %605 = vector.broadcast %c6_i32 : i32 to vector<8x1xi32>
    %606 = arith.cmpi eq, %6, %605 : vector<8x1xi32>
    %607 = arith.extui %606 : vector<8x1xi1> to vector<8x1xi32>
    %608 = arith.sitofp %607 : vector<8x1xi32> to vector<8x1xf32>
    %609 = vector.broadcast %594 : vector<1x1xf32> to vector<8x1xf32>
    %610 = arith.mulf %608, %609 : vector<8x1xf32>
    %611 = arith.addf %524, %610 : vector<8x1xf32>
    %612 = vector.broadcast %604 : vector<1x1xf32> to vector<8x1xf32>
    %613 = arith.mulf %608, %612 : vector<8x1xf32>
    %614 = arith.addf %527, %613 : vector<8x1xf32>
    %615 = vector.broadcast %585 : vector<1x1xf32> to vector<8x1xf32>
    %616 = arith.mulf %608, %615 : vector<8x1xf32>
    %617 = arith.addf %530, %616 : vector<8x1xf32>
    %c7_i32 = arith.constant 7 : i32
    %618 = arith.index_cast %c7_i32 : i32 to index
    %c0_135 = arith.constant 0 : index
    %c0_136 = arith.constant 0 : index
    %c0_137 = arith.constant 0 : index
    %619 = vector.load %arg2[%618, %c0_135, %c0_136, %c0_137] : memref<8x1x1x128xbf16, #tpu.memory_space<vmem>>, vector<1x1x1x128xbf16>
    %620 = vector.shape_cast %619 : vector<1x1x1x128xbf16> to vector<1x1x128xbf16>
    %621 = vector.shape_cast %620 : vector<1x1x128xbf16> to vector<1x128xbf16>
    %622 = arith.extf %621 : vector<1x128xbf16> to vector<1x128xf32>
    %623 = arith.index_cast %c7_i32 : i32 to index
    %c0_138 = arith.constant 0 : index
    %c0_139 = arith.constant 0 : index
    %c0_140 = arith.constant 0 : index
    %624 = vector.load %arg3[%623, %c0_138, %c0_139, %c0_140] : memref<8x1x1x9xf32, #tpu.memory_space<vmem>>, vector<1x1x1x9xf32>
    %625 = vector.shape_cast %624 : vector<1x1x1x9xf32> to vector<1x1x9xf32>
    %626 = vector.shape_cast %625 : vector<1x1x9xf32> to vector<1x9xf32>
    %627 = vector.extract_strided_slice %626 {offsets = [0, 0], sizes = [1, 1], strides = [1, 1]} : vector<1x9xf32> to vector<1x1xf32>
    %628 = vector.extract_strided_slice %626 {offsets = [0, 1], sizes = [1, 1], strides = [1, 1]} : vector<1x9xf32> to vector<1x1xf32>
    %629 = vector.extract_strided_slice %626 {offsets = [0, 2], sizes = [1, 1], strides = [1, 1]} : vector<1x9xf32> to vector<1x1xf32>
    %630 = vector.extract_strided_slice %626 {offsets = [0, 3], sizes = [1, 6], strides = [1, 1]} : vector<1x9xf32> to vector<1x6xf32>
    %631 = vector.broadcast %627 : vector<1x1xf32> to vector<1x32xf32>
    %632 = arith.mulf %567, %631 : vector<1x32xf32>
    %633 = arith.truncf %632 : vector<1x32xf32> to vector<1x32xbf16>
    %cst_141 = arith.constant dense<0.000000e+00> : vector<1x128xf32>
    %634 = tpu.matmul %633, %3, %cst_141 {dimension_numbers = #tpu.dot_dimension_numbers<[1], [0], [0], [1], [0, 0, 1, 1], [], []>} : vector<1x32xbf16>, vector<32x128xbf16>, vector<1x128xf32> -> vector<1x128xf32>
    %635 = vector.extract_strided_slice %622 {offsets = [0, 0], sizes = [1, 64], strides = [1, 1]} : vector<1x128xf32> to vector<1x64xf32>
    %636 = vector.extract_strided_slice %634 {offsets = [0, 0], sizes = [1, 64], strides = [1, 1]} : vector<1x128xf32> to vector<1x64xf32>
    %637 = arith.addf %635, %636 : vector<1x64xf32>
    %638 = arith.negf %637 : vector<1x64xf32>
    %639 = math.exp %638 : vector<1x64xf32>
    %cst_142 = arith.constant 1.000000e+00 : f32
    %640 = vector.broadcast %cst_142 : f32 to vector<1x64xf32>
    %641 = arith.addf %640, %639 : vector<1x64xf32>
    %642 = arith.divf %640, %641 : vector<1x64xf32>
    %643 = vector.extract_strided_slice %642 {offsets = [0, 0], sizes = [1, 32], strides = [1, 1]} : vector<1x64xf32> to vector<1x32xf32>
    %644 = vector.extract_strided_slice %642 {offsets = [0, 32], sizes = [1, 32], strides = [1, 1]} : vector<1x64xf32> to vector<1x32xf32>
    %645 = vector.extract_strided_slice %622 {offsets = [0, 64], sizes = [1, 32], strides = [1, 1]} : vector<1x128xf32> to vector<1x32xf32>
    %646 = vector.extract_strided_slice %634 {offsets = [0, 64], sizes = [1, 32], strides = [1, 1]} : vector<1x128xf32> to vector<1x32xf32>
    %647 = arith.mulf %643, %646 : vector<1x32xf32>
    %648 = arith.addf %645, %647 : vector<1x32xf32>
    %649 = math.tanh %648 : vector<1x32xf32>
    %cst_143 = arith.constant 1.000000e+00 : f32
    %650 = vector.broadcast %cst_143 : f32 to vector<1x32xf32>
    %651 = arith.subf %650, %644 : vector<1x32xf32>
    %652 = arith.mulf %651, %649 : vector<1x32xf32>
    %653 = arith.mulf %644, %632 : vector<1x32xf32>
    %654 = arith.addf %652, %653 : vector<1x32xf32>
    %655 = arith.truncf %654 : vector<1x32xf32> to vector<1x32xbf16>
    %cst_144 = arith.constant dense<0.000000e+00> : vector<1x128xf32>
    %656 = tpu.matmul %655, %4, %cst_144 {dimension_numbers = #tpu.dot_dimension_numbers<[1], [0], [0], [1], [0, 0, 1, 1], [], []>} : vector<1x32xbf16>, vector<32x128xbf16>, vector<1x128xf32> -> vector<1x128xf32>
    %657 = arith.addf %656, %5 : vector<1x128xf32>
    %658 = vector.extract_strided_slice %657 {offsets = [0, 0], sizes = [1, 6], strides = [1, 1]} : vector<1x128xf32> to vector<1x6xf32>
    %659 = vector.extract_strided_slice %657 {offsets = [0, 6], sizes = [1, 1], strides = [1, 1]} : vector<1x128xf32> to vector<1x1xf32>
    %cst_145 = arith.constant dense<0xFF800000> : vector<1xf32>
    %660 = vector.multi_reduction <maximumf>, %658, %cst_145 [1] : vector<1x6xf32> to vector<1xf32>
    %661 = vector.shape_cast %660 : vector<1xf32> to vector<1x1xf32>
    %662 = vector.broadcast %661 : vector<1x1xf32> to vector<1x6xf32>
    %663 = arith.subf %658, %662 : vector<1x6xf32>
    %664 = math.exp %663 : vector<1x6xf32>
    %cst_146 = arith.constant dense<0.000000e+00> : vector<1xf32>
    %665 = vector.multi_reduction <add>, %664, %cst_146 [1] : vector<1x6xf32> to vector<1xf32>
    %666 = vector.shape_cast %665 : vector<1xf32> to vector<1x1xf32>
    %667 = math.log %666 : vector<1x1xf32>
    %668 = arith.addf %661, %667 : vector<1x1xf32>
    %669 = vector.broadcast %668 : vector<1x1xf32> to vector<1x6xf32>
    %670 = arith.subf %658, %669 : vector<1x6xf32>
    %cst_147 = arith.constant dense<0.000000e+00> : vector<1xf32>
    %671 = vector.multi_reduction <add>, %628, %cst_147 [0] : vector<1x1xf32> to vector<1xf32>
    %672 = vector.shape_cast %671 : vector<1xf32> to vector<1x1xf32>
    %673 = arith.mulf %630, %670 : vector<1x6xf32>
    %674 = vector.broadcast %628 : vector<1x1xf32> to vector<1x6xf32>
    %675 = arith.mulf %673, %674 : vector<1x6xf32>
    %cst_148 = arith.constant dense<0.000000e+00> : vector<1xf32>
    %676 = vector.multi_reduction <add>, %675, %cst_148 [1] : vector<1x6xf32> to vector<1xf32>
    %677 = vector.shape_cast %676 : vector<1xf32> to vector<1x1xf32>
    %cst_149 = arith.constant dense<0.000000e+00> : vector<1xf32>
    %678 = vector.multi_reduction <add>, %677, %cst_149 [0] : vector<1x1xf32> to vector<1xf32>
    %679 = vector.shape_cast %678 : vector<1xf32> to vector<1x1xf32>
    %cst_150 = arith.constant 0.000000e+00 : f32
    %680 = vector.broadcast %cst_150 : f32 to vector<1x1xf32>
    %681 = arith.subf %680, %679 : vector<1x1xf32>
    %682 = arith.negf %659 : vector<1x1xf32>
    %683 = math.exp %682 : vector<1x1xf32>
    %cst_151 = arith.constant 1.000000e+00 : f32
    %684 = vector.broadcast %cst_151 : f32 to vector<1x1xf32>
    %685 = arith.addf %684, %683 : vector<1x1xf32>
    %686 = arith.divf %684, %685 : vector<1x1xf32>
    %687 = arith.subf %686, %629 : vector<1x1xf32>
    %688 = arith.mulf %687, %687 : vector<1x1xf32>
    %689 = arith.mulf %688, %628 : vector<1x1xf32>
    %cst_152 = arith.constant dense<0.000000e+00> : vector<1xf32>
    %690 = vector.multi_reduction <add>, %689, %cst_152 [0] : vector<1x1xf32> to vector<1xf32>
    %691 = vector.shape_cast %690 : vector<1xf32> to vector<1x1xf32>
    %692 = vector.broadcast %c7_i32 : i32 to vector<8x1xi32>
    %693 = arith.cmpi eq, %6, %692 : vector<8x1xi32>
    %694 = arith.extui %693 : vector<8x1xi1> to vector<8x1xi32>
    %695 = arith.sitofp %694 : vector<8x1xi32> to vector<8x1xf32>
    %696 = vector.broadcast %681 : vector<1x1xf32> to vector<8x1xf32>
    %697 = arith.mulf %695, %696 : vector<8x1xf32>
    %698 = arith.addf %611, %697 : vector<8x1xf32>
    %699 = vector.broadcast %691 : vector<1x1xf32> to vector<8x1xf32>
    %700 = arith.mulf %695, %699 : vector<8x1xf32>
    %701 = arith.addf %614, %700 : vector<8x1xf32>
    %702 = vector.broadcast %672 : vector<1x1xf32> to vector<8x1xf32>
    %703 = arith.mulf %695, %702 : vector<8x1xf32>
    %704 = arith.addf %617, %703 : vector<8x1xf32>
    %c8_i32 = arith.constant 8 : i32
    %c0_153 = arith.constant 0 : index
    %c0_154 = arith.constant 0 : index
    %705 = vector.load %arg8[%c0_153, %c0_154] : memref<1x32xf32, #tpu.memory_space<vmem>>, vector<1x32xf32>
    tpu.vector_store %arg8[%c0_153, %c0_154], %654 {strides = array<i32>} : memref<1x32xf32, #tpu.memory_space<vmem>>, vector<1x32xf32>,
    %706 = tpu.concatenate %698, %701, %704 in 1 : vector<8x1xf32>, vector<8x1xf32>, vector<8x1xf32> -> vector<8x3xf32>
    %c0_155 = arith.constant 0 : index
    %c0_156 = arith.constant 0 : index
    %c0_157 = arith.constant 0 : index
    %707 = vector.load %arg7[%c0_155, %c0_156, %c0_157] : memref<1x8x3xf32, #tpu.memory_space<vmem>>, vector<1x8x3xf32>
    %708 = vector.shape_cast %707 : vector<1x8x3xf32> to vector<8x3xf32>
    %709 = vector.shape_cast %706 : vector<8x3xf32> to vector<1x8x3xf32>
    tpu.vector_store %arg7[%c0_155, %c0_156, %c0_157], %709 {strides = array<i32>} : memref<1x8x3xf32, #tpu.memory_space<vmem>>, vector<1x8x3xf32>,
    return
  }
  func.func @transform_0(%arg0: i32, %arg1: i32) -> (i32, i32, i32, i32) {
    %c0_i32 = arith.constant 0 : i32
    %c0_i32_0 = arith.constant 0 : i32
    %c0_i32_1 = arith.constant 0 : i32
    return %arg1, %arg0, %c0_i32, %c0_i32_0 : i32, i32, i32, i32
  }
  func.func @transform_1(%arg0: i32, %arg1: i32) -> (i32, i32, i32, i32) {
    %c0_i32 = arith.constant 0 : i32
    %c0_i32_0 = arith.constant 0 : i32
    %c0_i32_1 = arith.constant 0 : i32
    return %arg1, %arg0, %c0_i32, %c0_i32_0 : i32, i32, i32, i32
  }
  func.func @transform_2(%arg0: i32, %arg1: i32) -> (i32, i32) {
    %c0_i32 = arith.constant 0 : i32
    %c0_i32_0 = arith.constant 0 : i32
    %c0_i32_1 = arith.constant 0 : i32
    return %c0_i32, %c0_i32_0 : i32, i32
  }
  func.func @transform_3(%arg0: i32, %arg1: i32) -> (i32, i32) {
    %c0_i32 = arith.constant 0 : i32
    %c0_i32_0 = arith.constant 0 : i32
    %c0_i32_1 = arith.constant 0 : i32
    return %c0_i32, %c0_i32_0 : i32, i32
  }
  func.func @transform_4(%arg0: i32, %arg1: i32) -> (i32, i32) {
    %c0_i32 = arith.constant 0 : i32
    %c0_i32_0 = arith.constant 0 : i32
    %c0_i32_1 = arith.constant 0 : i32
    return %c0_i32, %c0_i32_0 : i32, i32
  }
  func.func @transform_5(%arg0: i32, %arg1: i32) -> (i32, i32, i32) {
    %c0_i32 = arith.constant 0 : i32
    %c0_i32_0 = arith.constant 0 : i32
    return %arg0, %arg1, %c0_i32 : i32, i32, i32
  }
}

</mosaic_0001>

<bundles_post_ra>
// kernel: bc_forward_pallas.2
= control target key start
LH: loop header
LB: loop body
LE: loop exit
PB: predicated region body
PF: predicated region fallthrough
CT: control target
= control target key end

     0   :  { %vm314_vm0 = vcmask 1042432   ;;  %vm310_vm1 = vcmask 48128   ;;  %vm1192_vm2 = vcmask 1040384   ;;  %vm1193_vm3 = vcmask 1041408   ;;  %s2794_s2 = inlined_call_operand.vmem [shape: bf16[2051,32], index: 2, kind: input, shape index: {}]   ;;  %s2795_s3 = inlined_call_operand.vmem [shape: bf16[6,32], index: 3, kind: input, shape index: {}]   ;;  %s2796_s1 = inlined_call_operand.vmem [shape: bf16[16,6], index: 1, kind: input, shape index: {}]   ;;  %s2797_s0 = inlined_call_operand.vmem [shape: bf16[16,2051], index: 0, kind: input, shape index: {}]   ;;  %s2798_s4 = inlined_call_operand.vmem [shape: f32[1,32], index: 4, kind: input, shape index: {}]   ;;  %s2799_s6 = inlined_call_operand.vmem [shape: f32[1,128], index: 6, kind: input, shape index: {}]   ;;  %s2800_s5 = inlined_call_operand.vmem [shape: bf16[32,128], index: 5, kind: input, shape index: {}]   ;;  %s2801_s7 = inlined_call_operand.vmem [shape: bf16[16,128], index: 7, kind: output, shape index: {}]  }
   0x1   :  { %v2111_v0 = vld [vmem:[%s2794_s2 + $0x38] sm:$0xff]  ;;  %v2110_v3 = vld [vmem:[%s2794_s2 + $0x30] sm:$0xff]  ;;  %v304_v5 = vld [vmem:[%s2795_s3] sm:$0x7]  ;;  %vm1188_vm4 = vcmask 23552   ;;  %vm1466_vm5 = vcmask 261120  }
   0x2   :  { %v2119_v1 = vld [vmem:[%s2794_s2 + $0x78] sm:$0xff]  ;;  %1199 = vmatpush.bf16.msra.mxu1 %v2111_v0  ;;  %v2118_v4 = vld [vmem:[%s2794_s2 + $0x70] sm:$0xff]  ;;  %v316_v8 = vsel %vm314_vm0, %v304_v5, 0  ;;  %v2109_v10 = vld [vmem:[%s2794_s2 + $0x28] sm:$0xff] }
   0x3   :  { %v2127_v2 = vld [vmem:[%s2794_s2 + $0xb8] sm:$0xff]  ;;  %1213 = vmatpush.bf16.msra.mxu2 %v2119_v1  ;;  %v2126_v7 = vld [vmem:[%s2794_s2 + $0xb0] sm:$0xff]  ;;  %325 = vmatpush.bf16.msra.mxu0 %v316_v8  ;;  %v2117_v11 = vld [vmem:[%s2794_s2 + $0x68] sm:$0xff] }
   0x4   :  { %v2135_v6 = vld [vmem:[%s2794_s2 + $0xf8] sm:$0xff]  ;;  %1227 = vmatpush.bf16.msra.mxu3 %v2127_v2  ;;  %v2134_v9 = vld [vmem:[%s2794_s2 + $0xf0] sm:$0xff]  ;;  %v2125_v12 = vld [vmem:[%s2794_s2 + $0xa8] sm:$0xff] }
   0x5   :  { %v2133_v13 = vld [vmem:[%s2794_s2 + $0xe8] sm:$0xff]  ;;  %v2232_v14 = vld [vmem:[%s2796_s1] sm:$0xff]  ;;  %v2107_v19 = vld [vmem:[%s2794_s2 + $0x18] sm:$0xff] }
   0x6   :  { %1200 = vmatpush.bf16.msra.mxu1 %v2110_v3  ;;  %v2108_v15 = vld [vmem:[%s2794_s2 + $0x20] sm:$0xff]  ;;  %1496 = vmatmul.msk.bf16.vlgmr.msra.gmra.mxu0 %vm310_vm1, %v2232_v14  ;;  %v2115_v20 = vld [vmem:[%s2794_s2 + $0x58] sm:$0xff]  ;;  %v2106_v23 = vld [vmem:[%s2794_s2 + $0x10] sm:$0xff] }
   0x7   :  { %1241 = vmatpush.bf16.msrb.mxu0 %v2135_v6  ;;  %1214 = vmatpush.bf16.msra.mxu2 %v2118_v4  ;;  %v2116_v16 = vld [vmem:[%s2794_s2 + $0x60] sm:$0xff]  ;;  %v2123_v21 = vld [vmem:[%s2794_s2 + $0x98] sm:$0xff]  ;;  %v2114_v24 = vld [vmem:[%s2794_s2 + $0x50] sm:$0xff] }
   0x8   :  { %1228 = vmatpush.bf16.msra.mxu3 %v2126_v7  ;;  %v2124_v17 = vld [vmem:[%s2794_s2 + $0xa0] sm:$0xff]  ;;  %v2131_v22 = vld [vmem:[%s2794_s2 + $0xd8] sm:$0xff]  ;;  %v2122_v25 = vld [vmem:[%s2794_s2 + $0x90] sm:$0xff] }
   0x9   :  { %v2132_v18 = vld [vmem:[%s2794_s2 + $0xe0] sm:$0xff]  ;;  %v2130_v26 = vld [vmem:[%s2794_s2 + $0xd0] sm:$0xff]  ;;  %v2105_v27 = vld [vmem:[%s2794_s2 + $0x8] sm:$0xff] }
   0xa   :  { %1201 = vmatpush.bf16.msra.mxu1 %v2109_v10  ;;  %v2113_v28 = vld [vmem:[%s2794_s2 + $0x48] sm:$0xff]  ;;  %v2104_v30 = vld [vmem:[%s2794_s2] sm:$0xff]  ;;  %v2143_v33 = vld [vmem:[%s2794_s2 + $0x138] sm:$0xff] }
   0xb   :  { %1242 = vmatpush.bf16.msrb.mxu0 %v2134_v9  ;;  %1215 = vmatpush.bf16.msra.mxu2 %v2117_v11  ;;  %v2121_v29 = vld [vmem:[%s2794_s2 + $0x88] sm:$0xff]  ;;  %v2112_v31 = vld [vmem:[%s2794_s2 + $0x40] sm:$0xff]  ;;  %v2151_v41 = vld [vmem:[%s2794_s2 + $0x178] sm:$0xff] }
   0xc   :  { %1229 = vmatpush.bf16.msra.mxu3 %v2125_v12  ;;  %v2120_v32 = vld [vmem:[%s2794_s2 + $0x80] sm:$0xff]  ;;  %v2129_v34 = vld [vmem:[%s2794_s2 + $0xc8] sm:$0xff]  ;;  %v2159_v42 = vld [vmem:[%s2794_s2 + $0x1b8] sm:$0xff] }
   0xd   :  { %v2087_v35 = vld [vmem:[%s2797_s0 + $0x4] sm:$0xf]  ;;  %v1501_v36 = vld [vmem:[%s2797_s0 + $0x44] sm:$0xf0]  ;;  %v2096_v38 = vld [vmem:[%s2797_s0 + $0x48] sm:$0xf0] }
   0xe   :  { %1202 = vmatpush.bf16.msra.mxu1 %v2108_v15  ;;  %v1507_v37 = vld [vmem:[%s2797_s0 + $0x8] sm:$0xf]  ;;  %v1499_v39 = vld [vmem:[%s2797_s0] sm:$0xf]  ;;  %v2095_v40 = vld [vmem:[%s2797_s0 + $0x40] sm:$0xf0]  ;;  %v1504_v43 = vor.u32 %v2087_v35, %v1501_v36 }
   0xf   :  { %1243 = vmatpush.bf16.msrb.mxu0 %v2133_v13  ;;  %1216 = vmatpush.bf16.msra.mxu2 %v2116_v16  ;;  %v2128_v44 = vld [vmem:[%s2794_s2 + $0xc0] sm:$0xff]  ;;  %v1508_v45 = vor.u32 %v2096_v38, %v1507_v37  ;;  %v1500_v46 = vor.u32 %v2095_v40, %v1499_v39  ;;  %v2088_v47 = vld [vmem:[%s2797_s0 + $0xc] sm:$0xf]  ;;  %v1509_v48 = vld [vmem:[%s2797_s0 + $0x4c] sm:$0xf0] }
  0x10   :  { %1230 = vmatpush.bf16.msra.mxu3 %v2124_v17  ;;  %v2142_v49 = vld [vmem:[%s2794_s2 + $0x130] sm:$0xff]  ;;  %v2167_v50 = vld [vmem:[%s2794_s2 + $0x1f8] sm:$0xff]  ;;  %v1512_v53 = vor.u32 %v2088_v47, %v1509_v48  ;;  %v2141_v54 = vld [vmem:[%s2794_s2 + $0x128] sm:$0xff] }
  0x11   :  { %v2150_v51 = vld [vmem:[%s2794_s2 + $0x170] sm:$0xff]  ;;  %v2149_v56 = vld [vmem:[%s2794_s2 + $0x168] sm:$0xff]  ;;  %v2140_v58 = vld [vmem:[%s2794_s2 + $0x120] sm:$0xff] }
  0x12   :  { %1203 = vmatpush.bf16.msra.mxu1 %v2107_v19  ;;  %v2158_v52 = vld [vmem:[%s2794_s2 + $0x1b0] sm:$0xff]  ;;  %v2157_v57 = vld [vmem:[%s2794_s2 + $0x1a8] sm:$0xff]  ;;  %v2148_v60 = vld [vmem:[%s2794_s2 + $0x160] sm:$0xff] }
  0x13   :  { %1244 = vmatpush.bf16.msrb.mxu0 %v2132_v18  ;;  %1217 = vmatpush.bf16.msra.mxu2 %v2115_v20  ;;  %v2166_v55 = vld [vmem:[%s2794_s2 + $0x1f0] sm:$0xff]  ;;  %v2165_v59 = vld [vmem:[%s2794_s2 + $0x1e8] sm:$0xff]  ;;  %v2156_v61 = vld [vmem:[%s2794_s2 + $0x1a0] sm:$0xff] }
  0x14   :  { %1231 = vmatpush.bf16.msra.mxu3 %v2123_v21  ;;  %v2139_v62 = vld [vmem:[%s2794_s2 + $0x118] sm:$0xff]  ;;  %v2164_v63 = vld [vmem:[%s2794_s2 + $0x1e0] sm:$0xff]  ;;  %v2138_v2 = vld [vmem:[%s2794_s2 + $0x110] sm:$0xff] }
  0x15   :  { %v2147_v0 = vld [vmem:[%s2794_s2 + $0x158] sm:$0xff]  ;;  %v2146_v4 = vld [vmem:[%s2794_s2 + $0x150] sm:$0xff]  ;;  %v2137_v6 = vld [vmem:[%s2794_s2 + $0x108] sm:$0xff] }
  0x16   :  { %1204 = vmatpush.bf16.msra.mxu1 %v2106_v23  ;;  %v2155_v1 = vld [vmem:[%s2794_s2 + $0x198] sm:$0xff]  ;;  %v2154_v5 = vld [vmem:[%s2794_s2 + $0x190] sm:$0xff]  ;;  %v2145_v8 = vld [vmem:[%s2794_s2 + $0x148] sm:$0xff] }
  0x17   :  { %1245 = vmatpush.bf16.msrb.mxu0 %v2131_v22  ;;  %1218 = vmatpush.bf16.msra.mxu2 %v2114_v24  ;;  %v2163_v3 = vld [vmem:[%s2794_s2 + $0x1d8] sm:$0xff]  ;;  %v2162_v7 = vld [vmem:[%s2794_s2 + $0x1d0] sm:$0xff]  ;;  %v2153_v9 = vld [vmem:[%s2794_s2 + $0x188] sm:$0xff] }
  0x18   :  { %1232 = vmatpush.bf16.msra.mxu3 %v2122_v25  ;;  %v2136_v10 = vld [vmem:[%s2794_s2 + $0x100] sm:$0xff]  ;;  %v2161_v13 = vld [vmem:[%s2794_s2 + $0x1c8] sm:$0xff]  ;;  %v1515_v14 = vld [vmem:[%s2797_s0 + $0x10] sm:$0xf] }
  0x19   :  { %v2144_v11 = vld [vmem:[%s2794_s2 + $0x140] sm:$0xff]  ;;  %v2097_v15 = vld [vmem:[%s2797_s0 + $0x50] sm:$0xf0]  ;;  %v1517_v17 = vld [vmem:[%s2797_s0 + $0x54] sm:$0xf0] }
  0x1a   :  { %1205 = vmatpush.bf16.msra.mxu1 %v2105_v27  ;;  %v2152_v12 = vld [vmem:[%s2794_s2 + $0x180] sm:$0xff]  ;;  %v2089_v16 = vld [vmem:[%s2797_s0 + $0x14] sm:$0xf]  ;;  %v1523_v18 = vld [vmem:[%s2797_s0 + $0x18] sm:$0xf]  ;;  %v1516_v23 = vor.u32 %v2097_v15, %v1515_v14 }
  0x1b   :  { %1246 = vmatpush.bf16.msrb.mxu0 %v2130_v26  ;;  %1219 = vmatpush.bf16.msra.mxu2 %v2113_v28  ;;  %v2098_v19 = vld [vmem:[%s2797_s0 + $0x58] sm:$0xf0]  ;;  %v1520_v24 = vor.u32 %v2089_v16, %v1517_v17  ;;  %v2160_v26 = vld [vmem:[%s2794_s2 + $0x1c0] sm:$0xff]  ;;  %v2181_v35 = vld [vmem:[%s2794_s2 + $0x268] sm:$0xff] }
  0x1c   :  { %1233 = vmatpush.bf16.msra.mxu3 %v2121_v29  ;;  %v2175_v20 = vld [vmem:[%s2794_s2 + $0x238] sm:$0xff]  ;;  %v1524_v25 = vor.u32 %v2098_v19, %v1523_v18  ;;  %v1525_v28 = vld [vmem:[%s2797_s0 + $0x5c] sm:$0xf0]  ;;  %v2174_v29 = vld [vmem:[%s2794_s2 + $0x230] sm:$0xff] }
  0x1d   :  { %v2183_v21 = vld [vmem:[%s2794_s2 + $0x278] sm:$0xff]  ;;  %v2189_v36 = vld [vmem:[%s2794_s2 + $0x2a8] sm:$0xff]  ;;  %v2198_v37 = vld [vmem:[%s2794_s2 + $0x2f0] sm:$0xff] }
  0x1e   :  { %1206 = vmatpush.bf16.msra.mxu1 %v2104_v30  ;;  %v2191_v22 = vld [vmem:[%s2794_s2 + $0x2b8] sm:$0xff]  ;;  %v2182_v30 = vld [vmem:[%s2794_s2 + $0x270] sm:$0xff]  ;;  %v2172_v38 = vld [vmem:[%s2794_s2 + $0x220] sm:$0xff] }
  0x1f   :  { %1247 = vmatpush.bf16.msrb.mxu0 %v2129_v34  ;;  %1220 = vmatpush.bf16.msra.mxu2 %v2112_v31  ;;  %v2090_v27 = vld [vmem:[%s2797_s0 + $0x1c] sm:$0xf]  ;;  %v2190_v31 = vld [vmem:[%s2794_s2 + $0x2b0] sm:$0xff]  ;;  %v2173_v34 = vld [vmem:[%s2794_s2 + $0x228] sm:$0xff] }
  0x20   :  { %1234 = vmatpush.bf16.msra.mxu3 %v2120_v32  ;;  %v2199_v32 = vld [vmem:[%s2794_s2 + $0x2f8] sm:$0xff]  ;;  %v2180_v39 = vld [vmem:[%s2794_s2 + $0x260] sm:$0xff]  ;;  %v2178_v47 = vld [vmem:[%s2794_s2 + $0x250] sm:$0xff] }
  0x21   :  { %1207 = vmatmul.bf16.vlgmr.msra.gmra.mxu1 %v1500_v46  ;;  %v2188_v40 = vld [vmem:[%s2794_s2 + $0x2a0] sm:$0xff]  ;;  %v2170_v46 = vld [vmem:[%s2794_s2 + $0x210] sm:$0xff]  ;;  %v2213_v14 = vld [vmem:[%s2794_s2 + $0x368] sm:$0xff] }
  0x22   :  { %1255 = vmatpush.bf16.msrb.mxu1 %v2143_v33  ;;  %1221 = vmatmul.bf16.vlgmr.msra.gmra.mxu2 %v1504_v43  ;;  %v1528_v33 = vor.u32 %v2090_v27, %v1525_v28  ;;  %v2179_v43 = vld [vmem:[%s2794_s2 + $0x258] sm:$0xff]  ;;  %v2186_v48 = vld [vmem:[%s2794_s2 + $0x290] sm:$0xff]  ;;  %v2221_v15 = vld [vmem:[%s2794_s2 + $0x3a8] sm:$0xff] }
  0x23   :  { %1269 = vmatpush.bf16.msrb.mxu2 %v2151_v41  ;;  %1248 = vmatpush.bf16.msrb.mxu0 %v2128_v44  ;;  %v2197_v41 = vld [vmem:[%s2794_s2 + $0x2e8] sm:$0xff]  ;;  %v2187_v44 = vld [vmem:[%s2794_s2 + $0x298] sm:$0xff]  ;;  %v2230_v17 = vld [vmem:[%s2794_s2 + $0x3f0] sm:$0xff] }
  0x24   :  { %1283 = vmatpush.bf16.msrb.mxu3 %v2159_v42  ;;  %v2171_v42 = vld [vmem:[%s2794_s2 + $0x218] sm:$0xff]  ;;  %v2204_v18 = vld [vmem:[%s2794_s2 + $0x320] sm:$0xff]  ;;  %v2202_v27 = vld [vmem:[%s2794_s2 + $0x310] sm:$0xff] }
  0x25   :  { %1235 = vmatmul.bf16.vlgmr.msra.gmra.mxu3 %v1508_v45  ;;  %v2196_v45 = vld [vmem:[%s2794_s2 + $0x2e0] sm:$0xff]  ;;  %v2210_v28 = vld [vmem:[%s2794_s2 + $0x350] sm:$0xff] }
  0x26   :  { %1256 = vmatpush.bf16.msrb.mxu1 %v2142_v49  ;;  %1249 = vmatmul.bf16.vlgmr.msrb.gmra.mxu0 %v1512_v53  ;;  %v2195_v49 = vld [vmem:[%s2794_s2 + $0x2d8] sm:$0xff]  ;;  %v2194_v53 = vld [vmem:[%s2794_s2 + $0x2d0] sm:$0xff]  ;;  %v2212_v19 = vld [vmem:[%s2794_s2 + $0x360] sm:$0xff] }
  0x27   :  { %1297 = vmatpush.bf16.msra.mxu0 %v2167_v50  ;;  %1270 = vmatpush.bf16.msrb.mxu2 %v2150_v51  ;;  %v2169_v50 = vld [vmem:[%s2794_s2 + $0x208] sm:$0xff] }
  0x28   :  { %1284 = vmatpush.bf16.msrb.mxu3 %v2158_v52  ;;  %v2177_v51 = vld [vmem:[%s2794_s2 + $0x248] sm:$0xff] }
  0x29   :  { %v2185_v52 = vld [vmem:[%s2794_s2 + $0x288] sm:$0xff] }
  0x2a   :  { %1257 = vmatpush.bf16.msrb.mxu1 %v2141_v54  ;;  %v2168_v54 = vld [vmem:[%s2794_s2 + $0x200] sm:$0xff] }
  0x2b   :  { %1298 = vmatpush.bf16.msra.mxu0 %v2166_v55  ;;  %1271 = vmatpush.bf16.msrb.mxu2 %v2149_v56  ;;  %v2176_v55 = vld [vmem:[%s2794_s2 + $0x240] sm:$0xff] }
  0x2c   :  { %1285 = vmatpush.bf16.msrb.mxu3 %v2157_v57  ;;  %v2184_v56 = vld [vmem:[%s2794_s2 + $0x280] sm:$0xff]  ;;  %v2207_v57 = vld [vmem:[%s2794_s2 + $0x338] sm:$0xff] }
  0x2e   :  { %1258 = vmatpush.bf16.msrb.mxu1 %v2140_v58  ;;  %v1531_v58 = vld [vmem:[%s2797_s0 + $0x20] sm:$0xf] }
  0x2f   :  { %1299 = vmatpush.bf16.msra.mxu0 %v2165_v59  ;;  %1272 = vmatpush.bf16.msrb.mxu2 %v2148_v60  ;;  %v2099_v59 = vld [vmem:[%s2797_s0 + $0x60] sm:$0xf0] }
  0x30   :  { %1286 = vmatpush.bf16.msrb.mxu3 %v2156_v61  ;;  %v2091_v60 = vld [vmem:[%s2797_s0 + $0x24] sm:$0xf]  ;;  %v1533_v61 = vld [vmem:[%s2797_s0 + $0x64] sm:$0xf0] }
  0x32   :  { %1259 = vmatpush.bf16.msrb.mxu1 %v2139_v62  ;;  %v1539_v62 = vld [vmem:[%s2797_s0 + $0x28] sm:$0xf] }
  0x33   :  { %1300 = vmatpush.bf16.msra.mxu0 %v2164_v63  ;;  %1273 = vmatpush.bf16.msrb.mxu2 %v2147_v0  ;;  %v2100_v63 = vld [vmem:[%s2797_s0 + $0x68] sm:$0xf0]  ;;  %v2215_v0 = vld [vmem:[%s2794_s2 + $0x378] sm:$0xff] }
  0x34   :  { %1287 = vmatpush.bf16.msrb.mxu3 %v2155_v1  ;;  %v2223_v1 = vld [vmem:[%s2794_s2 + $0x3b8] sm:$0xff] }
  0x36   :  { %1260 = vmatpush.bf16.msrb.mxu1 %v2138_v2  ;;  %v2193_v2 = vld [vmem:[%s2794_s2 + $0x2c8] sm:$0xff] }
  0x37   :  { %1301 = vmatpush.bf16.msra.mxu0 %v2163_v3  ;;  %1274 = vmatpush.bf16.msrb.mxu2 %v2146_v4  ;;  %v1532_v3 = vor.u32 %v2099_v59, %v1531_v58  ;;  %v1536_v4 = vor.u32 %v2091_v60, %v1533_v61  ;;  %v1563_v58 = vld [vmem:[%s2797_s0 + $0x40] sm:$0xf]  ;;  %v2103_v59 = vld [vmem:[%s2797_s0 + $0x80] sm:$0xf0] }
  0x38   :  { %1288 = vmatpush.bf16.msrb.mxu3 %v2154_v5  ;;  %v1540_v5 = vor.u32 %v2100_v63, %v1539_v62  ;;  %v1564_v60 = vor.u32 %v2103_v59, %v1563_v58 }
  0x3a   :  { %1261 = vmatpush.bf16.msrb.mxu1 %v2137_v6  ;;  %v2206_v6 = vld [vmem:[%s2794_s2 + $0x330] sm:$0xff] }
  0x3b   :  { %1302 = vmatpush.bf16.msra.mxu0 %v2162_v7  ;;  %1275 = vmatpush.bf16.msrb.mxu2 %v2145_v8  ;;  %v2214_v7 = vld [vmem:[%s2794_s2 + $0x370] sm:$0xff] }
  0x3c   :  { %1289 = vmatpush.bf16.msrb.mxu3 %v2153_v9  ;;  %v2222_v8 = vld [vmem:[%s2794_s2 + $0x3b0] sm:$0xff]  ;;  %v2192_v9 = vld [vmem:[%s2794_s2 + $0x2c0] sm:$0xff] }
  0x3e   :  { %1262 = vmatpush.bf16.msrb.mxu1 %v2136_v10  ;;  %v2231_v10 = vld [vmem:[%s2794_s2 + $0x3f8] sm:$0xff] }
  0x3f   :  { %1303 = vmatpush.bf16.msra.mxu0 %v2161_v13  ;;  %1276 = vmatpush.bf16.msrb.mxu2 %v2144_v11  ;;  %v2092_v11 = vld [vmem:[%s2797_s0 + $0x2c] sm:$0xf] }
  0x40   :  { %1290 = vmatpush.bf16.msrb.mxu3 %v2152_v12  ;;  %v1541_v12 = vld [vmem:[%s2797_s0 + $0x6c] sm:$0xf0]  ;;  %v2205_v13 = vld [vmem:[%s2794_s2 + $0x328] sm:$0xff] }
  0x41   :  { %1263 = vmatmul.bf16.vlgmr.msrb.gmra.mxu1 %v1516_v23  ;;  %v1544_v16 = vor.u32 %v2092_v11, %v1541_v12  ;;  %v2211_v23 = vld [vmem:[%s2794_s2 + $0x358] sm:$0xff] }
  0x42   :  { %1311 = vmatpush.bf16.msra.mxu1 %v2175_v20  ;;  %1277 = vmatmul.bf16.vlgmr.msrb.gmra.mxu2 %v1520_v24  ;;  %v2220_v20 = vld [vmem:[%s2794_s2 + $0x3a0] sm:$0xff]  ;;  %v2219_v24 = vld [vmem:[%s2794_s2 + $0x398] sm:$0xff] }
  0x43   :  { %1325 = vmatpush.bf16.msra.mxu2 %v2183_v21  ;;  %1291 = vmatmul.bf16.vlgmr.msrb.gmra.mxu3 %v1524_v25  ;;  %v2229_v21 = vld [vmem:[%s2794_s2 + $0x3e8] sm:$0xff]  ;;  %v2228_v25 = vld [vmem:[%s2794_s2 + $0x3e0] sm:$0xff] }
  0x44   :  { %1339 = vmatpush.bf16.msra.mxu3 %v2191_v22  ;;  %1304 = vmatpush.bf16.msra.mxu0 %v2160_v26  ;;  %v2203_v22 = vld [vmem:[%s2794_s2 + $0x318] sm:$0xff]  ;;  %v301_v26 = vld [vmem:[%s2794_s2 + $0x400] sm:$0x3] }
  0x46   :  { %1312 = vmatpush.bf16.msra.mxu1 %v2174_v29  ;;  %v2218_v29 = vld [vmem:[%s2794_s2 + $0x390] sm:$0xff] }
  0x47   :  { %1326 = vmatpush.bf16.msra.mxu2 %v2182_v30  ;;  %1305 = vmatmul.bf16.vlgmr.msra.gmra.mxu0 %v1528_v33  ;;  %v930_v30 = vunpack.c.l.b16 %v301_v26  ;;  %v2243_v33 = vmov 65535  }
  0x48   :  { %1340 = vmatpush.bf16.msra.mxu3 %v2190_v31  ;;  %1353 = vmatpush.bf16.msrb.mxu0 %v2199_v32  ;;  %v2227_v31 = vld [vmem:[%s2794_s2 + $0x3d8] sm:$0xff]  ;;  %v2201_v32 = vld [vmem:[%s2794_s2 + $0x308] sm:$0xff] }
  0x4a   :  { %1313 = vmatpush.bf16.msra.mxu1 %v2173_v34  ;;  %v1194_v34 = vsel %vm1192_vm2, 4294967295, %v2243_v33 }
  0x4b   :  { %1327 = vmatpush.bf16.msra.mxu2 %v2181_v35  ;;  %v2209_v35 = vld [vmem:[%s2794_s2 + $0x348] sm:$0xff] }
  0x4c   :  { %1341 = vmatpush.bf16.msra.mxu3 %v2189_v36  ;;  %1354 = vmatpush.bf16.msrb.mxu0 %v2198_v37  ;;  %v2217_v36 = vld [vmem:[%s2794_s2 + $0x388] sm:$0xff]  ;;  %v2226_v37 = vld [vmem:[%s2794_s2 + $0x3d0] sm:$0xff] }
  0x4e   :  { %1314 = vmatpush.bf16.msra.mxu1 %v2172_v38  ;;  %v1059_v38 = vpack.c.b16 %v930_v30, %v930_v30 }
  0x4f   :  { %1328 = vmatpush.bf16.msra.mxu2 %v2180_v39  ;;  %v2200_v39 = vld [vmem:[%s2794_s2 + $0x300] sm:$0xff] }
  0x50   :  { %1342 = vmatpush.bf16.msra.mxu3 %v2188_v40  ;;  %1355 = vmatpush.bf16.msrb.mxu0 %v2197_v41  ;;  %v2208_v40 = vld [vmem:[%s2794_s2 + $0x340] sm:$0xff] }
  0x51   :  { %v2216_v41 = vld [vmem:[%s2794_s2 + $0x380] sm:$0xff] }
  0x52   :  { %1315 = vmatpush.bf16.msra.mxu1 %v2171_v42  ;;  %v1195_v42 = vsel %vm1193_vm3, %v1194_v34, 0 }
  0x53   :  { %1329 = vmatpush.bf16.msra.mxu2 %v2179_v43  ;;  %v1547_v43 = vld [vmem:[%s2797_s0 + $0x30] sm:$0xf] }
  0x54   :  { %1343 = vmatpush.bf16.msra.mxu3 %v2187_v44  ;;  %1356 = vmatpush.bf16.msrb.mxu0 %v2196_v45  ;;  %v2101_v44 = vld [vmem:[%s2797_s0 + $0x70] sm:$0xf0] }
  0x55   :  { %v2093_v45 = vld [vmem:[%s2797_s0 + $0x34] sm:$0xf] }
  0x56   :  { %1316 = vmatpush.bf16.msra.mxu1 %v2170_v46  ;;  %v1549_v46 = vld [vmem:[%s2797_s0 + $0x74] sm:$0xf0] }
  0x57   :  { %1330 = vmatpush.bf16.msra.mxu2 %v2178_v47  ;;  %v1555_v47 = vld [vmem:[%s2797_s0 + $0x38] sm:$0xf] }
  0x58   :  { %1344 = vmatpush.bf16.msra.mxu3 %v2186_v48  ;;  %1357 = vmatpush.bf16.msrb.mxu0 %v2195_v49  ;;  %v2102_v48 = vld [vmem:[%s2797_s0 + $0x78] sm:$0xf0]  ;;  %v1197_v49 = vand.u32 %v1195_v42, %v1059_v38 }
  0x5a   :  { %1317 = vmatpush.bf16.msra.mxu1 %v2169_v50  ;;  %v2225_v50 = vld [vmem:[%s2794_s2 + $0x3c8] sm:$0xff] }
  0x5b   :  { %1331 = vmatpush.bf16.msra.mxu2 %v2177_v51  ;;  %v1548_v51 = vor.u32 %v2101_v44, %v1547_v43 }
  0x5c   :  { %1345 = vmatpush.bf16.msra.mxu3 %v2185_v52  ;;  %1358 = vmatpush.bf16.msrb.mxu0 %v2194_v53  ;;  %v1552_v52 = vor.u32 %v2093_v45, %v1549_v46  ;;  %v1556_v53 = vor.u32 %v2102_v48, %v1555_v47 }
  0x5e   :  { %1318 = vmatpush.bf16.msra.mxu1 %v2168_v54  ;;  %v2224_v54 = vld [vmem:[%s2794_s2 + $0x3c0] sm:$0xff] }
  0x5f   :  { %1332 = vmatpush.bf16.msra.mxu2 %v2176_v55  ;;  %v2094_v55 = vld [vmem:[%s2797_s0 + $0x3c] sm:$0xf] }
  0x60   :  { %1346 = vmatpush.bf16.msra.mxu3 %v2184_v56  ;;  %1359 = vmatpush.bf16.msrb.mxu0 %v2193_v2  ;;  %v1557_v56 = vld [vmem:[%s2797_s0 + $0x7c] sm:$0xf0] }
  0x61   :  { %1319 = vmatmul.bf16.vlgmr.msra.gmra.mxu1 %v1532_v3 }
  0x62   :  { %1367 = vmatpush.bf16.msrb.mxu1 %v2207_v57  ;;  %1333 = vmatmul.bf16.vlgmr.msra.gmra.mxu2 %v1536_v4  ;;  %v1560_v57 = vor.u32 %v2094_v55, %v1557_v56 }
  0x63   :  { %1381 = vmatpush.bf16.msrb.mxu2 %v2215_v0  ;;  %1347 = vmatmul.bf16.vlgmr.msra.gmra.mxu3 %v1540_v5 }
  0x64   :  { %1395 = vmatpush.bf16.msrb.mxu3 %v2223_v1  ;;  %1360 = vmatpush.bf16.msrb.mxu0 %v2192_v9 }
  0x66   :  { %1368 = vmatpush.bf16.msrb.mxu1 %v2206_v6 }
  0x67   :  { %1382 = vmatpush.bf16.msrb.mxu2 %v2214_v7  ;;  %1361 = vmatmul.bf16.vlgmr.msrb.gmra.mxu0 %v1544_v16 }
  0x68   :  { %1396 = vmatpush.bf16.msrb.mxu3 %v2222_v8  ;;  %1409 = vmatpush.bf16.msra.mxu0 %v2231_v10 }
  0x6a   :  { %1369 = vmatpush.bf16.msrb.mxu1 %v2205_v13 }
  0x6b   :  { %1383 = vmatpush.bf16.msrb.mxu2 %v2213_v14 }
  0x6c   :  { %1397 = vmatpush.bf16.msrb.mxu3 %v2221_v15  ;;  %1410 = vmatpush.bf16.msra.mxu0 %v2230_v17 }
  0x6e   :  { %1370 = vmatpush.bf16.msrb.mxu1 %v2204_v18 }
  0x6f   :  { %1384 = vmatpush.bf16.msrb.mxu2 %v2212_v19 }
  0x70   :  { %1398 = vmatpush.bf16.msrb.mxu3 %v2220_v20  ;;  %1411 = vmatpush.bf16.msra.mxu0 %v2229_v21 }
  0x72   :  { %1371 = vmatpush.bf16.msrb.mxu1 %v2203_v22 }
  0x73   :  { %1385 = vmatpush.bf16.msrb.mxu2 %v2211_v23 }
  0x74   :  { %1399 = vmatpush.bf16.msrb.mxu3 %v2219_v24  ;;  %1412 = vmatpush.bf16.msra.mxu0 %v2228_v25 }
  0x76   :  { %1372 = vmatpush.bf16.msrb.mxu1 %v2202_v27  ;;  %v2234_v27 = vld [vmem:[%s2800_s5 + $0x8] sm:$0xff] }
  0x77   :  { %1386 = vmatpush.bf16.msrb.mxu2 %v2210_v28 }
  0x78   :  { %1400 = vmatpush.bf16.msrb.mxu3 %v2218_v29  ;;  %1413 = vmatpush.bf16.msra.mxu0 %v2227_v31 }
  0x7a   :  { %1373 = vmatpush.bf16.msrb.mxu1 %v2201_v32 }
  0x7b   :  { %1387 = vmatpush.bf16.msrb.mxu2 %v2209_v35 }
  0x7c   :  { %1401 = vmatpush.bf16.msrb.mxu3 %v2217_v36  ;;  %1414 = vmatpush.bf16.msra.mxu0 %v2226_v37  ;;  %v2233_v37 = vld [vmem:[%s2800_s5] sm:$0xff] }
  0x7e   :  { %1374 = vmatpush.bf16.msrb.mxu1 %v2200_v39 }
  0x7f   :  { %1388 = vmatpush.bf16.msrb.mxu2 %v2208_v40 }
  0x80   :  { %1402 = vmatpush.bf16.msrb.mxu3 %v2216_v41  ;;  %1415 = vmatpush.bf16.msra.mxu0 %v2225_v50 }
  0x81   :  { %1375 = vmatmul.bf16.vlgmr.msrb.gmra.mxu1 %v1548_v51 }
  0x82   :  { %1430 = vmatpush.bf16.msra.mxu1 %v1197_v49  ;;  %1389 = vmatmul.bf16.vlgmr.msrb.gmra.mxu2 %v1552_v52 }
  0x83   :  { %1403 = vmatmul.bf16.vlgmr.msrb.gmra.mxu3 %v1556_v53  ;;  %v327_v61 = vpop.f32.mrf.mxu0  ;;  %1476 = vmatpush.bf16.msra.mxu2 %v2234_v27 }
  0x84   :  { %1416 = vmatpush.bf16.msra.mxu0 %v2224_v54 }
  0x87   :  { %1417 = vmatmul.bf16.vlgmr.msra.gmra.mxu0 %v1560_v57  ;;  %1477 = vmatpush.bf16.msra.mxu2 %v2233_v37 }
  0x8b   :  { %v329_v63 = vpop.f32.mrf.mxu0 }
  0x91   :  { %2077 = vmatmul.msk.bf16.vlgmr.msra.gmra.mxu1 %vm1188_vm4, %v1564_v60 }
  0x9e   :  { %v1208_v62 = vpop.f32.mrf.mxu1 }
  0x9f   :  { %v1209_v8 = vadd.f32 %v1208_v62, %v327_v61 }
  0xa3   :  { %v1250_v3 = vpop.f32.mrf.mxu0 }
  0xa5   :  { %v1222_v0 = vpop.f32.mrf.mxu2 }
  0xa6   :  { %v1210_v2 = vpop.f32.mrf.mxu1  ;;  %v1223_v12 = vadd.f32 %v1222_v0, %v1209_v8 }
  0xa7   :  { %v1211_v13 = vadd.f32 %v1210_v2, %v329_v63 }
  0xa8   :  { %v1236_v1 = vpop.f32.mrf.mxu3 }
  0xa9   :  { %v1237_v15 = vadd.f32 %v1236_v1, %v1223_v12  ;;  %v2241_v1 = vld [vmem:[%s2798_s4] ss:$0 sm:$0xff] }
  0xaa   :  { %v2242_v12 = vld [vmem:[%s2799_s6] ss:$0 sm:$0xff] }
  0xab   :  { %v1252_v7 = vpop.f32.mrf.mxu0  ;;  %v1251_v20 = vadd.f32 %v1250_v3, %v1237_v15 }
  0xad   :  { %v1224_v4 = vpop.f32.mrf.mxu2 }
  0xae   :  { %v1225_v16 = vadd.f32 %v1224_v4, %v1211_v13 }
  0xb0   :  { %v1238_v5 = vpop.f32.mrf.mxu3 }
  0xb1   :  { %v1239_v21 = vadd.f32 %v1238_v5, %v1225_v16 }
  0xb3   :  { %v1253_v25 = vadd.f32 %v1252_v7, %v1239_v21 }
  0xbe   :  { %v1264_v6 = vpop.f32.mrf.mxu1 }
  0xbf   :  { %v1265_v22 = vadd.f32 %v1264_v6, %v1251_v20 }
  0xc4   :  { %v1306_v14 = vpop.f32.mrf.mxu0 }
  0xc5   :  { %v1278_v9 = vpop.f32.mrf.mxu2 }
  0xc6   :  { %v1292_v10 = vpop.f32.mrf.mxu3  ;;  %v1266_v11 = vpop.f32.mrf.mxu1  ;;  %v1279_v24 = vadd.f32 %v1278_v9, %v1265_v22 }
  0xc7   :  { %v1267_v28 = vadd.f32 %v1266_v11, %v1253_v25 }
  0xc8   :  { %v1293_v30 = vadd.f32 %v1292_v10, %v1279_v24 }
  0xca   :  { %v1307_v34 = vadd.f32 %v1306_v14, %v1293_v30 }
  0xcc   :  { %v1308_v23 = vpop.f32.mrf.mxu0 }
  0xcd   :  { %v1280_v17 = vpop.f32.mrf.mxu2 }
  0xce   :  { %v1294_v18 = vpop.f32.mrf.mxu3  ;;  %v1281_v31 = vadd.f32 %v1280_v17, %v1267_v28 }
  0xd0   :  { %v1295_v35 = vadd.f32 %v1294_v18, %v1281_v31 }
  0xd2   :  { %v1309_v40 = vadd.f32 %v1308_v23, %v1295_v35 }
  0xde   :  { %v1320_v19 = vpop.f32.mrf.mxu1 }
  0xdf   :  { %v1321_v36 = vadd.f32 %v1320_v19, %v1307_v34 }
  0xe4   :  { %v1362_v33 = vpop.f32.mrf.mxu0 }
  0xe5   :  { %v1334_v26 = vpop.f32.mrf.mxu2 }
  0xe6   :  { %v1348_v29 = vpop.f32.mrf.mxu3  ;;  %v1322_v32 = vpop.f32.mrf.mxu1  ;;  %v1335_v38 = vadd.f32 %v1334_v26, %v1321_v36 }
  0xe7   :  { %v1323_v43 = vadd.f32 %v1322_v32, %v1309_v40 }
  0xe8   :  { %v1349_v44 = vadd.f32 %v1348_v29, %v1335_v38 }
  0xea   :  { %v1363_v47 = vadd.f32 %v1362_v33, %v1349_v44 }
  0xec   :  { %v1364_v46 = vpop.f32.mrf.mxu0 }
  0xed   :  { %v1336_v39 = vpop.f32.mrf.mxu2 }
  0xee   :  { %v1350_v41 = vpop.f32.mrf.mxu3  ;;  %v1337_v45 = vadd.f32 %v1336_v39, %v1323_v43 }
  0xf0   :  { %v1351_v49 = vadd.f32 %v1350_v41, %v1337_v45 }
  0xf2   :  { %v1365_v54 = vadd.f32 %v1364_v46, %v1351_v49 }
  0xfe   :  { %v1376_v42 = vpop.f32.mrf.mxu1 }
  0xff   :  { %v1377_v52 = vadd.f32 %v1376_v42, %v1363_v47 }
 0x104   :  { %v1418_v55 = vpop.f32.mrf.mxu0 }
 0x105   :  { %v1390_v48 = vpop.f32.mrf.mxu2 }
 0x106   :  { %v1404_v50 = vpop.f32.mrf.mxu3  ;;  %v1378_v51 = vpop.f32.mrf.mxu1  ;;  %v1391_v53 = vadd.f32 %v1390_v48, %v1377_v52 }
 0x107   :  { %v1379_v56 = vadd.f32 %v1378_v51, %v1365_v54 }
 0x108   :  { %v1405_v57 = vadd.f32 %v1404_v50, %v1391_v53 }
 0x10a   :  { %v1419_v62 = vadd.f32 %v1418_v55, %v1405_v57 }
 0x10c   :  { %v1420_v2 = vpop.f32.mrf.mxu0 }
 0x10d   :  { %v1392_v58 = vpop.f32.mrf.mxu2 }
 0x10e   :  { %v1393_v59 = vadd.f32 %v1392_v58, %v1379_v56  ;;  %v1432_v60 = vpop.f32.mrf.mxu1  ;;  %v1406_v61 = vpop.f32.mrf.mxu3 }
 0x10f   :  { %v1433_v0 = vadd.f32 %v1432_v60, %v1419_v62 }
 0x110   :  { %v1407_v63 = vadd.f32 %v1406_v61, %v1393_v59 }
 0x111   :  { %v1441_v5 = vadd.f32 %v2241_v1, %v1433_v0 }
 0x112   :  { %v1421_v3 = vadd.f32 %v1420_v2, %v1407_v63 }
 0x113   :  { %v1443_v8 = vmax.f32 %v1441_v5, 0.0 }
 0x116   :  { %v1434_v4 = vpop.f32.mrf.mxu1 }
 0x117   :  { %v1435_v6 = vadd.f32 %v1434_v4, %v1421_v3 }
 0x119   :  { %v1442_v7 = vadd.f32 %v2241_v1, %v1435_v6 }
 0x11b   :  { %v1444_v9 = vmax.f32 %v1442_v7, 0.0 }
 0x11d   :  { %v1445_v10 = vpack.c.bf16 %v1444_v9, %v1443_v8 }
 0x11f   :  { %2086 = vmatmul.msk.bf16.vlgmr.msra.gmra.mxu2 %vm1466_vm5, %v1445_v10 }
 0x1a2   :  { %v1479_v11 = vpop.f32.mrf.mxu2 }
 0x1a3   :  { %v1480_v14 = vadd.f32 %v2242_v12, %v1479_v11 }
 0x1aa   :  { %v1481_v13 = vpop.f32.mrf.mxu2 }
 0x1ab   :  { %v1482_v15 = vadd.f32 %v2242_v12, %v1481_v13 }
 0x1ad   :  { %v2238_v16 = vpack.c.bf16 %v1482_v15, %v1480_v14 }
 0x1af   :  { %2239 = vst [vmem:[%s2801_s7] sm:$0xff] %v2238_v16  }

// kernel: bc_forward_pallas.3
= control target key start
LH: loop header
LB: loop body
LE: loop exit
PB: predicated region body
PF: predicated region fallthrough
CT: control target
= control target key end

     0   :  { %s2294_s18 = smov 0   ;;  %s2296_s19 = smov 0   ;;  %s2861_s0 = inlined_call_operand.vmem [shape: bf16[8,2,1,128], index: 0, kind: input, shape index: {}]   ;;  %s2862_s1 = inlined_call_operand.vmem [shape: f32[8,2,1,9], index: 1, kind: input, shape index: {}]   ;;  %s2863_s2 = inlined_call_operand.vmem [shape: bf16[32,128], index: 2, kind: input, shape index: {}]   ;;  %s2864_s3 = inlined_call_operand.vmem [shape: bf16[32,128], index: 3, kind: input, shape index: {}]   ;;  %s2865_s4 = inlined_call_operand.vmem [shape: f32[1,128], index: 4, kind: input, shape index: {}]   ;;  %s2866_s5 = inlined_call_operand.vmem [shape: f32[2,8,3], index: 5, kind: output, shape index: {}]  }
   0x1   :  { %s2298_s20 = smov 0   ;;  %s2300_s21 = smov 0  }
   0x2   :  { %s2302_s22 = smov 0  }
   0x3 LB: > { %s27_s23 = sadd.s32 1, %s2245_s21  ;;  %p43_p1 = scmp.ne.s32.totalorder %s2237_s19, %s2233_s18  ;;  %s2249_s22 = sphi %s2302_s22, %s15_s22   ;;  %s2245_s21 = sphi %s2300_s21, %s2871_s21   ;;  %s2241_s20 = sphi %s2298_s20, %s2870_s20   ;;  %s2237_s19 = sphi %s2296_s19, %s2869_s19   ;;  %s2233_s18 = sphi %s2294_s18, %s2868_s18  }
   0x4   : > { %p29_p0 = scmp.ge.s32.totalorder %s27_s23, 2  ;;  %p44_p2 = scmp.eq.s32.totalorder %s2249_s22, 0 }
   0x5   : > { %s36_s26 = sadd.s32 1, %s2237_s19  ;;  %p1944_p5 = scmp.ge.s32.totalorder %s2249_s22, 2 }
   0x6   : > { %s2873_s23 = smov (%p29_p0, %s27_s23), 0  ;;  %p2325_p3 = por %p44_p2, %p43_p1 }
   0x7   : > { %s32_s25 = ssub.s32 %s2245_s21, %s2873_s23  ;;  %197 = sbr.rel (%p1944_p5) target bundleno = 36 (0x24), region = 28 }
   0x8   : > { %p34_p4 = scmp.eq.s32.totalorder %s32_s25, 0 }
   0xa   : > { %s2333_s27 = scalar_select %p34_p4, %s2237_s19, %s36_s26  }
   0xc   : > { %200 = sbr.rel (!%p2325_p3) target bundleno = 24 (0x18), region = 32  ;;  %s202_s28 = sand.u32 (%p2325_p3), 1, %s2237_s19  }
   0xd   : > { %s208_s6 = scalar_lea.vmem (%p2325_p3), %s2861_s0, %s2245_s21  ;;  %s1945_s7 = sshll.u32 (%p2325_p3), %s202_s28, 3 }
   0xe   : > { %v225_v0 = vld [vmem:[%s208_s6] sm:$0x1] (%p2325_p3)  ;;  %v227_v1 = vld [vmem:[%s208_s6 + $0x2] sm:$0x1] (%p2325_p3)  ;;  %v229_v2 = vld [vmem:[%s208_s6 + $0x4] sm:$0x1] (%p2325_p3) }
   0xf   : > { %s204_s8 = scalar_lea.vmem (%p2325_p3), [#allocation3], %s1945_s7  ;;  %v231_v3 = vld [vmem:[%s208_s6 + $0x6] sm:$0x1] (%p2325_p3)  ;;  %v233_v4 = vld [vmem:[%s208_s6 + $0x8] sm:$0x1] (%p2325_p3) }
  0x10   : > { %226 = vst [vmem:[%s204_s8] sm:$0x1] (%p2325_p3), %v225_v0  ;;  %v235_v5 = vld [vmem:[%s208_s6 + $0xa] sm:$0x1] (%p2325_p3)  ;;  %v237_v6 = vld [vmem:[%s208_s6 + $0xc] sm:$0x1] (%p2325_p3) }
  0x11   : > { %228 = vst [vmem:[%s204_s8 + $0x1] sm:$0x1] %v227_v1  ;;  %v239_v7 = vld [vmem:[%s208_s6 + $0xe] sm:$0x1] }
  0x12   : > { %230 = vst [vmem:[%s204_s8 + $0x2] sm:$0x1] %v229_v2 }
  0x13   : > { %232 = vst [vmem:[%s204_s8 + $0x3] sm:$0x1] %v231_v3 }
  0x14   : > { %234 = vst [vmem:[%s204_s8 + $0x4] sm:$0x1] %v233_v4 }
  0x15   : > { %236 = vst [vmem:[%s204_s8 + $0x5] sm:$0x1] %v235_v5 }
  0x16   : > { %238 = vst [vmem:[%s204_s8 + $0x6] sm:$0x1] %v237_v6 }
  0x17   : > { %240 = vst [vmem:[%s204_s8 + $0x7] sm:$0x1] %v239_v7 }
  0x18 PF: > { %280 = sbr.rel (!%p2325_p3) target bundleno = 36 (0x24), region = 73  ;;  %s282_s9 = sand.u32 (%p2325_p3), 1, %s2237_s19  }
  0x19   : > { %s288_s12 = scalar_lea.vmem (%p2325_p3), %s2862_s1, %s2245_s21  ;;  %s1946_s13 = sshll.u32 (%p2325_p3), %s282_s9, 3 }
  0x1a   : > { %v305_v8 = vld [vmem:[%s288_s12] sm:$0x1] (%p2325_p3)  ;;  %v307_v9 = vld [vmem:[%s288_s12 + $0x2] sm:$0x1] (%p2325_p3)  ;;  %v309_v10 = vld [vmem:[%s288_s12 + $0x4] sm:$0x1] (%p2325_p3) }
  0x1b   : > { %s284_s14 = scalar_lea.vmem (%p2325_p3), [#allocation4], %s1946_s13  ;;  %v311_v11 = vld [vmem:[%s288_s12 + $0x6] sm:$0x1] (%p2325_p3)  ;;  %v313_v12 = vld [vmem:[%s288_s12 + $0x8] sm:$0x1] (%p2325_p3) }
  0x1c   : > { %306 = vst [vmem:[%s284_s14] sm:$0x1] (%p2325_p3), %v305_v8  ;;  %v315_v13 = vld [vmem:[%s288_s12 + $0xa] sm:$0x1] (%p2325_p3)  ;;  %v317_v14 = vld [vmem:[%s288_s12 + $0xc] sm:$0x1] (%p2325_p3) }
  0x1d   : > { %308 = vst [vmem:[%s284_s14 + $0x1] sm:$0x1] %v307_v9  ;;  %v319_v15 = vld [vmem:[%s288_s12 + $0xe] sm:$0x1] }
  0x1e   : > { %310 = vst [vmem:[%s284_s14 + $0x2] sm:$0x1] %v309_v10 }
  0x1f   : > { %312 = vst [vmem:[%s284_s14 + $0x3] sm:$0x1] %v311_v11 }
  0x20   : > { %314 = vst [vmem:[%s284_s14 + $0x4] sm:$0x1] %v313_v12 }
  0x21   : > { %316 = vst [vmem:[%s284_s14 + $0x5] sm:$0x1] %v315_v13 }
  0x22   : > { %318 = vst [vmem:[%s284_s14 + $0x6] sm:$0x1] %v317_v14 }
  0x23   : > { %320 = vst [vmem:[%s284_s14 + $0x7] sm:$0x1] %v319_v15 }
  0x24 PF: > { %p1947_p6 = scmp.ge.s32.totalorder %s2249_s22, 1  ;;  %p359_p7 = scmp.lt.s32.totalorder %s2249_s22, 3 }
  0x26   : > { %p360_p8 = pnand %p1947_p6, %p359_p7 }
  0x27   : > { %s366_s15 = sand.u32 (!%p360_p8), 1, %s2233_s18   ;;  %s2254_s28 = smov (!%p360_p8), 32  }
  0x28   : > { %363 = sbr.rel (%p360_p8) target bundleno = 6945 (0x1b21), region = 114  ;;  %s2358_s24 = sshll.u32 (!%p360_p8), %s366_s15, 3 }
  0x29   : > { %s2365_s18 = scalar_lea.vmem (!%p360_p8), [#allocation4], %s2358_s24  ;;  %s2255_s29 = smov (!%p360_p8), 64  }
  0x2a   : > { %s2387_s30 = scalar_lea.vmem (!%p360_p8), [#allocation3], %s2358_s24  ;;  %s2256_s6 = smov (!%p360_p8), 96  }
  0x2b   : > { %s2258_s13 = smov (!%p360_p8), 3   ;;  %s2259_s14 = smov (!%p360_p8), 5  }
  0x2c   : > { %s2260_s15 = smov (!%p360_p8), 125   ;;  %s2261_s16 = smov (!%p360_p8), 4  }
  0x2d   : > { %v2356_v16 = vld [vmem:[%s2863_s2 + $0x8] sm:$0xff]  ;;  %vm420_vm0 = vcmask 253952   ;;  %v2251_v17 = vmov 0   ;;  %v2252_v18 = vmov 0.0   ;;  %v2368_v19 = vld [vmem:[%s2365_s18] sm:$0x1] }
  0x2e   : > { %2080 = vset.pattern.permute.xlu0 %v2251_v17  ;;  %421 = vst.msk [vmem:[#allocation2] sm:$0x1] %vm420_vm0, %v2252_v18  ;;  %2081 = vset.pattern.permute.xlu2 %v2251_v17  ;;  %v2374_v20 = vld [vmem:[%s2863_s2] sm:$0xff]  ;;  %v2253_v21 = vmov 857870592   ;;  %vm457_vm1 = vcmask 261120  }
  0x2f   : > { %467 = vmatpush.bf16.msra.mxu0 %v2356_v16  ;;  %658 = vmatpush.bf16.msra.mxu2 %v2356_v16  ;;  %v513_v22 = vunpack.c.l.s4 %v2253_v21  ;;  %v434_v32 = vld [vmem:[%s2387_s30] sm:$0x1]  ;;  %v2392_v50 = vld [vmem:[%s2365_s18 + $0x1] sm:$0x1]  ;;  %v1972_v3 = vld [vmem:[%s2387_s30 + $0x1] sm:$0x1] }
  0x30   : > { %2082 = vset.pattern.permute.xlu1 %v2251_v17  ;;  %439 = vperm.xlu0 %2080, %v2368_v19   ;;  %v435_v33 = vunpack.c.l.bf16 %v434_v32  ;;  %v635_v4 = vunpack.c.l.bf16 %v1972_v3  ;;  %s2262_s17 = smov 123   ;;  %s2263_s24 = smov 1  }
  0x31   : > { %v514_v26 = vunpack.c.0.s8 %v513_v22  ;;  %p408_p9 = scmp.lt.s32.totalorder %s2241_s20, 1 }
  0x33   : > { %468 = vmatpush.bf16.msra.mxu0 %v2374_v20  ;;  %659 = vmatpush.bf16.msra.mxu2 %v2374_v20  ;;  %s2875_s20 = smov (!%p408_p9, %s2241_s20), 1 }
  0x35   : > { %v433_v23 = vld [vmem:[#allocation2] sm:$0x1] }
  0x37   : > { %828 = vmatpush.bf16.msrb.mxu0 %v2356_v16  ;;  %998 = vmatpush.bf16.msrb.mxu2 %v2356_v16 }
  0x3b   : > { %829 = vmatpush.bf16.msrb.mxu0 %v2374_v20  ;;  %999 = vmatpush.bf16.msrb.mxu2 %v2374_v20 }
  0xa2   : > { %v440_v24 = vpop.permute.xlu0 %439 }
  0xa3   : > { %v442_v25 = vperm.slane %v440_v24, 0 }
  0xa5   : > { %v443_v27 = vmul.f32 %v442_v25, %v433_v23  ;;  %v2407_v25 = vld [vmem:[%s2365_s18 + $0x2] sm:$0x1] }
  0xa7   : > { %v515_v28 = vperm.slane %v443_v27, %v514_v26  ;;  %v444_v29 = vpack.c.bf16 %v443_v27, %v443_v27 }
  0xa9   : > { %516 = vrot.lane.b32.xlu2 %v515_v28, %s2254_s28  ;;  %1959 = vmatmul.msk.bf16.vlgmr.msra.gmra.mxu0 %vm457_vm1, %v444_v29 }
  0xaa   : > { %1168 = vmatpush.bf16.msra.mxu0 %v2356_v16 }
  0xae   : > { %1169 = vmatpush.bf16.msra.mxu0 %v2374_v20 }
  0xb1   : > { %640 = vperm.xlu2 %2081, %v2392_v50  }
 0x103   : > { %v517_v54 = vpop.permute.xlu2 %516 }
 0x10b   : > { %v641_v55 = vpop.permute.xlu2 %640 }
 0x10c   : > { %v643_v60 = vperm.slane %v641_v55, 0 }
 0x126   : > { %v470_v30 = vpop.f32.mrf.mxu0 }
 0x127   : > { %495 = vrot.lane.b32.xlu0 %v470_v30, %s2255_s29  ;;  %v474_v34 = vadd.f32 %v470_v30, %v435_v33 }
 0x129   : > { %v1960_v35 = vmul.f32 -1.442695, %v474_v34 }
 0x12b   : > { %2093 = vpow2.f32 %v1960_v35 }
 0x12e   : > { %v472_v31 = vpop.f32.mrf.mxu0 }
 0x131   : > { %v2094_v36 = vpop.eup %2093 }
 0x132   : > { %v478_v37 = vadd.f32 1.0, %v2094_v36 }
 0x134   : > { %2095 = vrcp.f32 %v478_v37  ;;  %v490_v43 = vand.u32 2147483648, %v478_v37  ;;  %vm484_vm3 = vweird.f32 %v478_v37  ;;  %v488_v44 = vand.u32 2147483647, %v478_v37 }
 0x136   : > { %v491_v46 = vor.u32 1.1754944e-38, %v490_v43  ;;  %vm489_vm5 = vcmp.eq.f32.partialorder %v488_v44, 8.507059e+37 }
 0x13a   : > { %v2096_v38 = vpop.eup %2095 }
 0x13b   : > { %v480_v39 = vmul.f32 %v2096_v38, %v478_v37  ;;  %vm485_vm2 = vweird.f32 %v2096_v38 }
 0x13c   : > { %vm486_vm4 = vmor %vm484_vm3, %vm485_vm2 }
 0x13d   : > { %v481_v40 = vsub.f32 1.0, %v480_v39 }
 0x13f   : > { %v482_v41 = vmul.f32 %v2096_v38, %v481_v40  ;;  %v2420_v40 = vld [vmem:[%s2365_s18 + $0x3] sm:$0x1] }
 0x141   : > { %v483_v42 = vadd.f32 %v2096_v38, %v482_v41 }
 0x143   : > { %v487_v45 = vsel %vm486_vm4, %v2096_v38, %v483_v42  ;;  %v1979_v42 = vld [vmem:[%s2387_s30 + $0x2] sm:$0x1] }
 0x144   : > { %v492_v48 = vsel %vm489_vm5, %v491_v46, %v487_v45  ;;  %v805_v43 = vunpack.c.l.bf16 %v1979_v42 }
 0x145   : > { %v505_v56 = vsub.f32 1.0, %v492_v48  ;;  %v519_v58 = vmul.f32 %v517_v54, %v492_v48 }
 0x199   : > { %v496_v47 = vpop.permute.xlu0 %495 }
 0x19a   : > { %v498_v49 = vmul.f32 %v496_v47, %v492_v48 }
 0x19c   : > { %500 = vrot.lane.b32.xlu1 %v498_v49, %s2255_s29 }
 0x20e   : > { %v501_v51 = vpop.permute.xlu1 %500 }
 0x20f   : > { %v503_v52 = vadd.f32 %v501_v51, %v435_v33 }
 0x211   : > { %2097 = vtanh.f32 %v503_v52 }
 0x217   : > { %v2098_v53 = vpop.eup %2097 }
 0x218   : > { %507 = vrot.lane.b32.xlu1 %v2098_v53, %s2256_s6 }
 0x28a   : > { %v508_v57 = vpop.permute.xlu1 %507 }
 0x28b   : > { %v510_v59 = vmul.f32 %v508_v57, %v505_v56 }
 0x28d   : > { %v2396_v61 = vadd.f32 %v519_v58, %v510_v59 }
 0x28f   : > { %v644_v62 = vmul.f32 %v643_v60, %v2396_v61 }
 0x291   : > { %v645_v63 = vpack.c.bf16 %v644_v62, %v644_v62 }
 0x293   : > { %647 = vrot.lane.b32.xlu0 %v645_v63, %s2256_s6 }
 0x305   : > { %v648_v0 = vpop.permute.xlu0 %647 }
 0x306   : > { %1974 = vmatmul.msk.bf16.vlgmr.msra.gmra.mxu2 %vm457_vm1, %v648_v0 }
 0x307   : > { %1338 = vmatpush.bf16.msra.mxu2 %v2356_v16 }
 0x30b   : > { %1339 = vmatpush.bf16.msra.mxu2 %v2374_v20 }
 0x389   : > { %v661_v1 = vpop.f32.mrf.mxu2 }
 0x38a   : > { %686 = vrot.lane.b32.xlu1 %v661_v1, %s2255_s29  ;;  %v665_v5 = vadd.f32 %v661_v1, %v635_v4 }
 0x38c   : > { %v1975_v6 = vmul.f32 -1.442695, %v665_v5 }
 0x38e   : > { %2099 = vpow2.f32 %v1975_v6 }
 0x391   : > { %v663_v2 = vpop.f32.mrf.mxu2 }
 0x392   : > { %810 = vperm.xlu1 %2082, %v2407_v25  }
 0x394   : > { %v2100_v7 = vpop.eup %2099 }
 0x395   : > { %v669_v8 = vadd.f32 1.0, %v2100_v7 }
 0x397   : > { %2101 = vrcp.f32 %v669_v8  ;;  %v681_v14 = vand.u32 2147483648, %v669_v8  ;;  %vm675_vm7 = vweird.f32 %v669_v8  ;;  %v679_v15 = vand.u32 2147483647, %v669_v8 }
 0x399   : > { %v682_v21 = vor.u32 1.1754944e-38, %v681_v14  ;;  %vm680_vm9 = vcmp.eq.f32.partialorder %v679_v15, 8.507059e+37  ;;  %v1986_v14 = vld [vmem:[%s2387_s30 + $0x3] sm:$0x1] }
 0x39a   : > { %v975_v15 = vunpack.c.l.bf16 %v1986_v14 }
 0x39d   : > { %v2102_v9 = vpop.eup %2101 }
 0x39e   : > { %v671_v10 = vmul.f32 %v2102_v9, %v669_v8  ;;  %vm676_vm6 = vweird.f32 %v2102_v9 }
 0x39f   : > { %vm677_vm8 = vmor %vm675_vm7, %vm676_vm6 }
 0x3a0   : > { %v672_v11 = vsub.f32 1.0, %v671_v10 }
 0x3a2   : > { %v673_v12 = vmul.f32 %v2102_v9, %v672_v11 }
 0x3a4   : > { %v674_v13 = vadd.f32 %v2102_v9, %v673_v12  ;;  %v1994_v12 = vld [vmem:[%s2365_s18 + $0x4] sm:$0x1] }
 0x3a6   : > { %v678_v17 = vsel %vm677_vm8, %v2102_v9, %v674_v13 }
 0x3a7   : > { %v683_v23 = vsel %vm680_vm9, %v682_v21, %v678_v17 }
 0x3a8   : > { %v696_v30 = vsub.f32 1.0, %v683_v23  ;;  %v702_v32 = vmul.f32 %v683_v23, %v644_v62 }
 0x3fc   : > { %v687_v22 = vpop.permute.xlu1 %686 }
 0x3fd   : > { %v689_v24 = vmul.f32 %v687_v22, %v683_v23 }
 0x3ff   : > { %691 = vrot.lane.b32.xlu2 %v689_v24, %s2255_s29 }
 0x404   : > { %v811_v29 = vpop.permute.xlu1 %810 }
 0x405   : > { %v813_v34 = vperm.slane %v811_v29, 0 }
 0x459   : > { %v692_v26 = vpop.permute.xlu2 %691 }
 0x45a   : > { %v694_v27 = vadd.f32 %v692_v26, %v635_v4 }
 0x45c   : > { %2103 = vtanh.f32 %v694_v27 }
 0x462   : > { %v2104_v28 = vpop.eup %2103 }
 0x463   : > { %698 = vrot.lane.b32.xlu0 %v2104_v28, %s2256_s6 }
 0x4d5   : > { %v699_v31 = vpop.permute.xlu0 %698 }
 0x4d6   : > { %v701_v33 = vmul.f32 %v699_v31, %v696_v30 }
 0x4d8   : > { %v2411_v35 = vadd.f32 %v702_v32, %v701_v33 }
 0x4da   : > { %v814_v36 = vmul.f32 %v813_v34, %v2411_v35 }
 0x4dc   : > { %v815_v37 = vpack.c.bf16 %v814_v36, %v814_v36 }
 0x4de   : > { %817 = vrot.lane.b32.xlu2 %v815_v37, %s2256_s6 }
 0x538   : > { %v818_v38 = vpop.permute.xlu2 %817 }
 0x539   : > { %1981 = vmatmul.msk.bf16.vlgmr.msrb.gmra.mxu0 %vm457_vm1, %v818_v38 }
 0x53a   : > { %1508 = vmatpush.bf16.msrb.mxu0 %v2356_v16 }
 0x53e   : > { %1509 = vmatpush.bf16.msrb.mxu0 %v2374_v20 }
 0x5b6   : > { %v831_v39 = vpop.f32.mrf.mxu0 }
 0x5b7   : > { %856 = vrot.lane.b32.xlu0 %v831_v39, %s2255_s29  ;;  %v835_v44 = vadd.f32 %v831_v39, %v805_v43 }
 0x5b9   : > { %v1982_v45 = vmul.f32 -1.442695, %v835_v44 }
 0x5bb   : > { %2105 = vpow2.f32 %v1982_v45 }
 0x5be   : > { %v833_v41 = vpop.f32.mrf.mxu0 }
 0x5bf   : > { %980 = vperm.xlu0 %2080, %v2420_v40  }
 0x5c1   : > { %v2106_v46 = vpop.eup %2105 }
 0x5c2   : > { %v839_v47 = vadd.f32 1.0, %v2106_v46 }
 0x5c4   : > { %2107 = vrcp.f32 %v839_v47  ;;  %v851_v54 = vand.u32 2147483648, %v839_v47  ;;  %vm845_vm11 = vweird.f32 %v839_v47  ;;  %v849_v55 = vand.u32 2147483647, %v839_v47 }
 0x5c6   : > { %v852_v57 = vor.u32 1.1754944e-38, %v851_v54  ;;  %vm850_vm13 = vcmp.eq.f32.partialorder %v849_v55, 8.507059e+37  ;;  %v1993_v54 = vld [vmem:[%s2387_s30 + $0x4] sm:$0x1] }
 0x5c7   : > { %v1145_v55 = vunpack.c.l.bf16 %v1993_v54 }
 0x5ca   : > { %v2108_v48 = vpop.eup %2107 }
 0x5cb   : > { %v841_v49 = vmul.f32 %v2108_v48, %v839_v47  ;;  %vm846_vm10 = vweird.f32 %v2108_v48 }
 0x5cc   : > { %vm847_vm12 = vmor %vm845_vm11, %vm846_vm10 }
 0x5cd   : > { %v842_v51 = vsub.f32 1.0, %v841_v49 }
 0x5cf   : > { %v843_v52 = vmul.f32 %v2108_v48, %v842_v51 }
 0x5d1   : > { %v844_v53 = vadd.f32 %v2108_v48, %v843_v52  ;;  %v2001_v52 = vld [vmem:[%s2365_s18 + $0x5] sm:$0x1] }
 0x5d3   : > { %v848_v56 = vsel %vm847_vm12, %v2108_v48, %v844_v53 }
 0x5d4   : > { %v853_v59 = vsel %vm850_vm13, %v852_v57, %v848_v56 }
 0x5d5   : > { %v866_v1 = vsub.f32 1.0, %v853_v59  ;;  %v872_v4 = vmul.f32 %v853_v59, %v814_v36 }
 0x629   : > { %v857_v58 = vpop.permute.xlu0 %856 }
 0x62a   : > { %v859_v60 = vmul.f32 %v857_v58, %v853_v59 }
 0x62c   : > { %861 = vrot.lane.b32.xlu1 %v859_v60, %s2255_s29 }
 0x631   : > { %v981_v2 = vpop.permute.xlu0 %980 }
 0x632   : > { %v983_v6 = vperm.slane %v981_v2, 0 }
 0x69e   : > { %v862_v62 = vpop.permute.xlu1 %861 }
 0x69f   : > { %v864_v63 = vadd.f32 %v862_v62, %v805_v43 }
 0x6a1   : > { %2109 = vtanh.f32 %v864_v63 }
 0x6a7   : > { %v2110_v0 = vpop.eup %2109 }
 0x6a8   : > { %868 = vrot.lane.b32.xlu2 %v2110_v0, %s2256_s6 }
 0x702   : > { %v869_v3 = vpop.permute.xlu2 %868 }
 0x703   : > { %v871_v5 = vmul.f32 %v869_v3, %v866_v1 }
 0x705   : > { %v2426_v7 = vadd.f32 %v872_v4, %v871_v5 }
 0x707   : > { %v984_v8 = vmul.f32 %v983_v6, %v2426_v7 }
 0x709   : > { %v985_v9 = vpack.c.bf16 %v984_v8, %v984_v8 }
 0x70b   : > { %987 = vrot.lane.b32.xlu1 %v985_v9, %s2256_s6 }
 0x77d   : > { %v988_v10 = vpop.permute.xlu1 %987 }
 0x77e   : > { %1988 = vmatmul.msk.bf16.vlgmr.msrb.gmra.mxu2 %vm457_vm1, %v988_v10 }
 0x77f   : > { %1678 = vmatpush.bf16.msrb.mxu2 %v2356_v16 }
 0x783   : > { %1679 = vmatpush.bf16.msrb.mxu2 %v2374_v20 }
 0x801   : > { %v1001_v11 = vpop.f32.mrf.mxu2 }
 0x802   : > { %1026 = vrot.lane.b32.xlu2 %v1001_v11, %s2255_s29  ;;  %v1005_v17 = vadd.f32 %v1001_v11, %v975_v15 }
 0x804   : > { %v1989_v21 = vmul.f32 -1.442695, %v1005_v17 }
 0x806   : > { %2111 = vpow2.f32 %v1989_v21 }
 0x809   : > { %v1003_v13 = vpop.f32.mrf.mxu2 }
 0x80a   : > { %1150 = vperm.xlu2 %2081, %v1994_v12  }
 0x80c   : > { %v2112_v22 = vpop.eup %2111 }
 0x80d   : > { %v1009_v23 = vadd.f32 1.0, %v2112_v22 }
 0x80f   : > { %2113 = vrcp.f32 %v1009_v23  ;;  %v1021_v20 = vand.u32 2147483648, %v1009_v23  ;;  %vm1015_vm15 = vweird.f32 %v1009_v23  ;;  %v1019_v29 = vand.u32 2147483647, %v1009_v23 }
 0x811   : > { %v1022_v31 = vor.u32 1.1754944e-38, %v1021_v20  ;;  %vm1020_vm3 = vcmp.eq.f32.partialorder %v1019_v29, 8.507059e+37  ;;  %v2000_v29 = vld [vmem:[%s2387_s30 + $0x5] sm:$0x1] }
 0x815   : > { %v2114_v24 = vpop.eup %2113 }
 0x816   : > { %v1011_v26 = vmul.f32 %v2114_v24, %v1009_v23  ;;  %vm1016_vm14 = vweird.f32 %v2114_v24 }
 0x817   : > { %vm1017_vm2 = vmor %vm1015_vm15, %vm1016_vm14 }
 0x818   : > { %v1012_v27 = vsub.f32 1.0, %v1011_v26 }
 0x81a   : > { %v1013_v16 = vmul.f32 %v2114_v24, %v1012_v27 }
 0x81c   : > { %v1014_v28 = vadd.f32 %v2114_v24, %v1013_v16 }
 0x81e   : > { %v1018_v30 = vsel %vm1017_vm2, %v2114_v24, %v1014_v28  ;;  %v2008_v28 = vld [vmem:[%s2365_s18 + $0x6] sm:$0x1]  ;;  %vm553_vm2 = vcmask 40960  }
 0x81f   : > { %v1023_v33 = vsel %vm1020_vm3, %v1022_v31, %v1018_v30  ;;  %v1315_v30 = vunpack.c.l.bf16 %v2000_v29 }
 0x820   : > { %v1036_v39 = vsub.f32 1.0, %v1023_v33  ;;  %v1042_v43 = vmul.f32 %v1023_v33, %v984_v8 }
 0x85c   : > { %v1027_v32 = vpop.permute.xlu2 %1026 }
 0x85d   : > { %v1029_v34 = vmul.f32 %v1027_v32, %v1023_v33 }
 0x85f   : > { %1031 = vrot.lane.b32.xlu0 %v1029_v34, %s2255_s29 }
 0x864   : > { %v1151_v41 = vpop.permute.xlu2 %1150 }
 0x865   : > { %v1153_v45 = vperm.slane %v1151_v41, 0 }
 0x8d1   : > { %v1032_v36 = vpop.permute.xlu0 %1031 }
 0x8d2   : > { %v1034_v37 = vadd.f32 %v1032_v36, %v975_v15 }
 0x8d4   : > { %2115 = vtanh.f32 %v1034_v37 }
 0x8da   : > { %v2116_v38 = vpop.eup %2115 }
 0x8db   : > { %1038 = vrot.lane.b32.xlu1 %v2116_v38, %s2256_s6 }
 0x94d   : > { %v1039_v42 = vpop.permute.xlu1 %1038 }
 0x94e   : > { %v1041_v44 = vmul.f32 %v1039_v42, %v1036_v39 }
 0x950   : > { %v2438_v46 = vadd.f32 %v1042_v43, %v1041_v44 }
 0x952   : > { %v1154_v47 = vmul.f32 %v1153_v45, %v2438_v46 }
 0x954   : > { %v1155_v48 = vpack.c.bf16 %v1154_v47, %v1154_v47 }
 0x956   : > { %1157 = vrot.lane.b32.xlu0 %v1155_v48, %s2256_s6 }
 0x9c8   : > { %v1158_v49 = vpop.permute.xlu0 %1157 }
 0x9c9   : > { %1995 = vmatmul.msk.bf16.vlgmr.msra.gmra.mxu0 %vm457_vm1, %v1158_v49 }
 0xa46   : > { %v1171_v51 = vpop.f32.mrf.mxu0 }
 0xa47   : > { %1196 = vrot.lane.b32.xlu1 %v1171_v51, %s2255_s29  ;;  %v1175_v56 = vadd.f32 %v1171_v51, %v1145_v55 }
 0xa49   : > { %v1996_v57 = vmul.f32 -1.442695, %v1175_v56 }
 0xa4b   : > { %2117 = vpow2.f32 %v1996_v57 }
 0xa4e   : > { %v1173_v53 = vpop.f32.mrf.mxu0 }
 0xa4f   : > { %1320 = vperm.xlu1 %2082, %v2001_v52  }
 0xa51   : > { %v2118_v58 = vpop.eup %2117 }
 0xa52   : > { %v1179_v59 = vadd.f32 1.0, %v2118_v58 }
 0xa54   : > { %2119 = vrcp.f32 %v1179_v59  ;;  %v1191_v2 = vand.u32 2147483648, %v1179_v59  ;;  %vm1185_vm5 = vweird.f32 %v1179_v59  ;;  %v1189_v3 = vand.u32 2147483647, %v1179_v59 }
 0xa56   : > { %v1192_v5 = vor.u32 1.1754944e-38, %v1191_v2  ;;  %vm1190_vm7 = vcmp.eq.f32.partialorder %v1189_v3, 8.507059e+37  ;;  %v2465_v2 = vld [vmem:[%s2365_s18 + $0x7] sm:$0x1] }
 0xa5a   : > { %v2120_v60 = vpop.eup %2119 }
 0xa5b   : > { %v1181_v62 = vmul.f32 %v2120_v60, %v1179_v59  ;;  %vm1186_vm4 = vweird.f32 %v2120_v60 }
 0xa5c   : > { %vm1187_vm6 = vmor %vm1185_vm5, %vm1186_vm4 }
 0xa5d   : > { %v1182_v63 = vsub.f32 1.0, %v1181_v62 }
 0xa5f   : > { %v1183_v0 = vmul.f32 %v2120_v60, %v1182_v63 }
 0xa61   : > { %v1184_v1 = vadd.f32 %v2120_v60, %v1183_v0 }
 0xa63   : > { %v1188_v4 = vsel %vm1187_vm6, %v2120_v60, %v1184_v1 }
 0xa64   : > { %v1193_v8 = vsel %vm1190_vm7, %v1192_v5, %v1188_v4  ;;  %v2007_v4 = vld [vmem:[%s2387_s30 + $0x6] sm:$0x1] }
 0xa65   : > { %v1206_v13 = vsub.f32 1.0, %v1193_v8  ;;  %v1212_v17 = vmul.f32 %v1193_v8, %v1154_v47  ;;  %v1485_v5 = vunpack.c.l.bf16 %v2007_v4 }
 0xab9   : > { %v1197_v6 = vpop.permute.xlu1 %1196 }
 0xaba   : > { %v1199_v9 = vmul.f32 %v1197_v6, %v1193_v8 }
 0xabc   : > { %1201 = vrot.lane.b32.xlu2 %v1199_v9, %s2255_s29 }
 0xac1   : > { %v1321_v14 = vpop.permute.xlu1 %1320 }
 0xac2   : > { %v1323_v22 = vperm.slane %v1321_v14, 0 }
 0xb16   : > { %v1202_v10 = vpop.permute.xlu2 %1201 }
 0xb17   : > { %v1204_v11 = vadd.f32 %v1202_v10, %v1145_v55 }
 0xb19   : > { %2121 = vtanh.f32 %v1204_v11 }
 0xb1f   : > { %v2122_v12 = vpop.eup %2121 }
 0xb20   : > { %1208 = vrot.lane.b32.xlu0 %v2122_v12, %s2256_s6 }
 0xb92   : > { %v1209_v15 = vpop.permute.xlu0 %1208 }
 0xb93   : > { %v1211_v21 = vmul.f32 %v1209_v15, %v1206_v13 }
 0xb95   : > { %v2448_v23 = vadd.f32 %v1212_v17, %v1211_v21 }
 0xb97   : > { %v1324_v24 = vmul.f32 %v1323_v22, %v2448_v23 }
 0xb99   : > { %v1325_v26 = vpack.c.bf16 %v1324_v24, %v1324_v24 }
 0xb9b   : > { %1327 = vrot.lane.b32.xlu2 %v1325_v26, %s2256_s6 }
 0xbf5   : > { %v1328_v27 = vpop.permute.xlu2 %1327 }
 0xbf6   : > { %2002 = vmatmul.msk.bf16.vlgmr.msra.gmra.mxu2 %vm457_vm1, %v1328_v27 }
 0xc79   : > { %v1341_v16 = vpop.f32.mrf.mxu2 }
 0xc7a   : > { %1366 = vrot.lane.b32.xlu0 %v1341_v16, %s2255_s29  ;;  %v1345_v31 = vadd.f32 %v1341_v16, %v1315_v30 }
 0xc7c   : > { %v2003_v32 = vmul.f32 -1.442695, %v1345_v31 }
 0xc7e   : > { %2123 = vpow2.f32 %v2003_v32 }
 0xc81   : > { %v1343_v20 = vpop.f32.mrf.mxu2 }
 0xc82   : > { %1490 = vperm.xlu0 %2080, %v2008_v28  }
 0xc84   : > { %v2124_v33 = vpop.eup %2123 }
 0xc85   : > { %v1349_v34 = vadd.f32 1.0, %v2124_v33 }
 0xc87   : > { %2125 = vrcp.f32 %v1349_v34  ;;  %v1361_v42 = vand.u32 2147483648, %v1349_v34  ;;  %vm1355_vm9 = vweird.f32 %v1349_v34  ;;  %v1359_v43 = vand.u32 2147483647, %v1349_v34 }
 0xc89   : > { %v1362_v45 = vor.u32 1.1754944e-38, %v1361_v42  ;;  %vm1360_vm11 = vcmp.eq.f32.partialorder %v1359_v43, 8.507059e+37  ;;  %v2485_v42 = vld [vmem:[%s2864_s3 + $0x8] sm:$0xff]  ;;  %v2491_v43 = vld [vmem:[%s2864_s3] sm:$0xff] }
 0xc8a   : > { %546 = vmatpush.bf16.msra.mxu1 %v2485_v42  ;;  %717 = vmatpush.bf16.msra.mxu3 %v2485_v42 }
 0xc8d   : > { %v2126_v36 = vpop.eup %2125 }
 0xc8e   : > { %v1351_v37 = vmul.f32 %v2126_v36, %v1349_v34  ;;  %vm1356_vm8 = vweird.f32 %v2126_v36  ;;  %547 = vmatpush.bf16.msra.mxu1 %v2491_v43  ;;  %718 = vmatpush.bf16.msra.mxu3 %v2491_v43 }
 0xc8f   : > { %vm1357_vm10 = vmor %vm1355_vm9, %vm1356_vm8 }
 0xc90   : > { %v1352_v38 = vsub.f32 1.0, %v1351_v37 }
 0xc92   : > { %v1353_v39 = vmul.f32 %v2126_v36, %v1352_v38  ;;  %1057 = vmatpush.bf16.msrb.mxu3 %v2485_v42  ;;  %887 = vmatpush.bf16.msrb.mxu1 %v2485_v42 }
 0xc94   : > { %v1354_v41 = vadd.f32 %v2126_v36, %v1353_v39 }
 0xc96   : > { %v1358_v44 = vsel %vm1357_vm10, %v2126_v36, %v1354_v41  ;;  %v521_v41 = vpack.c.bf16 %v2396_v61, %v2396_v61  ;;  %1058 = vmatpush.bf16.msrb.mxu3 %v2491_v43  ;;  %888 = vmatpush.bf16.msrb.mxu1 %v2491_v43 }
 0xc97   : > { %v1363_v48 = vsel %vm1360_vm11, %v1362_v45, %v1358_v44 }
 0xc98   : > { %v1376_v54 = vsub.f32 1.0, %v1363_v48  ;;  %v1382_v57 = vmul.f32 %v1363_v48, %v1324_v24 }
 0xcec   : > { %v1367_v47 = vpop.permute.xlu0 %1366 }
 0xced   : > { %v1369_v49 = vmul.f32 %v1367_v47, %v1363_v48 }
 0xcef   : > { %1371 = vrot.lane.b32.xlu1 %v1369_v49, %s2255_s29 }
 0xcf4   : > { %v1491_v55 = vpop.permute.xlu0 %1490 }
 0xcf5   : > { %v1493_v59 = vperm.slane %v1491_v55, 0 }
 0xd61   : > { %v1372_v51 = vpop.permute.xlu1 %1371 }
 0xd62   : > { %v1374_v52 = vadd.f32 %v1372_v51, %v1315_v30  ;;  %v2508_v51 = vld [vmem:[%s2865_s4] sm:$0x1] }
 0xd64   : > { %2127 = vtanh.f32 %v1374_v52 }
 0xd6a   : > { %v2128_v53 = vpop.eup %2127 }
 0xd6b   : > { %1378 = vrot.lane.b32.xlu2 %v2128_v53, %s2256_s6 }
 0xdc5   : > { %v1379_v56 = vpop.permute.xlu2 %1378 }
 0xdc6   : > { %v1381_v58 = vmul.f32 %v1379_v56, %v1376_v54  ;;  %v2014_v54 = vld [vmem:[%s2387_s30 + $0x7] sm:$0x1] }
 0xdc7   : > { %v1655_v55 = vunpack.c.l.bf16 %v2014_v54 }
 0xdc8   : > { %v2458_v60 = vadd.f32 %v1382_v57, %v1381_v58 }
 0xdca   : > { %v1494_v62 = vmul.f32 %v1493_v59, %v2458_v60 }
 0xdcc   : > { %v1495_v63 = vpack.c.bf16 %v1494_v62, %v1494_v62 }
 0xdce   : > { %1497 = vrot.lane.b32.xlu1 %v1495_v63, %s2256_s6 }
 0xe40   : > { %v1498_v0 = vpop.permute.xlu1 %1497 }
 0xe41   : > { %2009 = vmatmul.msk.bf16.vlgmr.msrb.gmra.mxu0 %vm457_vm1, %v1498_v0 }
 0xebe   : > { %v1511_v1 = vpop.f32.mrf.mxu0 }
 0xebf   : > { %1536 = vrot.lane.b32.xlu2 %v1511_v1, %s2255_s29  ;;  %v1515_v6 = vadd.f32 %v1511_v1, %v1485_v5 }
 0xec1   : > { %v2010_v8 = vmul.f32 -1.442695, %v1515_v6 }
 0xec3   : > { %2129 = vpow2.f32 %v2010_v8 }
 0xec6   : > { %v1513_v3 = vpop.f32.mrf.mxu0 }
 0xec7   : > { %1660 = vperm.xlu2 %2081, %v2465_v2  }
 0xec9   : > { %v2130_v9 = vpop.eup %2129 }
 0xeca   : > { %v1519_v10 = vadd.f32 1.0, %v2130_v9 }
 0xecc   : > { %2131 = vrcp.f32 %v1519_v10  ;;  %v1531_v17 = vand.u32 2147483648, %v1519_v10  ;;  %vm1525_vm13 = vweird.f32 %v1519_v10  ;;  %v1529_v21 = vand.u32 2147483647, %v1519_v10 }
 0xece   : > { %v1532_v24 = vor.u32 1.1754944e-38, %v1531_v17  ;;  %vm1530_vm15 = vcmp.eq.f32.partialorder %v1529_v21, 8.507059e+37  ;;  %v2257_v21 = vmov 1  }
 0xecf   : > { %2083 = vset.pattern.permute.xlu0 %v2257_v21  ;;  %2084 = vset.pattern.permute.xlu2 %v2257_v21 }
 0xed0   : > { %2085 = vset.pattern.permute.xlu1 %v2257_v21 }
 0xed2   : > { %v2132_v11 = vpop.eup %2131 }
 0xed3   : > { %v1521_v12 = vmul.f32 %v2132_v11, %v1519_v10  ;;  %vm1526_vm12 = vweird.f32 %v2132_v11 }
 0xed4   : > { %vm1527_vm14 = vmor %vm1525_vm13, %vm1526_vm12 }
 0xed5   : > { %v1522_v13 = vsub.f32 1.0, %v1521_v12 }
 0xed7   : > { %v1523_v14 = vmul.f32 %v2132_v11, %v1522_v13 }
 0xed9   : > { %v1524_v15 = vadd.f32 %v2132_v11, %v1523_v14 }
 0xedb   : > { %v1528_v22 = vsel %vm1527_vm14, %v2132_v11, %v1524_v15 }
 0xedc   : > { %v1533_v27 = vsel %vm1530_vm15, %v1532_v24, %v1528_v22 }
 0xedd   : > { %v1546_v30 = vsub.f32 1.0, %v1533_v27  ;;  %v1552_v33 = vmul.f32 %v1533_v27, %v1494_v62 }
 0xf19   : > { %v1537_v26 = vpop.permute.xlu2 %1536 }
 0xf1a   : > { %v1539_v16 = vmul.f32 %v1537_v26, %v1533_v27 }
 0xf1c   : > { %1541 = vrot.lane.b32.xlu0 %v1539_v16, %s2255_s29 }
 0xf21   : > { %v1661_v31 = vpop.permute.xlu2 %1660 }
 0xf22   : > { %v1663_v36 = vperm.slane %v1661_v31, 0  ;;  %v1044_v31 = vpack.c.bf16 %v2438_v46, %v2438_v46 }
 0xf8e   : > { %v1542_v28 = vpop.permute.xlu0 %1541 }
 0xf8f   : > { %v1544_v20 = vadd.f32 %v1542_v28, %v1485_v5 }
 0xf91   : > { %2133 = vtanh.f32 %v1544_v20 }
 0xf97   : > { %v2134_v29 = vpop.eup %2133 }
 0xf98   : > { %1548 = vrot.lane.b32.xlu1 %v2134_v29, %s2256_s6  ;;  %v704_v29 = vpack.c.bf16 %v2411_v35, %v2411_v35  ;;  %v2536_v35 = vperm.slane %v2368_v19, 0 }
0x100a   : > { %v1549_v32 = vpop.permute.xlu1 %1548 }
0x100b   : > { %v1551_v34 = vmul.f32 %v1549_v32, %v1546_v30  ;;  %v1384_v32 = vpack.c.bf16 %v2458_v60, %v2458_v60 }
0x100d   : > { %v2471_v37 = vadd.f32 %v1552_v33, %v1551_v34  ;;  %v1214_v33 = vpack.c.bf16 %v2448_v23, %v2448_v23 }
0x100f   : > { %v2474_v38 = vmul.f32 %v1663_v36, %v2471_v37  ;;  %v1554_v46 = vpack.c.bf16 %v2471_v37, %v2471_v37 }
0x1011   : > { %v1665_v39 = vpack.c.bf16 %v2474_v38, %v2474_v38 }
0x1013   : > { %1667 = vrot.lane.b32.xlu0 %v1665_v39, %s2256_s6 }
0x101b   : > { %523 = vrot.lane.b32.xlu0 %v521_v41, %s2256_s6 }
0x1085   : > { %v1668_v61 = vpop.permute.xlu0 %1667 }
0x1086   : > { %2016 = vmatmul.msk.bf16.vlgmr.msrb.gmra.mxu2 %vm457_vm1, %v1668_v61 }
0x108d   : > { %v524_v44 = vpop.permute.xlu0 %523 }
0x108e   : > { %1969 = vmatmul.msk.bf16.vlgmr.msra.gmra.mxu1 %vm457_vm1, %v524_v44 }
0x108f   : > { %1227 = vmatpush.bf16.msra.mxu1 %v2485_v42 }
0x1093   : > { %1228 = vmatpush.bf16.msra.mxu1 %v2491_v43 }
0x1109   : > { %v1681_v45 = vpop.f32.mrf.mxu2 }
0x110a   : > { %1706 = vrot.lane.b32.xlu1 %v1681_v45, %s2255_s29  ;;  %v1685_v56 = vadd.f32 %v1681_v45, %v1655_v55 }
0x110b   : > { %v549_v47 = vpop.f32.mrf.mxu1 }
0x110c   : > { %v2511_v52 = vadd.f32 %v549_v47, %v2508_v51  ;;  %v2017_v57 = vmul.f32 -1.442695, %v1685_v56 }
0x110e   : > { %v554_v53 = vsel %vm553_vm2, %v2511_v52, -inf  ;;  %2135 = vpow2.f32 %v2017_v57 }
0x1111   : > { %v1683_v48 = vpop.f32.mrf.mxu2 }
0x1113   : > { %v551_v49 = vpop.f32.mrf.mxu1 }
0x1114   : > { %v2136_v58 = vpop.eup %2135 }
0x1115   : > { %v1689_v59 = vadd.f32 1.0, %v2136_v58 }
0x1117   : > { %2137 = vrcp.f32 %v1689_v59  ;;  %v1701_v4 = vand.u32 2147483648, %v1689_v59  ;;  %vm1695_vm4 = vweird.f32 %v1689_v59  ;;  %v1699_v5 = vand.u32 2147483647, %v1689_v59 }
0x1119   : > { %v1702_v8 = vor.u32 1.1754944e-38, %v1701_v4  ;;  %vm1700_vm6 = vcmp.eq.f32.partialorder %v1699_v5, 8.507059e+37 }
0x111d   : > { %v2138_v62 = vpop.eup %2137 }
0x111e   : > { %v1691_v63 = vmul.f32 %v2138_v62, %v1689_v59  ;;  %vm1696_vm3 = vweird.f32 %v2138_v62 }
0x111f   : > { %vm1697_vm5 = vmor %vm1695_vm4, %vm1696_vm3 }
0x1120   : > { %v1692_v0 = vsub.f32 1.0, %v1691_v63 }
0x1122   : > { %v1693_v1 = vmul.f32 %v2138_v62, %v1692_v0 }
0x1124   : > { %v1694_v3 = vadd.f32 %v2138_v62, %v1693_v1 }
0x1126   : > { %v1698_v6 = vsel %vm1697_vm5, %v2138_v62, %v1694_v3 }
0x1127   : > { %v1703_v10 = vsel %vm1700_vm6, %v1702_v8, %v1698_v6 }
0x1128   : > { %v1716_v37 = vsub.f32 1.0, %v1703_v10 }
0x1134   : > { %555 = vmax.xlane.f32.xlu1 %v554_v53 }
0x117c   : > { %v1707_v9 = vpop.permute.xlu1 %1706 }
0x117d   : > { %v1709_v11 = vmul.f32 %v1707_v9, %v1703_v10 }
0x117f   : > { %1711 = vrot.lane.b32.xlu2 %v1709_v11, %s2255_s29 }
0x11a7   : > { %v556_v12 = vpop.xlane.xlu1 %555 }
0x11a8   : > { %v557_v13 = vsub.f32 %v2511_v52, %v556_v12 }
0x11aa   : > { %v558_v14 = vmul.f32 1.442695, %v557_v13 }
0x11ac   : > { %2139 = vpow2.f32 %v558_v14  ;;  %v874_v14 = vpack.c.bf16 %v2426_v7, %v2426_v7 }
0x11b2   : > { %v2140_v15 = vpop.eup %2139 }
0x11b3   : > { %v560_v17 = vsel %vm553_vm2, %v2140_v15, 0.0 }
0x11b4   : > { %561 = vadd.xlane.f32.xlu2 %v560_v17 }
0x11d9   : > { %v1712_v22 = vpop.permute.xlu2 %1711 }
0x11da   : > { %v1714_v20 = vadd.f32 %v1712_v22, %v1655_v55 }
0x1227   : > { %v562_v24 = vpop.xlane.xlu2 %561 }
0x1228   : > { %2141 = vlog2.f32 %v562_v24 }
0x1229   : > { %2143 = vtanh.f32 %v1714_v20 }
0x122e   : > { %v2142_v26 = vpop.eup %2141 }
0x122f   : > { %v564_v27 = vmul.f32 0.6931472, %v2142_v26  ;;  %v2144_v30 = vpop.eup %2143 }
0x1231   : > { %v565_v16 = vadd.f32 %v564_v27, %v556_v12 }
0x1233   : > { %v566_v28 = vsub.f32 %v2511_v52, %v565_v16 }
0x1235   : > { %569 = vrot.lane.b32.xlu0 %v566_v28, %s2258_s13  ;;  %v2578_v28 = vld [vmem:[%s2365_s18 + $0x1] ss:$0 sm:$0xff] }
0x123d   : > { %574 = vperm.xlu0 %2083, %v2368_v19  }
0x1245   : > { %706 = vrot.lane.b32.xlu0 %v704_v29, %s2256_s6 }
0x124d   : > { %1718 = vrot.lane.b32.xlu0 %v2144_v30, %s2256_s6 }
0x1255   : > { %1046 = vrot.lane.b32.xlu0 %v1044_v31, %s2256_s6 }
0x125d   : > { %1386 = vrot.lane.b32.xlu0 %v1384_v32, %s2256_s6 }
0x1265   : > { %1216 = vrot.lane.b32.xlu0 %v1214_v33, %s2256_s6 }
0x126d   : > { %614 = vrot.lane.b32.xlu0 %v2536_v35, %s2259_s14 }
0x1275   : > { %1556 = vrot.lane.b32.xlu0 %v1554_v46, %s2256_s6 }
0x12a7   : > { %v570_v60 = vpop.permute.xlu0 %569 }
0x12a8   : > { %v572_v36 = vmul.f32 %v570_v60, %v2368_v19  ;;  %v1722_v19 = vmul.f32 %v1703_v10, %v2474_v38  ;;  %v1970_v38 = vmul.f32 -1.442695, %v2511_v52 }
0x12aa   : > { %2145 = vpow2.f32 %v1970_v38 }
0x12af   : > { %v575_v34 = vpop.permute.xlu0 %574 }
0x12b0   : > { %v577_v39 = vperm.slane %v575_v34, 0  ;;  %v2146_v54 = vpop.eup %2145 }
0x12b1   : > { %v592_v55 = vadd.f32 1.0, %v2146_v54 }
0x12b2   : > { %v578_v23 = vmul.f32 %v577_v39, %v572_v36 }
0x12b3   : > { %2147 = vrcp.f32 %v592_v55  ;;  %v604_v3 = vand.u32 2147483648, %v592_v55  ;;  %vm598_vm8 = vweird.f32 %v592_v55  ;;  %v602_v4 = vand.u32 2147483647, %v592_v55 }
0x12b4   : > { %v580_v41 = vperm.slane %v578_v23, 0 }
0x12b5   : > { %v605_v5 = vor.u32 1.1754944e-38, %v604_v3  ;;  %vm603_vm10 = vcmp.eq.f32.partialorder %v602_v4, 8.507059e+37 }
0x12b6   : > { %581 = vrot.lane.b32.xlu2 %v580_v41, %s2260_s15 }
0x12b7   : > { %v707_v61 = vpop.permute.xlu0 %706 }
0x12b8   : > { %1976 = vmatmul.msk.bf16.vlgmr.msra.gmra.mxu3 %vm457_vm1, %v707_v61 }
0x12b9   : > { %1397 = vmatpush.bf16.msra.mxu3 %v2485_v42  ;;  %v2148_v56 = vpop.eup %2147 }
0x12ba   : > { %v594_v57 = vmul.f32 %v2148_v56, %v592_v55  ;;  %vm599_vm7 = vweird.f32 %v2148_v56 }
0x12bb   : > { %vm600_vm9 = vmor %vm598_vm8, %vm599_vm7 }
0x12bc   : > { %v595_v58 = vsub.f32 1.0, %v594_v57 }
0x12bd   : > { %1398 = vmatpush.bf16.msra.mxu3 %v2491_v43 }
0x12be   : > { %609 = vrot.lane.b32.xlu2 %v2536_v35, %s2261_s16  ;;  %v596_v59 = vmul.f32 %v2148_v56, %v595_v58  ;;  %v2612_v58 = vld [vmem:[%s2365_s18 + $0x2] ss:$0 sm:$0xff] }
0x12bf   : > { %v1719_v44 = vpop.permute.xlu0 %1718 }
0x12c0   : > { %v1721_v45 = vmul.f32 %v1719_v44, %v1716_v37  ;;  %v597_v0 = vadd.f32 %v2148_v56, %v596_v59 }
0x12c2   : > { %v2551_v47 = vadd.f32 %v1722_v19, %v1721_v45  ;;  %v601_v52 = vsel %vm600_vm9, %v2148_v56, %v597_v0 }
0x12c3   : > { %v606_v6 = vsel %vm603_vm10, %v605_v5, %v601_v52 }
0x12c4   : > { %v1724_v48 = vpack.c.bf16 %v2551_v47, %v2551_v47 }
0x12c6   : > { %1726 = vrot.lane.b32.xlu2 %v1724_v48, %s2256_s6 }
0x12c7   : > { %v1047_v49 = vpop.permute.xlu0 %1046 }
0x12c8   : > { %1990 = vmatmul.msk.bf16.vlgmr.msrb.gmra.mxu3 %vm457_vm1, %v1047_v49 }
0x12c9   : > { %1737 = vmatpush.bf16.msrb.mxu3 %v2485_v42 }
0x12cd   : > { %1738 = vmatpush.bf16.msrb.mxu3 %v2491_v43 }
0x12cf   : > { %v1387_v53 = vpop.permute.xlu0 %1386 }
0x12d7   : > { %v1217_v1 = vpop.permute.xlu0 %1216 }
0x12d8   : > { %2004 = vmatmul.msk.bf16.vlgmr.msra.gmra.mxu3 %vm457_vm1, %v1387_v53 }
0x12df   : > { %v615_v11 = vpop.permute.xlu0 %614 }
0x12e7   : > { %v1557_v31 = vpop.permute.xlu0 %1556 }
0x1310   : > { %v582_v62 = vpop.permute.xlu2 %581 }
0x1311   : > { %v584_v63 = vsel %vm553_vm2, %v582_v62, 0.0  ;;  %v2205_v62 = vld [vmem:[%s2365_s18 + $0x1] sm:$0x1] }
0x1312   : > { %585 = vadd.xlane.f32.xlu1 %v584_v63 }
0x1318   : > { %v610_v8 = vpop.permute.xlu2 %609 }
0x1319   : > { %v612_v9 = vsub.f32 %v606_v6, %v610_v8 }
0x131b   : > { %v613_v10 = vmul.f32 %v612_v9, %v612_v9 }
0x131d   : > { %v2562_v12 = vmul.f32 %v615_v11, %v613_v10  ;;  %v431_v11 = vlaneseq }
0x1320   : > { %v1727_v13 = vpop.permute.xlu2 %1726 }
0x1321   : > { %2018 = vmatmul.msk.bf16.vlgmr.msrb.gmra.mxu3 %vm457_vm1, %v1727_v13  ;;  %v2625_v13 = vshrl.u32 %v431_v11, 7 }
0x1323   : > { %vm789_vm11 = vcmp.eq.s32.totalorder %v2625_v13, 1  ;;  %vm959_vm12 = vcmp.eq.s32.totalorder %v2625_v13, 2  ;;  %vm1129_vm13 = vcmp.eq.s32.totalorder %v2625_v13, 3 }
0x132b   : > { %876 = vrot.lane.b32.xlu1 %v874_v14, %s2256_s6 }
0x133b   : > { %v720_v15 = vpop.f32.mrf.mxu3 }
0x133c   : > { %v2571_v22 = vadd.f32 %v720_v15, %v2508_v51 }
0x133e   : > { %v724_v26 = vsel %vm553_vm2, %v2571_v22, -inf }
0x1343   : > { %v722_v17 = vpop.f32.mrf.mxu3 }
0x134b   : > { %v2568_v21 = vpop.f32.mrf.mxu3 }
0x1353   : > { %v1062_v24 = vpop.f32.mrf.mxu3 }
0x1355   : > { %725 = vmax.xlane.f32.xlu1 %v724_v26 }
0x135b   : > { %v2575_v27 = vpop.f32.mrf.mxu3 }
0x1363   : > { %v1402_v16 = vpop.f32.mrf.mxu3 }
0x136e   : > { %779 = vrot.lane.b32.xlu1 %v2578_v28, %s2261_s16 }
0x1385   : > { %v2582_v7 = vpop.xlane.xlu1 %585 }
0x1386   : > { %v588_v14 = vsub.f32 0.0, %v2582_v7 }
0x1388   : > { %v622_v17 = vperm.slane %v588_v14, 0 }
0x139d   : > { %v877_v20 = vpop.permute.xlu1 %876 }
0x139e   : > { %1983 = vmatmul.msk.bf16.vlgmr.msrb.gmra.mxu1 %vm457_vm1, %v877_v20  ;;  %v2634_v20 = vsel %vm789_vm11, 1.0, %v2252_v18 }
0x139f   : > { %1567 = vmatpush.bf16.msrb.mxu1 %v2485_v42 }
0x13a3   : > { %1568 = vmatpush.bf16.msrb.mxu1 %v2491_v43 }
0x13a4   : > { %v2587_v29 = vpop.f32.mrf.mxu3 }
0x13ac   : > { %v1742_v30 = vpop.f32.mrf.mxu3 }
0x13ae   : > { %1997 = vmatmul.msk.bf16.vlgmr.msra.gmra.mxu1 %vm457_vm1, %v1217_v1 }
0x13be   : > { %2011 = vmatmul.msk.bf16.vlgmr.msrb.gmra.mxu1 %vm457_vm1, %v1557_v31  ;;  %vm619_vm1 = vcmp.eq.s32.totalorder %v2625_v13, 0 }
0x13bf   : > { %v2631_v16 = vsel %vm619_vm1, 1.0, %v2252_v18 }
0x13c0   : > { %v623_v30 = vmul.f32 %v2631_v16, %v622_v17  ;;  %v2206_v17 = vld [vmem:[%s2365_s18 + $0x3] sm:$0x1] }
0x13c8   : > { %v726_v32 = vpop.xlane.xlu1 %725 }
0x13c9   : > { %v727_v33 = vsub.f32 %v2571_v22, %v726_v32 }
0x13cb   : > { %v728_v46 = vmul.f32 1.442695, %v727_v33 }
0x13cd   : > { %2149 = vpow2.f32 %v728_v46 }
0x13d3   : > { %v2150_v60 = vpop.eup %2149 }
0x13d4   : > { %v730_v34 = vsel %vm553_vm2, %v2150_v60, 0.0 }
0x13d5   : > { %731 = vadd.xlane.f32.xlu2 %v730_v34 }
0x13e0   : > { %v2607_v53 = vpop.permute.xlu1 %779 }
0x13ed   : > { %784 = vrot.lane.b32.xlu2 %v2578_v28, %s2259_s14 }
0x141b   : > { %v890_v42 = vpop.f32.mrf.mxu1 }
0x141c   : > { %v2596_v43 = vadd.f32 %v890_v42, %v2508_v51 }
0x141e   : > { %v894_v36 = vsel %vm553_vm2, %v2596_v43, -inf }
0x141f   : > { %895 = vmax.xlane.f32.xlu1 %v894_v36 }
0x1423   : > { %v892_v39 = vpop.f32.mrf.mxu1 }
0x142b   : > { %v2600_v23 = vpop.f32.mrf.mxu1 }
0x1433   : > { %v1232_v41 = vpop.f32.mrf.mxu1 }
0x1434   : > { %v2645_v41 = vadd.f32 %v2568_v21, %v2508_v51 }
0x143b   : > { %v2602_v61 = vpop.f32.mrf.mxu1 }
0x1443   : > { %v1572_v37 = vpop.f32.mrf.mxu1 }
0x1444   : > { %v1064_v37 = vsel %vm553_vm2, %v2645_v41, -inf }
0x1448   : > { %v732_v44 = vpop.xlane.xlu2 %731 }
0x1449   : > { %2151 = vlog2.f32 %v732_v44 }
0x144f   : > { %v2152_v19 = vpop.eup %2151 }
0x1450   : > { %v734_v45 = vmul.f32 0.6931472, %v2152_v19  ;;  %v2619_v4 = vpop.permute.xlu2 %784 }
0x1452   : > { %v735_v48 = vadd.f32 %v734_v45, %v726_v32  ;;  %v2651_v45 = vsel %vm959_vm12, 1.0, %v2252_v18  ;;  %vm1299_vm12 = vcmp.eq.s32.totalorder %v2625_v13, 4 }
0x1454   : > { %v736_v49 = vsub.f32 %v2571_v22, %v735_v48 }
0x1456   : > { %739 = vrot.lane.b32.xlu0 %v736_v49, %s2258_s13 }
0x145e   : > { %744 = vperm.xlu0 %2083, %v2392_v50  }
0x1492   : > { %v896_v38 = vpop.xlane.xlu1 %895 }
0x1493   : > { %v897_v54 = vsub.f32 %v2596_v43, %v896_v38 }
0x1495   : > { %v898_v55 = vmul.f32 1.442695, %v897_v54 }
0x1497   : > { %2153 = vpow2.f32 %v898_v55 }
0x149d   : > { %v2154_v56 = vpop.eup %2153 }
0x149e   : > { %v900_v57 = vsel %vm553_vm2, %v2154_v56, 0.0 }
0x149f   : > { %901 = vadd.xlane.f32.xlu2 %v900_v57  ;;  %v2660_v57 = vadd.f32 %v2602_v61, %v2508_v51 }
0x14b7   : > { %949 = vrot.lane.b32.xlu2 %v2612_v58, %s2261_s16 }
0x14bf   : > { %1084 = vperm.xlu2 %2084, %v2420_v40  }
0x14c8   : > { %v740_v59 = vpop.permute.xlu0 %739 }
0x14c9   : > { %v742_v63 = vmul.f32 %v2205_v62, %v740_v59  ;;  %v1574_v59 = vsel %vm553_vm2, %v2660_v57, -inf }
0x14d0   : > { %v745_v50 = vpop.permute.xlu0 %744 }
0x14d1   : > { %v747_v0 = vperm.slane %v745_v50, 0 }
0x14d3   : > { %v748_v1 = vmul.f32 %v747_v0, %v742_v63 }
0x14d5   : > { %v750_v3 = vperm.slane %v748_v1, 0 }
0x14d7   : > { %751 = vrot.lane.b32.xlu0 %v750_v3, %s2260_s15 }
0x1512   : > { %v902_v52 = vpop.xlane.xlu2 %901 }
0x1513   : > { %2155 = vlog2.f32 %v902_v52  ;;  %v2670_v52 = vadd.f32 %v2600_v23, %v2508_v51 }
0x1515   : > { %v1234_v61 = vsel %vm553_vm2, %v2670_v52, -inf }
0x1519   : > { %v2156_v8 = vpop.eup %2155 }
0x151a   : > { %v904_v9 = vmul.f32 0.6931472, %v2156_v8 }
0x151c   : > { %v905_v40 = vadd.f32 %v904_v9, %v896_v38 }
0x151e   : > { %v906_v10 = vsub.f32 %v2596_v43, %v905_v40  ;;  %v2683_v40 = vpop.permute.xlu2 %949 }
0x1526   : > { %v1085_v11 = vpop.permute.xlu2 %1084 }
0x1527   : > { %v1087_v14 = vperm.slane %v1085_v11, 0 }
0x1549   : > { %v752_v5 = vpop.permute.xlu0 %751 }
0x154a   : > { %v754_v6 = vsel %vm553_vm2, %v752_v5, 0.0  ;;  %v2675_v5 = vld [vmem:[%s2365_s18 + $0x3] ss:$0 sm:$0xff] }
0x154b   : > { %755 = vadd.xlane.f32.xlu0 %v754_v6 }
0x155f   : > { %909 = vrot.lane.b32.xlu0 %v906_v10, %s2258_s13 }
0x1567   : > { %914 = vperm.xlu0 %2083, %v2407_v25  }
0x15be   : > { %v756_v15 = vpop.xlane.xlu0 %755 }
0x15bf   : > { %v758_v24 = vsub.f32 0.0, %v756_v15 }
0x15c1   : > { %v792_v26 = vperm.slane %v758_v24, 0 }
0x15c3   : > { %v793_v31 = vmul.f32 %v2634_v20, %v792_v26 }
0x15c5   : > { %v794_v32 = vadd.f32 %v793_v31, %v623_v30  ;;  %v2690_v31 = vadd.f32 %v2575_v27, %v2508_v51  ;;  %v2699_v27 = vadd.f32 %v2587_v29, %v2508_v51 }
0x15d1   : > { %v910_v7 = vpop.permute.xlu0 %909 }
0x15d2   : > { %v912_v46 = vmul.f32 %v2407_v25, %v910_v7 }
0x15d9   : > { %v915_v33 = vpop.permute.xlu0 %914 }
0x15da   : > { %v917_v60 = vperm.slane %v915_v33, 0 }
0x15dc   : > { %v918_v34 = vmul.f32 %v917_v60, %v912_v46  ;;  %v1404_v46 = vsel %vm553_vm2, %v2690_v31, -inf }
0x15de   : > { %v920_v42 = vperm.slane %v918_v34, 0 }
0x15e0   : > { %921 = vrot.lane.b32.xlu0 %v920_v42, %s2260_s15 }
0x15e8   : > { %954 = vrot.lane.b32.xlu0 %v2612_v58, %s2259_s14 }
0x1652   : > { %v922_v36 = vpop.permute.xlu0 %921 }
0x1653   : > { %v924_v39 = vsel %vm553_vm2, %v922_v36, 0.0 }
0x1654   : > { %925 = vadd.xlane.f32.xlu1 %v924_v39  ;;  %v1744_v39 = vsel %vm553_vm2, %v2699_v27, -inf }
0x165a   : > { %v2664_v50 = vpop.permute.xlu0 %954 }
0x165c   : > { %1065 = vmax.xlane.f32.xlu1 %v1064_v37 }
0x16c7   : > { %v926_v25 = vpop.xlane.xlu1 %925 }
0x16c8   : > { %v928_v44 = vsub.f32 0.0, %v926_v25 }
0x16ca   : > { %v962_v19 = vperm.slane %v928_v44, 0 }
0x16cc   : > { %v963_v48 = vmul.f32 %v2651_v45, %v962_v19 }
0x16ce   : > { %v2654_v49 = vadd.f32 %v963_v48, %v794_v32 }
0x16cf   : > { %v1066_v38 = vpop.xlane.xlu1 %1065 }
0x16d0   : > { %v1067_v21 = vsub.f32 %v2645_v41, %v1066_v38 }
0x16d2   : > { %v1068_v54 = vmul.f32 1.442695, %v1067_v21 }
0x16d4   : > { %2157 = vpow2.f32 %v1068_v54 }
0x16da   : > { %v2158_v55 = vpop.eup %2157 }
0x16db   : > { %v1070_v56 = vsel %vm553_vm2, %v2158_v55, 0.0  ;;  %v1977_v55 = vmul.f32 -1.442695, %v2571_v22 }
0x16dc   : > { %1071 = vadd.xlane.f32.xlu0 %v1070_v56  ;;  %v1984_v56 = vmul.f32 -1.442695, %v2596_v43 }
0x16e4   : > { %1575 = vmax.xlane.f32.xlu0 %v1574_v59 }
0x174f   : > { %v1072_v62 = vpop.xlane.xlu0 %1071 }
0x1750   : > { %2159 = vlog2.f32 %v1072_v62 }
0x1756   : > { %v2160_v63 = vpop.eup %2159 }
0x1757   : > { %v1074_v0 = vmul.f32 0.6931472, %v2160_v63  ;;  %v2679_v6 = vpop.xlane.xlu0 %1575  ;;  %v1991_v63 = vmul.f32 -1.442695, %v2645_v41 }
0x1758   : > { %v1577_v8 = vsub.f32 %v2660_v57, %v2679_v6 }
0x1759   : > { %v1075_v1 = vadd.f32 %v1074_v0, %v1066_v38  ;;  %v2716_v0 = vld [vmem:[%s2365_s18 + $0x4] sm:$0x1] }
0x175a   : > { %v1578_v9 = vmul.f32 1.442695, %v1577_v8 }
0x175b   : > { %v1076_v3 = vsub.f32 %v2645_v41, %v1075_v1 }
0x175c   : > { %2161 = vpow2.f32 %v1578_v9 }
0x175d   : > { %1079 = vrot.lane.b32.xlu1 %v1076_v3, %s2258_s13 }
0x1762   : > { %v2162_v23 = vpop.eup %2161 }
0x1763   : > { %v1580_v10 = vsel %vm553_vm2, %v2162_v23, 0.0 }
0x1787   : > { %1235 = vmax.xlane.f32.xlu1 %v1234_v61 }
0x17a0   : > { %1124 = vrot.lane.b32.xlu1 %v2675_v5, %s2259_s14 }
0x17ca   : > { %1581 = vadd.xlane.f32.xlu1 %v1580_v10 }
0x17cf   : > { %v1080_v15 = vpop.permute.xlu1 %1079 }
0x17d0   : > { %v1082_v24 = vmul.f32 %v2206_v17, %v1080_v15  ;;  %v2721_v15 = vsel %vm1129_vm13, 1.0, %v2252_v18 }
0x17d2   : > { %v1088_v26 = vmul.f32 %v1087_v14, %v1082_v24 }
0x17d4   : > { %v1090_v30 = vperm.slane %v1088_v26, 0 }
0x17d6   : > { %1091 = vrot.lane.b32.xlu2 %v1090_v30, %s2260_s15 }
0x17fa   : > { %v1236_v32 = vpop.xlane.xlu1 %1235 }
0x17fb   : > { %v1237_v7 = vsub.f32 %v2670_v52, %v1236_v32 }
0x17fd   : > { %v1238_v33 = vmul.f32 1.442695, %v1237_v7 }
0x17ff   : > { %2163 = vpow2.f32 %v1238_v33  ;;  %1405 = vmax.xlane.f32.xlu2 %v1404_v46 }
0x1805   : > { %v2164_v60 = vpop.eup %2163 }
0x1806   : > { %v1240_v34 = vsel %vm553_vm2, %v2164_v60, 0.0 }
0x1807   : > { %1241 = vadd.xlane.f32.xlu2 %v1240_v34 }
0x1830   : > { %v1092_v42 = vpop.permute.xlu2 %1091 }
0x1831   : > { %v1094_v36 = vsel %vm553_vm2, %v1092_v42, 0.0 }
0x1832   : > { %1095 = vadd.xlane.f32.xlu0 %v1094_v36 }
0x183a   : > { %1745 = vmax.xlane.f32.xlu0 %v1744_v39 }
0x184e   : > { %1119 = vrot.lane.b32.xlu0 %v2675_v5, %s2261_s16 }
0x1872   : > { %v2705_v37 = vpop.xlane.xlu2 %1405 }
0x1873   : > { %v1407_v25 = vsub.f32 %v2690_v31, %v2705_v37 }
0x1875   : > { %v1408_v44 = vmul.f32 1.442695, %v1407_v25 }
0x1877   : > { %2165 = vpow2.f32 %v1408_v44 }
0x187a   : > { %v1242_v19 = vpop.xlane.xlu2 %1241 }
0x187b   : > { %2167 = vlog2.f32 %v1242_v19 }
0x187c   : > { %2169 = vpow2.f32 %v1977_v55 }
0x187d   : > { %v2166_v48 = vpop.eup %2165  ;;  %2171 = vpow2.f32 %v1984_v56 }
0x187e   : > { %v1410_v51 = vsel %vm553_vm2, %v2166_v48, 0.0  ;;  %2173 = vpow2.f32 %v1991_v63 }
0x187f   : > { %1411 = vadd.xlane.f32.xlu0 %v1410_v51 }
0x1881   : > { %v2168_v29 = vpop.eup %2167 }
0x1882   : > { %v1244_v38 = vmul.f32 0.6931472, %v2168_v29  ;;  %v2170_v59 = vpop.eup %2169 }
0x1883   : > { %v2172_v62 = vpop.eup %2171  ;;  %v762_v1 = vadd.f32 1.0, %v2170_v59 }
0x1884   : > { %v1245_v21 = vadd.f32 %v1244_v38, %v1236_v32  ;;  %v932_v3 = vadd.f32 1.0, %v2172_v62  ;;  %v2174_v22 = vpop.eup %2173 }
0x1885   : > { %2175 = vrcp.f32 %v762_v1  ;;  %v1102_v9 = vadd.f32 1.0, %v2174_v22  ;;  %v774_v34 = vand.u32 2147483648, %v762_v1  ;;  %vm768_vm15 = vweird.f32 %v762_v1 }
0x1886   : > { %v1246_v54 = vsub.f32 %v2670_v52, %v1245_v21  ;;  %2177 = vrcp.f32 %v932_v3  ;;  %v772_v36 = vand.u32 2147483647, %v762_v1  ;;  %v944_v25 = vand.u32 2147483648, %v932_v3 }
0x1887   : > { %2179 = vrcp.f32 %v1102_v9  ;;  %vm938_vm5 = vweird.f32 %v932_v3  ;;  %v775_v51 = vor.u32 1.1754944e-38, %v774_v34  ;;  %v1114_v22 = vand.u32 2147483648, %v1102_v9 }
0x1888   : > { %1249 = vrot.lane.b32.xlu2 %v1246_v54, %s2258_s13  ;;  %vm773_vm7 = vcmp.eq.f32.partialorder %v772_v36, 8.507059e+37  ;;  %v945_v21 = vor.u32 1.1754944e-38, %v944_v25  ;;  %vm1108_vm10 = vweird.f32 %v1102_v9 }
0x188b   : > { %v2176_v61 = vpop.eup %2175 }
0x188c   : > { %v2178_v8 = vpop.eup %2177  ;;  %v764_v43 = vmul.f32 %v2176_v61, %v762_v1  ;;  %vm769_vm14 = vweird.f32 %v2176_v61 }
0x188d   : > { %v934_v23 = vmul.f32 %v2178_v8, %v932_v3  ;;  %v2180_v26 = vpop.eup %2179  ;;  %vm939_vm3 = vweird.f32 %v2178_v8  ;;  %vm770_vm4 = vmor %vm768_vm15, %vm769_vm14 }
0x188e   : > { %v765_v10 = vsub.f32 1.0, %v764_v43  ;;  %v1104_v60 = vmul.f32 %v2180_v26, %v1102_v9  ;;  %vm940_vm6 = vmor %vm938_vm5, %vm939_vm3  ;;  %vm1109_vm9 = vweird.f32 %v2180_v26  ;;  %v1112_v43 = vand.u32 2147483647, %v1102_v9 }
0x188f   : > { %v935_v14 = vsub.f32 1.0, %v934_v23  ;;  %vm1110_vm1 = vmor %vm1108_vm10, %vm1109_vm9 }
0x1890   : > { %v766_v24 = vmul.f32 %v2176_v61, %v765_v10  ;;  %v1105_v48 = vsub.f32 1.0, %v1104_v60  ;;  %v1115_v10 = vor.u32 1.1754944e-38, %v1114_v22  ;;  %vm1113_vm11 = vcmp.eq.f32.partialorder %v1112_v43, 8.507059e+37  ;;  %v2757_v22 = vld [vmem:[%s2365_s18 + $0x4] ss:$0 sm:$0xff] }
0x1891   : > { %v936_v32 = vmul.f32 %v2178_v8, %v935_v14  ;;  %v625_v14 = vperm.slane %v2562_v12, 0 }
0x1892   : > { %v767_v33 = vadd.f32 %v2176_v61, %v766_v24  ;;  %v1106_v55 = vmul.f32 %v2180_v26, %v1105_v48 }
0x1893   : > { %1254 = vperm.xlu0 %2083, %v2716_v0   ;;  %v937_v39 = vadd.f32 %v2178_v8, %v936_v32 }
0x1894   : > { %v771_v19 = vsel %vm770_vm4, %v2176_v61, %v767_v33  ;;  %v626_v33 = vmul.f32 %v2631_v16, %v625_v14 }
0x1895   : > { %v941_v29 = vsel %vm940_vm6, %v2178_v8, %v937_v39  ;;  %v776_v38 = vsel %vm773_vm7, %v775_v51, %v771_v19 }
0x1896   : > { %v782_v54 = vsub.f32 %v776_v38, %v2607_v53 }
0x1898   : > { %v783_v63 = vmul.f32 %v782_v54, %v782_v54 }
0x189a   : > { %v787_v61 = vmul.f32 %v2619_v4, %v783_v63  ;;  %v1125_v4 = vpop.permute.xlu1 %1124 }
0x18a2   : > { %v1582_v39 = vpop.xlane.xlu1 %1581 }
0x18a5   : > { %v1096_v41 = vpop.xlane.xlu0 %1095 }
0x18a6   : > { %v1098_v11 = vsub.f32 0.0, %v1096_v41  ;;  %v795_v41 = vperm.slane %v787_v61, 0 }
0x18a8   : > { %v1132_v17 = vperm.slane %v1098_v11, 0 }
0x18aa   : > { %v1133_v30 = vmul.f32 %v2721_v15, %v1132_v17 }
0x18ac   : > { %v2725_v7 = vadd.f32 %v1133_v30, %v2654_v49  ;;  %v942_v49 = vand.u32 2147483647, %v932_v3  ;;  %v1107_v3 = vadd.f32 %v2180_v26, %v1106_v55  ;;  %v796_v30 = vmul.f32 %v2634_v20, %v795_v41  ;;  %v2209_v41 = vld [vmem:[%s2365_s18 + $0x5] sm:$0x1] }
0x18ad   : > { %v2727_v46 = vpop.xlane.xlu0 %1745 }
0x18ae   : > { %v1747_v42 = vsub.f32 %v2699_v27, %v2727_v46  ;;  %vm943_vm8 = vcmp.eq.f32.partialorder %v942_v49, 8.507059e+37  ;;  %v1111_v23 = vsel %vm1110_vm1, %v2180_v26, %v1107_v3 }
0x18af   : > { %v946_v56 = vsel %vm943_vm8, %v945_v21, %v941_v29  ;;  %vm1469_vm8 = vcmp.eq.s32.totalorder %v2625_v13, 5 }
0x18b0   : > { %v1748_v44 = vmul.f32 1.442695, %v1747_v42  ;;  %v952_v59 = vsub.f32 %v946_v56, %v2683_v40  ;;  %v1116_v40 = vsel %vm1113_vm11, %v1115_v10, %v1111_v23 }
0x18b2   : > { %2181 = vpow2.f32 %v1748_v44  ;;  %v953_v8 = vmul.f32 %v952_v59, %v952_v59 }
0x18b4   : > { %v957_v53 = vmul.f32 %v2664_v50, %v953_v8  ;;  %v797_v50 = vadd.f32 %v796_v30, %v626_v33  ;;  %v2210_v30 = vld [vmem:[%s2365_s18 + $0x7] sm:$0x1] }
0x18b6   : > { %v965_v17 = vperm.slane %v957_v53, 0 }
0x18b8   : > { %v2182_v62 = vpop.eup %2181  ;;  %v966_v9 = vmul.f32 %v2651_v45, %v965_v17  ;;  %v2775_v17 = vld [vmem:[%s2365_s18 + $0x7] ss:$0 sm:$0xff] }
0x18b9   : > { %v1750_v1 = vsel %vm553_vm2, %v2182_v62, 0.0 }
0x18ba   : > { %1751 = vadd.xlane.f32.xlu2 %v1750_v1  ;;  %v967_v34 = vadd.f32 %v966_v9, %v797_v50  ;;  %v1998_v9 = vmul.f32 -1.442695, %v2670_v52  ;;  %v2785_v52 = vsel %vm1299_vm12, 1.0, %v2252_v18 }
0x18c0   : > { %v1120_v11 = vpop.permute.xlu0 %1119 }
0x18c1   : > { %v1122_v24 = vsub.f32 %v1116_v40, %v1120_v11  ;;  %v2768_v40 = vld [vmem:[%s2365_s18 + $0x5] ss:$0 sm:$0xff] }
0x18c3   : > { %v1123_v32 = vmul.f32 %v1122_v24, %v1122_v24 }
0x18c5   : > { %v1127_v60 = vmul.f32 %v1125_v4, %v1123_v32 }
0x18c7   : > { %v1135_v26 = vperm.slane %v1127_v60, 0 }
0x18c9   : > { %v1136_v42 = vmul.f32 %v2721_v15, %v1135_v26  ;;  %v2005_v26 = vmul.f32 -1.442695, %v2690_v31 }
0x18cb   : > { %v2741_v36 = vadd.f32 %v1136_v42, %v967_v34 }
0x18e2   : > { %v1250_v38 = vpop.permute.xlu2 %1249 }
0x18e3   : > { %v1252_v54 = vmul.f32 %v2716_v0, %v1250_v38 }
0x18f2   : > { %v1412_v12 = vpop.xlane.xlu0 %1411 }
0x18f3   : > { %2183 = vlog2.f32 %v1412_v12 }
0x18f4   : > { %2185 = vlog2.f32 %v1582_v39 }
0x18f9   : > { %v2184_v25 = vpop.eup %2183 }
0x18fa   : > { %v1414_v44 = vmul.f32 0.6931472, %v2184_v25  ;;  %v2186_v19 = vpop.eup %2185 }
0x18fb   : > { %v1584_v48 = vmul.f32 0.6931472, %v2186_v19 }
0x18fc   : > { %v1415_v49 = vadd.f32 %v1414_v44, %v2705_v37  ;;  %v2208_v37 = vld [vmem:[%s2365_s18 + $0x6] sm:$0x1] }
0x18fd   : > { %v1585_v29 = vadd.f32 %v1584_v48, %v2679_v6 }
0x18fe   : > { %v1416_v51 = vsub.f32 %v2690_v31, %v1415_v49 }
0x18ff   : > { %v1586_v56 = vsub.f32 %v2660_v57, %v1585_v29 }
0x1900   : > { %1419 = vrot.lane.b32.xlu0 %v1416_v51, %s2258_s13 }
0x1905   : > { %v1255_v21 = vpop.permute.xlu0 %1254 }
0x1906   : > { %v1257_v55 = vperm.slane %v1255_v21, 0 }
0x1908   : > { %v1258_v59 = vmul.f32 %v1257_v55, %v1252_v54  ;;  %1589 = vrot.lane.b32.xlu0 %v1586_v56, %s2258_s13 }
0x190a   : > { %v1260_v62 = vperm.slane %v1258_v59, 0 }
0x190c   : > { %1261 = vrot.lane.b32.xlu1 %v1260_v62, %s2260_s15 }
0x1914   : > { %1594 = vperm.xlu1 %2085, %v2208_v37  }
0x191c   : > { %1764 = vperm.xlu1 %2085, %v2465_v2  }
0x192d   : > { %v1752_v63 = vpop.xlane.xlu2 %1751 }
0x192e   : > { %2187 = vlog2.f32 %v1752_v63 }
0x192f   : > { %2189 = vpow2.f32 %v1998_v9 }
0x1934   : > { %v2188_v6 = vpop.eup %2187 }
0x1935   : > { %v1754_v1 = vmul.f32 0.6931472, %v2188_v6  ;;  %v2190_v60 = vpop.eup %2189 }
0x1936   : > { %v1272_v50 = vadd.f32 1.0, %v2190_v60 }
0x1937   : > { %v1755_v0 = vadd.f32 %v1754_v1, %v2727_v46 }
0x1938   : > { %2191 = vrcp.f32 %v1272_v50  ;;  %v1284_v29 = vand.u32 2147483648, %v1272_v50  ;;  %vm1278_vm14 = vweird.f32 %v1272_v50  ;;  %v1282_v38 = vand.u32 2147483647, %v1272_v50 }
0x1939   : > { %v1756_v3 = vsub.f32 %v2699_v27, %v1755_v0  ;;  %2193 = vpow2.f32 %v2005_v26 }
0x193a   : > { %v1285_v59 = vor.u32 1.1754944e-38, %v1284_v29  ;;  %vm1283_vm3 = vcmp.eq.f32.partialorder %v1282_v38, 8.507059e+37 }
0x193b   : > { %1759 = vrot.lane.b32.xlu0 %v1756_v3, %s2258_s13 }
0x193e   : > { %v2192_v34 = vpop.eup %2191 }
0x193f   : > { %v2194_v42 = vpop.eup %2193  ;;  %v1274_v39 = vmul.f32 %v2192_v34, %v1272_v50  ;;  %vm1279_vm13 = vweird.f32 %v2192_v34 }
0x1940   : > { %v1442_v12 = vadd.f32 1.0, %v2194_v42  ;;  %vm1280_vm15 = vmor %vm1278_vm14, %vm1279_vm13 }
0x1941   : > { %v1275_v25 = vsub.f32 1.0, %v1274_v39 }
0x1942   : > { %2195 = vrcp.f32 %v1442_v12  ;;  %vm1448_vm5 = vweird.f32 %v1442_v12 }
0x1943   : > { %1289 = vrot.lane.b32.xlu0 %v2757_v22, %s2261_s16  ;;  %v1276_v44 = vmul.f32 %v2192_v34, %v1275_v25 }
0x1945   : > { %v1277_v48 = vadd.f32 %v2192_v34, %v1276_v44 }
0x1947   : > { %v1281_v54 = vsel %vm1280_vm15, %v2192_v34, %v1277_v48  ;;  %v2019_v48 = vmul.f32 -1.442695, %v2699_v27  ;;  %vm1639_vm15 = vcmp.eq.s32.totalorder %v2625_v13, 6 }
0x1948   : > { %v2196_v31 = vpop.eup %2195  ;;  %v1286_v1 = vsel %vm1283_vm3, %v1285_v59, %v1281_v54  ;;  %vm1809_vm3 = vcmp.eq.s32.totalorder %v2625_v13, 7 }
0x1949   : > { %v1444_v56 = vmul.f32 %v2196_v31, %v1442_v12  ;;  %vm1449_vm4 = vweird.f32 %v2196_v31 }
0x194a   : > { %vm1450_vm6 = vmor %vm1448_vm5, %vm1449_vm4  ;;  %vm1838_vm4 = vcmask 7168   ;;  %vm1840_vm5 = vcmask 15360  }
0x1972   : > { %v1420_v61 = vpop.permute.xlu0 %1419 }
0x1973   : > { %v1422_v63 = vmul.f32 %v2209_v41, %v1420_v61 }
0x197a   : > { %v1590_v43 = vpop.permute.xlu0 %1589 }
0x197b   : > { %v1592_v46 = vmul.f32 %v2208_v37, %v1590_v43 }
0x197e   : > { %v1262_v8 = vpop.permute.xlu1 %1261 }
0x197f   : > { %v1264_v2 = vsel %vm553_vm2, %v1262_v8, 0.0  ;;  %v1445_v8 = vsub.f32 1.0, %v1444_v56 }
0x1980   : > { %1265 = vadd.xlane.f32.xlu2 %v1264_v2 }
0x1986   : > { %v1595_v53 = vpop.permute.xlu1 %1594 }
0x1987   : > { %v1597_v23 = vperm.slane %v1595_v53, 0  ;;  %v1446_v53 = vmul.f32 %v2196_v31, %v1445_v8 }
0x1989   : > { %v2762_v10 = vmul.f32 %v1597_v23, %v1592_v46 }
0x198b   : > { %v1600_v50 = vperm.slane %v2762_v10, 0 }
0x198e   : > { %v1765_v11 = vpop.permute.xlu1 %1764 }
0x198f   : > { %v1767_v24 = vperm.slane %v1765_v11, 0  ;;  %v2793_v11 = vld [vmem:[%s2365_s18 + $0x6] ss:$0 sm:$0xff]  ;;  %s1950_s18 = sshll.u32 %s2875_s20, 3 }
0x1990   : > { %s414_s28 = scalar_lea.vmem %s2866_s5, %s1950_s18 }
0x1998   : > { %1424 = vperm.xlu2 %2084, %v2209_v41   ;;  %v1452_v41 = vand.u32 2147483647, %v1442_v12 }
0x199a   : > { %vm1453_vm7 = vcmp.eq.f32.partialorder %v1452_v41, 8.507059e+37 }
0x19a0   : > { %1294 = vrot.lane.b32.xlu2 %v2757_v22, %s2259_s14 }
0x19a8   : > { %1459 = vrot.lane.b32.xlu2 %v2768_v40, %s2261_s16 }
0x19ad   : > { %v1760_v14 = vpop.permute.xlu0 %1759 }
0x19ae   : > { %v1762_v32 = vmul.f32 %v2210_v30, %v1760_v14  ;;  %v1447_v14 = vadd.f32 %v2196_v31, %v1446_v53 }
0x19b0   : > { %1464 = vrot.lane.b32.xlu2 %v2768_v40, %s2259_s14  ;;  %v1768_v4 = vmul.f32 %v1767_v24, %v1762_v32  ;;  %v1454_v24 = vand.u32 2147483648, %v1442_v12  ;;  %v1451_v32 = vsel %vm1450_vm6, %v2196_v31, %v1447_v14  ;;  %vm1842_vm6 = vcmask 23552  }
0x19b2   : > { %v1770_v33 = vperm.slane %v1768_v4, 0  ;;  %v1455_v4 = vor.u32 1.1754944e-38, %v1454_v24 }
0x19b4   : > { %v1456_v9 = vsel %vm1453_vm7, %v1455_v4, %v1451_v32  ;;  %v971_v32 = vmul.f32 %v2612_v58, %v2651_v45  ;;  %v1311_v58 = vmul.f32 %v2757_v22, %v2785_v52 }
0x19b5   : > { %v1290_v62 = vpop.permute.xlu0 %1289 }
0x19b6   : > { %v1292_v0 = vsub.f32 %v1286_v1, %v1290_v62 }
0x19b8   : > { %1799 = vrot.lane.b32.xlu2 %v2775_v17, %s2261_s16  ;;  %v1293_v43 = vmul.f32 %v1292_v0, %v1292_v0 }
0x19c0   : > { %1771 = vrot.lane.b32.xlu2 %v1770_v33, %s2260_s15 }
0x19f3   : > { %v1266_v19 = vpop.xlane.xlu2 %1265 }
0x19f4   : > { %v1268_v49 = vsub.f32 0.0, %v1266_v19 }
0x19f6   : > { %v1302_v51 = vperm.slane %v1268_v49, 0  ;;  %v2012_v49 = vmul.f32 -1.442695, %v2660_v57 }
0x19f8   : > { %v1303_v21 = vmul.f32 %v2785_v52, %v1302_v51  ;;  %2197 = vpow2.f32 %v2012_v49 }
0x19f9   : > { %2199 = vpow2.f32 %v2019_v48 }
0x19fa   : > { %v2789_v55 = vadd.f32 %v1303_v21, %v2725_v7 }
0x19fb   : > { %v1425_v37 = vpop.permute.xlu2 %1424 }
0x19fc   : > { %v1427_v6 = vperm.slane %v1425_v37, 0 }
0x19fe   : > { %v1428_v3 = vmul.f32 %v1427_v6, %v1422_v63  ;;  %v2198_v51 = vpop.eup %2197 }
0x19ff   : > { %v1612_v31 = vadd.f32 1.0, %v2198_v51  ;;  %v2200_v29 = vpop.eup %2199 }
0x1a00   : > { %v1430_v2 = vperm.slane %v1428_v3, 0  ;;  %v1782_v38 = vadd.f32 1.0, %v2200_v29 }
0x1a01   : > { %2201 = vrcp.f32 %v1612_v31  ;;  %v1624_v0 = vand.u32 2147483648, %v1612_v31  ;;  %vm1618_vm10 = vweird.f32 %v1612_v31  ;;  %v1622_v3 = vand.u32 2147483647, %v1612_v31 }
0x1a02   : > { %1431 = vrot.lane.b32.xlu1 %v1430_v2, %s2260_s15  ;;  %2203 = vrcp.f32 %v1782_v38  ;;  %v1794_v41 = vand.u32 2147483648, %v1782_v38  ;;  %vm1788_vm13 = vweird.f32 %v1782_v38  ;;  %v1792_v4 = vand.u32 2147483647, %v1782_v38 }
0x1a03   : > { %v1295_v46 = vpop.permute.xlu2 %1294  ;;  %vm1623_vm11 = vcmp.eq.f32.partialorder %v1622_v3, 8.507059e+37 }
0x1a04   : > { %v1297_v7 = vmul.f32 %v1295_v46, %v1293_v43  ;;  %v1625_v43 = vor.u32 1.1754944e-38, %v1624_v0  ;;  %v631_v46 = vmul.f32 %v2631_v16, %v2536_v35 }
0x1a06   : > { %v1305_v23 = vperm.slane %v1297_v7, 0  ;;  %v801_v7 = vmul.f32 %v2578_v28, %v2634_v20 }
0x1a07   : > { %v2202_v21 = vpop.eup %2201 }
0x1a08   : > { %v1306_v61 = vmul.f32 %v2785_v52, %v1305_v23  ;;  %v1614_v54 = vmul.f32 %v2202_v21, %v1612_v31  ;;  %v2204_v37 = vpop.eup %2203  ;;  %vm1619_vm9 = vweird.f32 %v2202_v21 }
0x1a09   : > { %v1784_v63 = vmul.f32 %v2204_v37, %v1782_v38  ;;  %vm1620_vm1 = vmor %vm1618_vm10, %vm1619_vm9  ;;  %vm1789_vm12 = vweird.f32 %v2204_v37 }
0x1a0a   : > { %v1307_v30 = vadd.f32 %v1306_v61, %v2741_v36  ;;  %1629 = vrot.lane.b32.xlu1 %v2793_v11, %s2261_s16  ;;  %v2803_v36 = vsel %vm1469_vm8, 1.0, %v2252_v18  ;;  %v1615_v62 = vsub.f32 1.0, %v1614_v54  ;;  %vm1790_vm14 = vmor %vm1788_vm13, %vm1789_vm12 }
0x1a0b   : > { %v1460_v33 = vpop.permute.xlu2 %1459  ;;  %v1785_v1 = vsub.f32 1.0, %v1784_v63 }
0x1a0c   : > { %v1462_v60 = vsub.f32 %v1456_v9, %v1460_v33  ;;  %v1616_v57 = vmul.f32 %v2202_v21, %v1615_v62  ;;  %v1795_v33 = vor.u32 1.1754944e-38, %v1794_v41  ;;  %v1141_v9 = vmul.f32 %v2675_v5, %v2721_v15 }
0x1a0d   : > { %v1786_v8 = vmul.f32 %v2204_v37, %v1785_v1  ;;  %v1481_v5 = vmul.f32 %v2768_v40, %v2803_v36  ;;  %v1824_v40 = vperm.slane %v2551_v47, 0 }
0x1a0e   : > { %v1463_v26 = vmul.f32 %v1462_v60, %v1462_v60  ;;  %v1617_v27 = vadd.f32 %v2202_v21, %v1616_v57 }
0x1a0f   : > { %v1787_v24 = vadd.f32 %v2204_v37, %v1786_v8 }
0x1a10   : > { %v1621_v2 = vsel %vm1620_vm1, %v2202_v21, %v1617_v27 }
0x1a11   : > { %v1626_v14 = vsel %vm1623_vm11, %v1625_v43, %v1621_v2  ;;  %v1791_v35 = vsel %vm1790_vm14, %v2204_v37, %v1787_v24 }
0x1a12   : > { %1601 = vrot.lane.b32.xlu1 %v1600_v50, %s2260_s15 }
0x1a13   : > { %v1465_v34 = vpop.permute.xlu2 %1464 }
0x1a14   : > { %v1467_v42 = vmul.f32 %v1465_v34, %v1463_v26 }
0x1a16   : > { %v1475_v39 = vperm.slane %v1467_v42, 0  ;;  %v2013_v42 = vsel %vm1639_vm15, 1.0, %v2252_v18 }
0x1a17   : > { %v1651_v48 = vmul.f32 %v2793_v11, %v2013_v42 }
0x1a18   : > { %v1476_v12 = vmul.f32 %v2803_v36, %v1475_v39 }
0x1a1a   : > { %v2806_v25 = vadd.f32 %v1476_v12, %v1307_v30  ;;  %1634 = vrot.lane.b32.xlu1 %v2793_v11, %s2259_s14  ;;  %v802_v30 = vadd.f32 %v801_v7, %v631_v46 }
0x1a1b   : > { %v1800_v10 = vpop.permute.xlu2 %1799 }
0x1a1c   : > { %v972_v20 = vadd.f32 %v971_v32, %v802_v30 }
0x1a1e   : > { %v1142_v34 = vadd.f32 %v1141_v9, %v972_v20 }
0x1a22   : > { %1804 = vrot.lane.b32.xlu1 %v2775_v17, %s2259_s14 }
0x1a23   : > { %v1772_v44 = vpop.permute.xlu2 %1771 }
0x1a24   : > { %v1774_v19 = vsel %vm553_vm2, %v1772_v44, 0.0  ;;  %v1312_v44 = vadd.f32 %v1311_v58, %v1142_v34 }
0x1a26   : > { %v1482_v51 = vadd.f32 %v1481_v5, %v1312_v44 }
0x1a28   : > { %v1652_v13 = vadd.f32 %v1651_v48, %v1482_v51 }
0x1a4c   : > { %1775 = vadd.xlane.f32.xlu1 %v1774_v19 }
0x1a74   : > { %v1432_v56 = vpop.permute.xlu1 %1431 }
0x1a75   : > { %v1434_v59 = vsel %vm553_vm2, %v1432_v56, 0.0 }
0x1a76   : > { %1435 = vadd.xlane.f32.xlu0 %v1434_v59 }
0x1a7c   : > { %v1630_v6 = vpop.permute.xlu1 %1629 }
0x1a7d   : > { %v1632_v61 = vsub.f32 %v1626_v14, %v1630_v6 }
0x1a7f   : > { %v1633_v16 = vmul.f32 %v1632_v61, %v1632_v61 }
0x1a84   : > { %v1602_v53 = vpop.permute.xlu1 %1601 }
0x1a85   : > { %v1604_v23 = vsel %vm553_vm2, %v1602_v53, 0.0  ;;  %vm1793_vm2 = vcmp.eq.f32.partialorder %v1792_v4, 8.507059e+37 }
0x1a86   : > { %1605 = vadd.xlane.f32.xlu2 %v1604_v23  ;;  %v1796_v50 = vsel %vm1793_vm2, %v1795_v33, %v1791_v35 }
0x1a87   : > { %v1802_v26 = vsub.f32 %v1796_v50, %v1800_v10  ;;  %v2020_v10 = vsel %vm1809_vm3, 1.0, %v2252_v18 }
0x1a88   : > { %v1821_v29 = vmul.f32 %v2775_v17, %v2020_v10 }
0x1a89   : > { %v1803_v39 = vmul.f32 %v1802_v26, %v1802_v26 }
0x1a8a   : > { %v1822_v38 = vadd.f32 %v1821_v29, %v1652_v13 }
0x1a8c   : > { %v1635_v28 = vpop.permute.xlu1 %1634 }
0x1a8d   : > { %v1637_v60 = vmul.f32 %v1635_v28, %v1633_v16 }
0x1a8f   : > { %v1645_v45 = vperm.slane %v1637_v60, 0 }
0x1a91   : > { %v1646_v15 = vmul.f32 %v2013_v42, %v1645_v45 }
0x1a93   : > { %v1647_v22 = vadd.f32 %v1646_v15, %v2806_v25 }
0x1a94   : > { %v1805_v12 = vpop.permute.xlu1 %1804 }
0x1a95   : > { %v1807_v19 = vmul.f32 %v1805_v12, %v1803_v39 }
0x1a97   : > { %v1815_v49 = vperm.slane %v1807_v19, 0 }
0x1a99   : > { %v1816_v52 = vmul.f32 %v2020_v10, %v1815_v49 }
0x1a9b   : > { %v1817_v31 = vadd.f32 %v1816_v52, %v1647_v22 }
0x1a9d   : > { %1831 = vrot.lane.b32.xlu0 %v1817_v31, %s2262_s17 }
0x1aa5   : > { %1835 = vrot.lane.b32.xlu0 %v1822_v38, %s2263_s24 }
0x1aad   : > { %1825 = vrot.lane.b32.xlu0 %v1824_v40, %s2256_s6 }
0x1abf   : > { %v1776_v56 = vpop.xlane.xlu1 %1775 }
0x1ac0   : > { %v1778_v62 = vsub.f32 0.0, %v1776_v56 }
0x1ac2   : > { %v1812_v63 = vperm.slane %v1778_v62, 0 }
0x1ac4   : > { %v1813_v1 = vmul.f32 %v2020_v10, %v1812_v63 }
0x1ae9   : > { %v1436_v18 = vpop.xlane.xlu0 %1435 }
0x1aea   : > { %v1438_v25 = vsub.f32 0.0, %v1436_v18 }
0x1aec   : > { %v1472_v54 = vperm.slane %v1438_v25, 0 }
0x1aee   : > { %v1473_v37 = vmul.f32 %v2803_v36, %v1472_v54 }
0x1af0   : > { %v1474_v57 = vadd.f32 %v1473_v37, %v2789_v55 }
0x1af9   : > { %v1606_v11 = vpop.xlane.xlu2 %1605 }
0x1afa   : > { %v1608_v21 = vsub.f32 0.0, %v1606_v11 }
0x1afc   : > { %v1642_v59 = vperm.slane %v1608_v21, 0 }
0x1afe   : > { %v1643_v17 = vmul.f32 %v2013_v42, %v1642_v59 }
0x1b00   : > { %v1644_v47 = vadd.f32 %v1643_v17, %v1474_v57 }
0x1b02   : > { %v1814_v27 = vadd.f32 %v1813_v1, %v1644_v47 }
0x1b0f   : > { %v1832_v6 = vpop.permute.xlu0 %1831 }
0x1b10   : > { %v1839_v0 = vsel %vm1838_vm4, %v1814_v27, %v1832_v6 }
0x1b17   : > { %v1836_v36 = vpop.permute.xlu0 %1835 }
0x1b18   : > { %v1841_v3 = vsel %vm1840_vm5, %v1839_v0, %v1836_v36 }
0x1b19   : > { %1843 = vst.msk [vmem:[%s414_s28] sm:$0xff] %vm1842_vm6, %v1841_v3 }
0x1b1f   : > { %v1826_v8 = vpop.permute.xlu0 %1825 }
0x1b20   : > { %1829 = vst.msk [vmem:[#allocation2] sm:$0x1] %vm420_vm0, %v1826_v8 }
0x1b21 PF: > { %s15_s22 = sadd.s32 1, %s2249_s22   ;;  %s2868_s18 = smov %s2237_s19 }
0x1b22   : > { %p12_p10 = scmp.ge.s32.totalorder %s15_s22, 4   ;;  %s2869_s19 = smov %s2333_s27 }
0x1b23   : > { %s2870_s20 = smov %s2245_s21  ;;  %s2871_s21 = smov %s2873_s23 }
0x1b24   :  { %14 = sbr.rel (!%p12_p10) target bundleno = 3 (0x3), region = 183 }

</bundles_post_ra>
